<compile_context>
chip_gen: v7x
topology: tpu7x:2x2x1
jax: 0.10.0
libtpu: 0.0.40
codegen_flags: <defaults>
</compile_context>

<pallas_src>
import functools
import math

import numpy as np

import jax
import jax.numpy as jnp
from jax.experimental import pallas as pl
from jax.experimental.pallas import tpu as pltpu


_TARGET_LANES = 256   # pack slabs until the lane axis is ~2 MXU tiles wide
_PALLAS_MIN_HW = 16   # deep tiny levels run in plain XLA


def _gaussian_1d(window_size, sigma=1.5):
    """Matches torch gaussian(): normalized 1D gaussian (float32)."""
    g = np.array(
        [math.exp(-((x - window_size // 2) ** 2) / float(2 * sigma ** 2))
         for x in range(window_size)],
        dtype=np.float32)
    return g / g.sum()


def _conv_matrices(H, W, win):
    """Banded matrices so that valid-conv2d(x, outer(g,g)) == ghT @ x @ gw."""
    g = _gaussian_1d(win, 1.5)
    Ho, Wo = H - win + 1, W - win + 1
    ghT = np.zeros((Ho, H), np.float32)
    for k in range(Ho):
        ghT[k, k:k + win] = g
    gw = np.zeros((W, Wo), np.float32)
    for l in range(Wo):
        gw[l:l + win, l] = g
    return ghT, gw


def _pool_matrices(H, W):
    """Banded matrices so that avg_pool2d(x, (2,2)) == phT @ x @ pw."""
    H2, W2 = H // 2, W // 2
    phT = np.zeros((H2, H), np.float32)
    for k in range(H2):
        phT[k, 2 * k] = 0.5
        phT[k, 2 * k + 1] = 0.5
    pw = np.zeros((W, W2), np.float32)
    for l in range(W2):
        pw[2 * l, l] = 0.5
        pw[2 * l + 1, l] = 0.5
    return phT, pw


def _vmem_limit_bytes():
    """Per-generation scoped-VMEM budget (v7x only has 64 MiB/TC)."""
    cap = 64 * 1024 * 1024
    try:
        cap = int(pltpu.get_tpu_info().vmem_capacity_bytes)
    except Exception:
        pass
    return int(min(int(0.7 * cap), 100 * 1024 * 1024))


def _pack(x, NB, P):
    """(NC, H, W) -> (NB, H, P*W): P slabs side by side along the lane axis."""
    NC, H, W = x.shape
    pad = NB * P - NC
    if pad:
        x = jnp.concatenate([x, jnp.zeros((pad, H, W), x.dtype)], axis=0)
    return x.reshape(NB, P, H, W).transpose(0, 2, 1, 3).reshape(NB, H, P * W)


def _unpack(y, NC, P):
    """(NB, H2, P*W2) -> (NC, H2, W2) (inverse of _pack's column grouping)."""
    NB, H2, PW2 = y.shape
    W2 = PW2 // P
    y = y.reshape(NB, H2, P, W2).transpose(0, 2, 1, 3).reshape(NB * P, H2, W2)
    return y[:NC]


def _make_level_kernel(P, Wo, W2, compute_pool):
    """Kernel for one block of P lane-packed channel slabs of one level."""
    PWo = P * Wo
    PW2 = P * W2

    def kernel(c_ref, i1_ref, i2_ref, ghT_ref, gw5_ref, mmean_ref, *rest):
        if compute_pool:
            phT_ref, pw2_ref, ssim_ref, cs_ref, pooled_ref, rng_ref = rest
        else:
            ssim_ref, cs_ref = rest

        a = i1_ref[0]          # (H, P*W) f32
        b = i2_ref[0]

        # Batched separable Gaussian conv: one row-stage matmul over the
        # lane-concatenated {a, b, a*a, b*b, a*b}, then one column-stage
        # matmul against a block-diagonal gw (5*P independent column groups).
        x = jnp.concatenate([a, b, a * a, b * b, a * b], axis=1)        # (H, 5PW)
        t = jnp.dot(ghT_ref[...], x, preferred_element_type=jnp.float32)     # (Ho, 5PW)
        y = jnp.dot(t, gw5_ref[...], preferred_element_type=jnp.float32)     # (Ho, 5PWo)

        mu1 = y[:, 0 * PWo:1 * PWo]
        mu2 = y[:, 1 * PWo:2 * PWo]
        s11 = y[:, 2 * PWo:3 * PWo]
        s22 = y[:, 3 * PWo:4 * PWo]
        s12 = y[:, 4 * PWo:5 * PWo]

        mu1_sq = mu1 * mu1
        mu2_sq = mu2 * mu2
        mu1_mu2 = mu1 * mu2
        sigma1_sq = s11 - mu1_sq
        sigma2_sq = s22 - mu2_sq
        sigma12 = s12 - mu1_mu2

        C1 = c_ref[0]
        C2 = c_ref[1]
        v1 = 2.0 * sigma12 + C2
        v2 = sigma1_sq + sigma2_sq + C2
        # Approx reciprocals run on the EUP (otherwise-idle slot); introduces a
        # tiny relative delta vs. the exact f32 divide of the torch reference.
        cs_map = v1 * pl.reciprocal(v2, approx=True)
        lum = (2.0 * mu1_mu2 + C1) * pl.reciprocal(mu1_sq + mu2_sq + C1,
                                                   approx=True)
        ssim_map = lum * cs_map

        # Per-slab means via a (P*Wo, P) group-mean matrix; zero-padded slabs
        # in the last block end up in lanes that the wrapper slices away.
        mm = mmean_ref[...]
        ssim_means = jnp.sum(
            jnp.dot(ssim_map, mm, preferred_element_type=jnp.float32),
            axis=0, keepdims=True)                                       # (1, P)
        cs_means = jnp.sum(
            jnp.dot(cs_map, mm, preferred_element_type=jnp.float32),
            axis=0, keepdims=True)
        ssim_ref[...] = ssim_means[None]
        cs_ref[...] = cs_means[None]

        if compute_pool:
            # Fused 2x2 avg-pool of both images for the next pyramid level.
            xp = jnp.concatenate([a, b], axis=1)                          # (H, 2PW)
            tp = jnp.dot(phT_ref[...], xp, preferred_element_type=jnp.float32)
            yp = jnp.dot(tp, pw2_ref[...], preferred_element_type=jnp.float32)
            pooled_ref[...] = yp[None]
            # max/min of pooled img1 for the next level's dynamic-range check.
            # (Zero-padded slabs cannot flip the >128 / <-0.5 classification.)
            p1 = yp[:, :PW2]
            rng_ref[...] = jnp.concatenate(
                [jnp.full((1, 1, 1), jnp.max(p1), jnp.float32),
                 jnp.full((1, 1, 1), jnp.min(p1), jnp.float32)], axis=2)

    return kernel


def _ssim_level_pallas(a, b, c1, c2, window_size, compute_pool):
    """One SSIM level via Pallas. Returns (ssim, cs, pooled1, pooled2, rng)."""
    NC, H, W = a.shape
    win = min(window_size, H, W)    # matches torch: real_size = min(ws, h, w)
    Ho, Wo = H - win + 1, W - win + 1
    H2, W2 = H // 2, W // 2

    # Lane packing factor: pack slabs until ~_TARGET_LANES lanes per block.
    P = max(1, min(NC, _TARGET_LANES // W))
    NB = -(-NC // P)

    ghT_np, gw_np = _conv_matrices(H, W, win)
    phT_np, pw_np = _pool_matrices(H, W)
    gw5_np = np.kron(np.eye(5 * P, dtype=np.float32), gw_np)      # (5PW, 5PWo)
    pw2_np = np.kron(np.eye(2 * P, dtype=np.float32), pw_np)      # (2PW, 2PW2)
    mmean_np = np.kron(np.eye(P, dtype=np.float32),
                       np.full((Wo, 1), 1.0 / (Ho * Wo), np.float32))  # (PWo, P)

    a_p = _pack(a.astype(jnp.float32), NB, P)
    b_p = _pack(b.astype(jnp.float32), NB, P)
    cvals = jnp.stack([c1, c2]).astype(jnp.float32)

    kernel = _make_level_kernel(P, Wo, W2, compute_pool)

    in_specs = [
        pl.BlockSpec((1, H, P * W), lambda bb, cc: (bb, 0, 0)),   # img1 block
        pl.BlockSpec((1, H, P * W), lambda bb, cc: (bb, 0, 0)),   # img2 block
        pl.BlockSpec((Ho, H), lambda bb, cc: (0, 0)),             # ghT
        pl.BlockSpec((5 * P * W, 5 * P * Wo), lambda bb, cc: (0, 0)),  # gw (bd)
        pl.BlockSpec((P * Wo, P), lambda bb, cc: (0, 0)),         # group means
    ]
    const_inputs = [jnp.asarray(ghT_np), jnp.asarray(gw5_np), jnp.asarray(mmean_np)]
    out_shape = [jax.ShapeDtypeStruct((NB, 1, P), jnp.float32),
                 jax.ShapeDtypeStruct((NB, 1, P), jnp.float32)]
    out_specs = [pl.BlockSpec((1, 1, P), lambda bb, cc: (bb, 0, 0)),
                 pl.BlockSpec((1, 1, P), lambda bb, cc: (bb, 0, 0))]
    if compute_pool:
        in_specs += [pl.BlockSpec((H2, H), lambda bb, cc: (0, 0)),             # phT
                     pl.BlockSpec((2 * P * W, 2 * P * W2), lambda bb, cc: (0, 0))]  # pw (bd)
        const_inputs += [jnp.asarray(phT_np), jnp.asarray(pw2_np)]
        out_shape += [jax.ShapeDtypeStruct((NB, H2, 2 * P * W2), jnp.float32),
                      jax.ShapeDtypeStruct((NB, 1, 2), jnp.float32)]
        out_specs += [pl.BlockSpec((1, H2, 2 * P * W2), lambda bb, cc: (bb, 0, 0)),
                      pl.BlockSpec((1, 1, 2), lambda bb, cc: (bb, 0, 0))]

    grid_spec = pltpu.PrefetchScalarGridSpec(
        num_scalar_prefetch=1,
        grid=(NB,),
        in_specs=in_specs,
        out_specs=tuple(out_specs),
    )

    outs = pl.pallas_call(
        kernel,
        grid_spec=grid_spec,
        out_shape=tuple(out_shape),
        compiler_params=pltpu.CompilerParams(
            # Independent blocks; lets v7x megacore shard the NB axis.
            dimension_semantics=("parallel",),
            vmem_limit_bytes=_vmem_limit_bytes(),
        ),
    )(cvals, a_p, b_p, *const_inputs)

    if compute_pool:
        ssim_p, cs_p, pooled, rng = outs
    else:
        ssim_p, cs_p = outs

    # Every slab has the same Ho*Wo count, so the mean of per-slab means equals
    # the global mean over (N, C, Ho, Wo) — matching torch.
    ssim_mean = jnp.mean(ssim_p.reshape(-1)[:NC])
    cs_mean = jnp.mean(cs_p.reshape(-1)[:NC])
    if not compute_pool:
        return ssim_mean, cs_mean, None, None, None

    a_next = _unpack(pooled[:, :, :P * W2], NC, P)
    b_next = _unpack(pooled[:, :, P * W2:], NC, P)
    rng_max = jnp.max(rng[:, 0, 0])
    rng_min = jnp.min(rng[:, 0, 1])
    return ssim_mean, cs_mean, a_next, b_next, (rng_max, rng_min)


def _ssim_level_xla(a, b, c1, c2, window_size, compute_pool):
    """Plain-XLA SSIM level for tiny deep levels (launch-overhead bound)."""
    NC, H, W = a.shape
    win = min(window_size, H, W)
    ghT_np, gw_np = _conv_matrices(H, W, win)
    ghT = jnp.asarray(ghT_np)
    gw = jnp.asarray(gw_np)

    def conv(x):
        t = jnp.einsum('oh,nhw->now', ghT, x)
        return jnp.einsum('now,wp->nop', t, gw)

    mu1, mu2 = conv(a), conv(b)
    s11, s22, s12 = conv(a * a), conv(b * b), conv(a * b)
    mu1_sq, mu2_sq, mu1_mu2 = mu1 * mu1, mu2 * mu2, mu1 * mu2
    sigma1_sq = s11 - mu1_sq
    sigma2_sq = s22 - mu2_sq
    sigma12 = s12 - mu1_mu2
    v1 = 2.0 * sigma12 + c2
    v2 = sigma1_sq + sigma2_sq + c2
    cs_map = v1 / v2
    ssim_map = (2.0 * mu1_mu2 + c1) / (mu1_sq + mu2_sq + c1) * cs_map
    sim = jnp.mean(ssim_map)
    cs = jnp.mean(cs_map)
    if not compute_pool:
        return sim, cs, None, None, None
    H2, W2 = H // 2, W // 2
    pa = a[:, :2 * H2, :2 * W2].reshape(NC, H2, 2, W2, 2).mean(axis=(2, 4))
    pb = b[:, :2 * H2, :2 * W2].reshape(NC, H2, 2, W2, 2).mean(axis=(2, 4))
    return sim, cs, pa, pb, (jnp.max(pa), jnp.min(pa))


@functools.partial(jax.jit, static_argnames=("window_size", "size_average"))
def msssim_pallas(img1, img2, window_size=11, size_average=True):
    # TODO(synk): only the size_average=True / normalize=False paths (the
    # module forward defaults) are implemented.
    weights = jnp.array([0.0448, 0.2856, 0.3001, 0.2363, 0.1333], jnp.float32)
    levels = int(weights.shape[0])

    N, C, H, W = img1.shape
    a = img1.reshape(N * C, H, W).astype(jnp.float32)
    b = img2.reshape(N * C, H, W).astype(jnp.float32)

    # Level-0 dynamic-range detection (from img1 only, as in the reference);
    # later levels reuse the pooled-image max/min emitted by the kernel.
    cur_max = jnp.max(a)
    cur_min = jnp.min(a)

    sims, css = [], []
    for lvl in range(levels):
        max_val = jnp.where(cur_max > 128.0, 255.0, 1.0)
        min_val = jnp.where(cur_min < -0.5, -1.0, 0.0)
        L = max_val - min_val
        c1 = (0.01 * L) ** 2
        c2 = (0.03 * L) ** 2

        last = lvl == levels - 1
        Hl, Wl = a.shape[1], a.shape[2]
        level_fn = (_ssim_level_pallas if min(Hl, Wl) >= _PALLAS_MIN_HW
                    else _ssim_level_xla)
        sim, cs, a_next, b_next, rng = level_fn(
            a, b, c1, c2, window_size, compute_pool=not last)
        sims.append(sim)
        css.append(cs)
        if not last:
            a, b = a_next, b_next
            cur_max, cur_min = rng

    mssim = jnp.stack(sims)
    mcs = jnp.stack(css)
    # Note: negative cs/ssim raised to fractional weights can produce NaN —
    # identical behavior to the normalize=False torch reference.
    pow1 = mcs ** weights
    pow2 = mssim ** weights
    return jnp.prod(pow1[:-1]) * pow2[-1]


class MSSSIM:
    """JAX/Pallas port of the PyTorch MSSSIM module (forward pass)."""

    def __init__(self, window_size=11, size_average=True, channel=3):
        self.window_size = window_size
        self.size_average = size_average
        self.channel = channel

    def __call__(self, img1, img2):
        return msssim_pallas(img1, img2,
                             window_size=self.window_size,
                             size_average=self.size_average)


if __name__ == "__main__":
    key = jax.random.PRNGKey(0)
    k1, k2 = jax.random.split(key)
    # Spatial size 32 so all 5 MS-SSIM pyramid levels (down to 2x2) are valid,
    # mirroring the PyTorch module's requirements.
    img1 = jax.random.uniform(k1, (2, 3, 32, 32), dtype=jnp.float32)
    img2 = jax.random.uniform(k2, (2, 3, 32, 32), dtype=jnp.float32)

    model = MSSSIM(window_size=11, size_average=True, channel=3)
    out = jax.block_until_ready(model(img1, img2))
    assert out.shape == () and bool(jnp.isfinite(out)), out
    print("KERNEL_OK")
</pallas_src>

<mosaic_0001>
module attributes {stable_mosaic.version = 11 : i64} {
  func.func @kernel(%arg0: i32, %arg1: memref<2xf32, #tpu.memory_space<smem>>, %arg2: memref<1x32x192xf32, #tpu.memory_space<vmem>>, %arg3: memref<1x32x192xf32, #tpu.memory_space<vmem>>, %arg4: memref<22x32xf32, #tpu.memory_space<vmem>>, %arg5: memref<960x660xf32, #tpu.memory_space<vmem>>, %arg6: memref<132x6xf32, #tpu.memory_space<vmem>>, %arg7: memref<16x32xf32, #tpu.memory_space<vmem>>, %arg8: memref<384x192xf32, #tpu.memory_space<vmem>>, %arg9: memref<1x1x6xf32, #tpu.memory_space<vmem>>, %arg10: memref<1x1x6xf32, #tpu.memory_space<vmem>>, %arg11: memref<1x16x192xf32, #tpu.memory_space<vmem>>, %arg12: memref<1x1x2xf32, #tpu.memory_space<vmem>>) attributes {dimension_semantics = [#tpu.dimension_semantics<parallel>], iteration_bounds = array<i64: 1>, scalar_prefetch = 1 : i64, scratch_operands = 0 : i64, tpu.core_type = #tpu.core_type<tc>, window_params = [{transform_indices = @transform_0, window_bounds = array<i64: 1, 32, 192>}, {transform_indices = @transform_1, window_bounds = array<i64: 1, 32, 192>}, {pipeline_mode = #tpu.pipeline_mode<synchronous>, transform_indices = @transform_2, window_bounds = array<i64: 22, 32>}, {pipeline_mode = #tpu.pipeline_mode<synchronous>, transform_indices = @transform_3, window_bounds = array<i64: 960, 660>}, {pipeline_mode = #tpu.pipeline_mode<synchronous>, transform_indices = @transform_4, window_bounds = array<i64: 132, 6>}, {pipeline_mode = #tpu.pipeline_mode<synchronous>, transform_indices = @transform_5, window_bounds = array<i64: 16, 32>}, {pipeline_mode = #tpu.pipeline_mode<synchronous>, transform_indices = @transform_6, window_bounds = array<i64: 384, 192>}, {transform_indices = @transform_7, window_bounds = array<i64: 1, 1, 6>}, {transform_indices = @transform_8, window_bounds = array<i64: 1, 1, 6>}, {transform_indices = @transform_9, window_bounds = array<i64: 1, 16, 192>}, {transform_indices = @transform_10, window_bounds = array<i64: 1, 1, 2>}]} {
    %c0 = arith.constant 0 : index
    %c0_0 = arith.constant 0 : index
    %c0_1 = arith.constant 0 : index
    %0 = vector.load %arg2[%c0, %c0_0, %c0_1] : memref<1x32x192xf32, #tpu.memory_space<vmem>>, vector<1x32x192xf32>
    %1 = vector.shape_cast %0 : vector<1x32x192xf32> to vector<32x192xf32>
    %c0_2 = arith.constant 0 : index
    %c0_3 = arith.constant 0 : index
    %c0_4 = arith.constant 0 : index
    %2 = vector.load %arg3[%c0_2, %c0_3, %c0_4] : memref<1x32x192xf32, #tpu.memory_space<vmem>>, vector<1x32x192xf32>
    %3 = vector.shape_cast %2 : vector<1x32x192xf32> to vector<32x192xf32>
    %4 = arith.mulf %1, %1 : vector<32x192xf32>
    %5 = arith.mulf %3, %3 : vector<32x192xf32>
    %6 = arith.mulf %1, %3 : vector<32x192xf32>
    %7 = tpu.concatenate %1, %3, %4, %5, %6 in 1 : vector<32x192xf32>, vector<32x192xf32>, vector<32x192xf32>, vector<32x192xf32>, vector<32x192xf32> -> vector<32x960xf32>
    %c0_5 = arith.constant 0 : index
    %c0_6 = arith.constant 0 : index
    %8 = vector.load %arg4[%c0_5, %c0_6] : memref<22x32xf32, #tpu.memory_space<vmem>>, vector<22x32xf32>
    %cst = arith.constant dense<0.000000e+00> : vector<22x960xf32>
    %9 = tpu.matmul %8, %7, %cst {dimension_numbers = #tpu.dot_dimension_numbers<[1], [0], [0], [1], [0, 0, 1, 1], [], []>} : vector<22x32xf32>, vector<32x960xf32>, vector<22x960xf32> -> vector<22x960xf32>
    %c0_7 = arith.constant 0 : index
    %c0_8 = arith.constant 0 : index
    %10 = vector.load %arg5[%c0_7, %c0_8] : memref<960x660xf32, #tpu.memory_space<vmem>>, vector<960x660xf32>
    %cst_9 = arith.constant dense<0.000000e+00> : vector<22x660xf32>
    %11 = tpu.matmul %9, %10, %cst_9 {dimension_numbers = #tpu.dot_dimension_numbers<[1], [0], [0], [1], [0, 0, 1, 1], [], []>} : vector<22x960xf32>, vector<960x660xf32>, vector<22x660xf32> -> vector<22x660xf32>
    %12 = vector.extract_strided_slice %11 {offsets = [0, 0], sizes = [22, 132], strides = [1, 1]} : vector<22x660xf32> to vector<22x132xf32>
    %13 = vector.extract_strided_slice %11 {offsets = [0, 132], sizes = [22, 132], strides = [1, 1]} : vector<22x660xf32> to vector<22x132xf32>
    %14 = vector.extract_strided_slice %11 {offsets = [0, 264], sizes = [22, 132], strides = [1, 1]} : vector<22x660xf32> to vector<22x132xf32>
    %15 = vector.extract_strided_slice %11 {offsets = [0, 396], sizes = [22, 132], strides = [1, 1]} : vector<22x660xf32> to vector<22x132xf32>
    %16 = vector.extract_strided_slice %11 {offsets = [0, 528], sizes = [22, 132], strides = [1, 1]} : vector<22x660xf32> to vector<22x132xf32>
    %17 = arith.mulf %12, %12 : vector<22x132xf32>
    %18 = arith.mulf %13, %13 : vector<22x132xf32>
    %19 = arith.mulf %12, %13 : vector<22x132xf32>
    %20 = arith.subf %14, %17 : vector<22x132xf32>
    %21 = arith.subf %15, %18 : vector<22x132xf32>
    %22 = arith.subf %16, %19 : vector<22x132xf32>
    %c0_10 = arith.constant 0 : index
    %23 = memref.load %arg1[%c0_10] : memref<2xf32, #tpu.memory_space<smem>>
    %c1 = arith.constant 1 : index
    %24 = memref.load %arg1[%c1] : memref<2xf32, #tpu.memory_space<smem>>
    %cst_11 = arith.constant 2.000000e+00 : f32
    %25 = vector.broadcast %cst_11 : f32 to vector<22x132xf32>
    %26 = arith.mulf %25, %22 : vector<22x132xf32>
    %27 = vector.broadcast %24 : f32 to vector<22x132xf32>
    %28 = arith.addf %26, %27 : vector<22x132xf32>
    %29 = arith.addf %20, %21 : vector<22x132xf32>
    %30 = vector.broadcast %24 : f32 to vector<22x132xf32>
    %31 = arith.addf %29, %30 : vector<22x132xf32>
    %32 = tpu.reciprocal %31 {approx = true} : vector<22x132xf32> -> vector<22x132xf32>
    %33 = arith.mulf %28, %32 : vector<22x132xf32>
    %cst_12 = arith.constant 2.000000e+00 : f32
    %34 = vector.broadcast %cst_12 : f32 to vector<22x132xf32>
    %35 = arith.mulf %34, %19 : vector<22x132xf32>
    %36 = vector.broadcast %23 : f32 to vector<22x132xf32>
    %37 = arith.addf %35, %36 : vector<22x132xf32>
    %38 = arith.addf %17, %18 : vector<22x132xf32>
    %39 = vector.broadcast %23 : f32 to vector<22x132xf32>
    %40 = arith.addf %38, %39 : vector<22x132xf32>
    %41 = tpu.reciprocal %40 {approx = true} : vector<22x132xf32> -> vector<22x132xf32>
    %42 = arith.mulf %37, %41 : vector<22x132xf32>
    %43 = arith.mulf %42, %33 : vector<22x132xf32>
    %c0_13 = arith.constant 0 : index
    %c0_14 = arith.constant 0 : index
    %44 = vector.load %arg6[%c0_13, %c0_14] : memref<132x6xf32, #tpu.memory_space<vmem>>, vector<132x6xf32>
    %cst_15 = arith.constant dense<0.000000e+00> : vector<22x6xf32>
    %45 = tpu.matmul %43, %44, %cst_15 {dimension_numbers = #tpu.dot_dimension_numbers<[1], [0], [0], [1], [0, 0, 1, 1], [], []>} : vector<22x132xf32>, vector<132x6xf32>, vector<22x6xf32> -> vector<22x6xf32>
    %cst_16 = arith.constant dense<0.000000e+00> : vector<6xf32>
    %46 = vector.multi_reduction <add>, %45, %cst_16 [0] : vector<22x6xf32> to vector<6xf32>
    %47 = vector.shape_cast %46 : vector<6xf32> to vector<1x6xf32>
    %cst_17 = arith.constant dense<0.000000e+00> : vector<22x6xf32>
    %48 = tpu.matmul %33, %44, %cst_17 {dimension_numbers = #tpu.dot_dimension_numbers<[1], [0], [0], [1], [0, 0, 1, 1], [], []>} : vector<22x132xf32>, vector<132x6xf32>, vector<22x6xf32> -> vector<22x6xf32>
    %cst_18 = arith.constant dense<0.000000e+00> : vector<6xf32>
    %49 = vector.multi_reduction <add>, %48, %cst_18 [0] : vector<22x6xf32> to vector<6xf32>
    %50 = vector.shape_cast %49 : vector<6xf32> to vector<1x6xf32>
    %51 = vector.shape_cast %47 : vector<1x6xf32> to vector<1x1x6xf32>
    %c0_19 = arith.constant 0 : index
    %c0_20 = arith.constant 0 : index
    %c0_21 = arith.constant 0 : index
    %52 = vector.load %arg9[%c0_19, %c0_20, %c0_21] : memref<1x1x6xf32, #tpu.memory_space<vmem>>, vector<1x1x6xf32>
    tpu.vector_store %arg9[%c0_19, %c0_20, %c0_21], %51 {strides = array<i32>} : memref<1x1x6xf32, #tpu.memory_space<vmem>>, vector<1x1x6xf32>,
    %53 = vector.shape_cast %50 : vector<1x6xf32> to vector<1x1x6xf32>
    %c0_22 = arith.constant 0 : index
    %c0_23 = arith.constant 0 : index
    %c0_24 = arith.constant 0 : index
    %54 = vector.load %arg10[%c0_22, %c0_23, %c0_24] : memref<1x1x6xf32, #tpu.memory_space<vmem>>, vector<1x1x6xf32>
    tpu.vector_store %arg10[%c0_22, %c0_23, %c0_24], %53 {strides = array<i32>} : memref<1x1x6xf32, #tpu.memory_space<vmem>>, vector<1x1x6xf32>,
    %55 = tpu.concatenate %1, %3 in 1 : vector<32x192xf32>, vector<32x192xf32> -> vector<32x384xf32>
    %c0_25 = arith.constant 0 : index
    %c0_26 = arith.constant 0 : index
    %56 = vector.load %arg7[%c0_25, %c0_26] : memref<16x32xf32, #tpu.memory_space<vmem>>, vector<16x32xf32>
    %cst_27 = arith.constant dense<0.000000e+00> : vector<16x384xf32>
    %57 = tpu.matmul %56, %55, %cst_27 {dimension_numbers = #tpu.dot_dimension_numbers<[1], [0], [0], [1], [0, 0, 1, 1], [], []>} : vector<16x32xf32>, vector<32x384xf32>, vector<16x384xf32> -> vector<16x384xf32>
    %c0_28 = arith.constant 0 : index
    %c0_29 = arith.constant 0 : index
    %58 = vector.load %arg8[%c0_28, %c0_29] : memref<384x192xf32, #tpu.memory_space<vmem>>, vector<384x192xf32>
    %cst_30 = arith.constant dense<0.000000e+00> : vector<16x192xf32>
    %59 = tpu.matmul %57, %58, %cst_30 {dimension_numbers = #tpu.dot_dimension_numbers<[1], [0], [0], [1], [0, 0, 1, 1], [], []>} : vector<16x384xf32>, vector<384x192xf32>, vector<16x192xf32> -> vector<16x192xf32>
    %60 = vector.shape_cast %59 : vector<16x192xf32> to vector<1x16x192xf32>
    %c0_31 = arith.constant 0 : index
    %c0_32 = arith.constant 0 : index
    %c0_33 = arith.constant 0 : index
    %61 = vector.load %arg11[%c0_31, %c0_32, %c0_33] : memref<1x16x192xf32, #tpu.memory_space<vmem>>, vector<1x16x192xf32>
    tpu.vector_store %arg11[%c0_31, %c0_32, %c0_33], %60 {strides = array<i32>} : memref<1x16x192xf32, #tpu.memory_space<vmem>>, vector<1x16x192xf32>,
    %62 = vector.extract_strided_slice %59 {offsets = [0, 0], sizes = [16, 96], strides = [1, 1]} : vector<16x192xf32> to vector<16x96xf32>
    %63 = vector.shape_cast %62 : vector<16x96xf32> to vector<1x16x96xf32>
    %cst_34 = arith.constant dense<0xFF800000> : vector<1xf32>
    %64 = vector.multi_reduction <maximumf>, %63, %cst_34 [1, 2] : vector<1x16x96xf32> to vector<1xf32>
    %65 = vector.shape_cast %64 : vector<1xf32> to vector<1x1x1xf32>
    %66 = vector.extract %65[0, 0, 0] : f32 from vector<1x1x1xf32>
    %67 = vector.broadcast %66 : f32 to vector<1x1x1xf32>
    %68 = vector.shape_cast %62 : vector<16x96xf32> to vector<1x16x96xf32>
    %cst_35 = arith.constant dense<0x7F800000> : vector<1xf32>
    %69 = vector.multi_reduction <minimumf>, %68, %cst_35 [1, 2] : vector<1x16x96xf32> to vector<1xf32>
    %70 = vector.shape_cast %69 : vector<1xf32> to vector<1x1x1xf32>
    %71 = vector.extract %70[0, 0, 0] : f32 from vector<1x1x1xf32>
    %72 = vector.broadcast %71 : f32 to vector<1x1x1xf32>
    %73 = tpu.concatenate %67, %72 in 2 : vector<1x1x1xf32>, vector<1x1x1xf32> -> vector<1x1x2xf32>
    %c0_36 = arith.constant 0 : index
    %c0_37 = arith.constant 0 : index
    %c0_38 = arith.constant 0 : index
    %74 = vector.load %arg12[%c0_36, %c0_37, %c0_38] : memref<1x1x2xf32, #tpu.memory_space<vmem>>, vector<1x1x2xf32>
    tpu.vector_store %arg12[%c0_36, %c0_37, %c0_38], %73 {strides = array<i32>} : memref<1x1x2xf32, #tpu.memory_space<vmem>>, vector<1x1x2xf32>,
    return
  }
  func.func @transform_0(%arg0: i32, %arg1: memref<2xf32, #tpu.memory_space<smem>>) -> (i32, i32, i32) {
    %c0_i32 = arith.constant 0 : i32
    %c0_i32_0 = arith.constant 0 : i32
    %c0_i32_1 = arith.constant 0 : i32
    return %arg0, %c0_i32, %c0_i32_0 : i32, i32, i32
  }
  func.func @transform_1(%arg0: i32, %arg1: memref<2xf32, #tpu.memory_space<smem>>) -> (i32, i32, i32) {
    %c0_i32 = arith.constant 0 : i32
    %c0_i32_0 = arith.constant 0 : i32
    %c0_i32_1 = arith.constant 0 : i32
    return %arg0, %c0_i32, %c0_i32_0 : i32, i32, i32
  }
  func.func @transform_2(%arg0: i32, %arg1: memref<2xf32, #tpu.memory_space<smem>>) -> (i32, i32) {
    %c0_i32 = arith.constant 0 : i32
    %c0_i32_0 = arith.constant 0 : i32
    %c0_i32_1 = arith.constant 0 : i32
    return %c0_i32, %c0_i32_0 : i32, i32
  }
  func.func @transform_3(%arg0: i32, %arg1: memref<2xf32, #tpu.memory_space<smem>>) -> (i32, i32) {
    %c0_i32 = arith.constant 0 : i32
    %c0_i32_0 = arith.constant 0 : i32
    %c0_i32_1 = arith.constant 0 : i32
    return %c0_i32, %c0_i32_0 : i32, i32
  }
  func.func @transform_4(%arg0: i32, %arg1: memref<2xf32, #tpu.memory_space<smem>>) -> (i32, i32) {
    %c0_i32 = arith.constant 0 : i32
    %c0_i32_0 = arith.constant 0 : i32
    %c0_i32_1 = arith.constant 0 : i32
    return %c0_i32, %c0_i32_0 : i32, i32
  }
  func.func @transform_5(%arg0: i32, %arg1: memref<2xf32, #tpu.memory_space<smem>>) -> (i32, i32) {
    %c0_i32 = arith.constant 0 : i32
    %c0_i32_0 = arith.constant 0 : i32
    %c0_i32_1 = arith.constant 0 : i32
    return %c0_i32, %c0_i32_0 : i32, i32
  }
  func.func @transform_6(%arg0: i32, %arg1: memref<2xf32, #tpu.memory_space<smem>>) -> (i32, i32) {
    %c0_i32 = arith.constant 0 : i32
    %c0_i32_0 = arith.constant 0 : i32
    %c0_i32_1 = arith.constant 0 : i32
    return %c0_i32, %c0_i32_0 : i32, i32
  }
  func.func @transform_7(%arg0: i32, %arg1: memref<2xf32, #tpu.memory_space<smem>>) -> (i32, i32, i32) {
    %c0_i32 = arith.constant 0 : i32
    %c0_i32_0 = arith.constant 0 : i32
    %c0_i32_1 = arith.constant 0 : i32
    return %arg0, %c0_i32, %c0_i32_0 : i32, i32, i32
  }
  func.func @transform_8(%arg0: i32, %arg1: memref<2xf32, #tpu.memory_space<smem>>) -> (i32, i32, i32) {
    %c0_i32 = arith.constant 0 : i32
    %c0_i32_0 = arith.constant 0 : i32
    %c0_i32_1 = arith.constant 0 : i32
    return %arg0, %c0_i32, %c0_i32_0 : i32, i32, i32
  }
  func.func @transform_9(%arg0: i32, %arg1: memref<2xf32, #tpu.memory_space<smem>>) -> (i32, i32, i32) {
    %c0_i32 = arith.constant 0 : i32
    %c0_i32_0 = arith.constant 0 : i32
    %c0_i32_1 = arith.constant 0 : i32
    return %arg0, %c0_i32, %c0_i32_0 : i32, i32, i32
  }
  func.func @transform_10(%arg0: i32, %arg1: memref<2xf32, #tpu.memory_space<smem>>) -> (i32, i32, i32) {
    %c0_i32 = arith.constant 0 : i32
    %c0_i32_0 = arith.constant 0 : i32
    %c0_i32_1 = arith.constant 0 : i32
    return %arg0, %c0_i32, %c0_i32_0 : i32, i32, i32
  }
}

module attributes {stable_mosaic.version = 11 : i64} {
  func.func @kernel(%arg0: i32, %arg1: memref<2xf32, #tpu.memory_space<smem>>, %arg2: memref<1x16x96xf32, #tpu.memory_space<vmem>>, %arg3: memref<1x16x96xf32, #tpu.memory_space<vmem>>, %arg4: memref<6x16xf32, #tpu.memory_space<vmem>>, %arg5: memref<480x180xf32, #tpu.memory_space<vmem>>, %arg6: memref<36x6xf32, #tpu.memory_space<vmem>>, %arg7: memref<8x16xf32, #tpu.memory_space<vmem>>, %arg8: memref<192x96xf32, #tpu.memory_space<vmem>>, %arg9: memref<1x1x6xf32, #tpu.memory_space<vmem>>, %arg10: memref<1x1x6xf32, #tpu.memory_space<vmem>>, %arg11: memref<1x8x96xf32, #tpu.memory_space<vmem>>, %arg12: memref<1x1x2xf32, #tpu.memory_space<vmem>>) attributes {dimension_semantics = [#tpu.dimension_semantics<parallel>], iteration_bounds = array<i64: 1>, scalar_prefetch = 1 : i64, scratch_operands = 0 : i64, tpu.core_type = #tpu.core_type<tc>, window_params = [{transform_indices = @transform_0, window_bounds = array<i64: 1, 16, 96>}, {transform_indices = @transform_1, window_bounds = array<i64: 1, 16, 96>}, {pipeline_mode = #tpu.pipeline_mode<synchronous>, transform_indices = @transform_2, window_bounds = array<i64: 6, 16>}, {pipeline_mode = #tpu.pipeline_mode<synchronous>, transform_indices = @transform_3, window_bounds = array<i64: 480, 180>}, {pipeline_mode = #tpu.pipeline_mode<synchronous>, transform_indices = @transform_4, window_bounds = array<i64: 36, 6>}, {pipeline_mode = #tpu.pipeline_mode<synchronous>, transform_indices = @transform_5, window_bounds = array<i64: 8, 16>}, {pipeline_mode = #tpu.pipeline_mode<synchronous>, transform_indices = @transform_6, window_bounds = array<i64: 192, 96>}, {transform_indices = @transform_7, window_bounds = array<i64: 1, 1, 6>}, {transform_indices = @transform_8, window_bounds = array<i64: 1, 1, 6>}, {transform_indices = @transform_9, window_bounds = array<i64: 1, 8, 96>}, {transform_indices = @transform_10, window_bounds = array<i64: 1, 1, 2>}]} {
    %c0 = arith.constant 0 : index
    %c0_0 = arith.constant 0 : index
    %c0_1 = arith.constant 0 : index
    %0 = vector.load %arg2[%c0, %c0_0, %c0_1] : memref<1x16x96xf32, #tpu.memory_space<vmem>>, vector<1x16x96xf32>
    %1 = vector.shape_cast %0 : vector<1x16x96xf32> to vector<16x96xf32>
    %c0_2 = arith.constant 0 : index
    %c0_3 = arith.constant 0 : index
    %c0_4 = arith.constant 0 : index
    %2 = vector.load %arg3[%c0_2, %c0_3, %c0_4] : memref<1x16x96xf32, #tpu.memory_space<vmem>>, vector<1x16x96xf32>
    %3 = vector.shape_cast %2 : vector<1x16x96xf32> to vector<16x96xf32>
    %4 = arith.mulf %1, %1 : vector<16x96xf32>
    %5 = arith.mulf %3, %3 : vector<16x96xf32>
    %6 = arith.mulf %1, %3 : vector<16x96xf32>
    %7 = tpu.concatenate %1, %3, %4, %5, %6 in 1 : vector<16x96xf32>, vector<16x96xf32>, vector<16x96xf32>, vector<16x96xf32>, vector<16x96xf32> -> vector<16x480xf32>
    %c0_5 = arith.constant 0 : index
    %c0_6 = arith.constant 0 : index
    %8 = vector.load %arg4[%c0_5, %c0_6] : memref<6x16xf32, #tpu.memory_space<vmem>>, vector<6x16xf32>
    %cst = arith.constant dense<0.000000e+00> : vector<6x480xf32>
    %9 = tpu.matmul %8, %7, %cst {dimension_numbers = #tpu.dot_dimension_numbers<[1], [0], [0], [1], [0, 0, 1, 1], [], []>} : vector<6x16xf32>, vector<16x480xf32>, vector<6x480xf32> -> vector<6x480xf32>
    %c0_7 = arith.constant 0 : index
    %c0_8 = arith.constant 0 : index
    %10 = vector.load %arg5[%c0_7, %c0_8] : memref<480x180xf32, #tpu.memory_space<vmem>>, vector<480x180xf32>
    %cst_9 = arith.constant dense<0.000000e+00> : vector<6x180xf32>
    %11 = tpu.matmul %9, %10, %cst_9 {dimension_numbers = #tpu.dot_dimension_numbers<[1], [0], [0], [1], [0, 0, 1, 1], [], []>} : vector<6x480xf32>, vector<480x180xf32>, vector<6x180xf32> -> vector<6x180xf32>
    %12 = vector.extract_strided_slice %11 {offsets = [0, 0], sizes = [6, 36], strides = [1, 1]} : vector<6x180xf32> to vector<6x36xf32>
    %13 = vector.extract_strided_slice %11 {offsets = [0, 36], sizes = [6, 36], strides = [1, 1]} : vector<6x180xf32> to vector<6x36xf32>
    %14 = vector.extract_strided_slice %11 {offsets = [0, 72], sizes = [6, 36], strides = [1, 1]} : vector<6x180xf32> to vector<6x36xf32>
    %15 = vector.extract_strided_slice %11 {offsets = [0, 108], sizes = [6, 36], strides = [1, 1]} : vector<6x180xf32> to vector<6x36xf32>
    %16 = vector.extract_strided_slice %11 {offsets = [0, 144], sizes = [6, 36], strides = [1, 1]} : vector<6x180xf32> to vector<6x36xf32>
    %17 = arith.mulf %12, %12 : vector<6x36xf32>
    %18 = arith.mulf %13, %13 : vector<6x36xf32>
    %19 = arith.mulf %12, %13 : vector<6x36xf32>
    %20 = arith.subf %14, %17 : vector<6x36xf32>
    %21 = arith.subf %15, %18 : vector<6x36xf32>
    %22 = arith.subf %16, %19 : vector<6x36xf32>
    %c0_10 = arith.constant 0 : index
    %23 = memref.load %arg1[%c0_10] : memref<2xf32, #tpu.memory_space<smem>>
    %c1 = arith.constant 1 : index
    %24 = memref.load %arg1[%c1] : memref<2xf32, #tpu.memory_space<smem>>
    %cst_11 = arith.constant 2.000000e+00 : f32
    %25 = vector.broadcast %cst_11 : f32 to vector<6x36xf32>
    %26 = arith.mulf %25, %22 : vector<6x36xf32>
    %27 = vector.broadcast %24 : f32 to vector<6x36xf32>
    %28 = arith.addf %26, %27 : vector<6x36xf32>
    %29 = arith.addf %20, %21 : vector<6x36xf32>
    %30 = vector.broadcast %24 : f32 to vector<6x36xf32>
    %31 = arith.addf %29, %30 : vector<6x36xf32>
    %32 = tpu.reciprocal %31 {approx = true} : vector<6x36xf32> -> vector<6x36xf32>
    %33 = arith.mulf %28, %32 : vector<6x36xf32>
    %cst_12 = arith.constant 2.000000e+00 : f32
    %34 = vector.broadcast %cst_12 : f32 to vector<6x36xf32>
    %35 = arith.mulf %34, %19 : vector<6x36xf32>
    %36 = vector.broadcast %23 : f32 to vector<6x36xf32>
    %37 = arith.addf %35, %36 : vector<6x36xf32>
    %38 = arith.addf %17, %18 : vector<6x36xf32>
    %39 = vector.broadcast %23 : f32 to vector<6x36xf32>
    %40 = arith.addf %38, %39 : vector<6x36xf32>
    %41 = tpu.reciprocal %40 {approx = true} : vector<6x36xf32> -> vector<6x36xf32>
    %42 = arith.mulf %37, %41 : vector<6x36xf32>
    %43 = arith.mulf %42, %33 : vector<6x36xf32>
    %c0_13 = arith.constant 0 : index
    %c0_14 = arith.constant 0 : index
    %44 = vector.load %arg6[%c0_13, %c0_14] : memref<36x6xf32, #tpu.memory_space<vmem>>, vector<36x6xf32>
    %cst_15 = arith.constant dense<0.000000e+00> : vector<6x6xf32>
    %45 = tpu.matmul %43, %44, %cst_15 {dimension_numbers = #tpu.dot_dimension_numbers<[1], [0], [0], [1], [0, 0, 1, 1], [], []>} : vector<6x36xf32>, vector<36x6xf32>, vector<6x6xf32> -> vector<6x6xf32>
    %cst_16 = arith.constant dense<0.000000e+00> : vector<6xf32>
    %46 = vector.multi_reduction <add>, %45, %cst_16 [0] : vector<6x6xf32> to vector<6xf32>
    %47 = vector.shape_cast %46 : vector<6xf32> to vector<1x6xf32>
    %cst_17 = arith.constant dense<0.000000e+00> : vector<6x6xf32>
    %48 = tpu.matmul %33, %44, %cst_17 {dimension_numbers = #tpu.dot_dimension_numbers<[1], [0], [0], [1], [0, 0, 1, 1], [], []>} : vector<6x36xf32>, vector<36x6xf32>, vector<6x6xf32> -> vector<6x6xf32>
    %cst_18 = arith.constant dense<0.000000e+00> : vector<6xf32>
    %49 = vector.multi_reduction <add>, %48, %cst_18 [0] : vector<6x6xf32> to vector<6xf32>
    %50 = vector.shape_cast %49 : vector<6xf32> to vector<1x6xf32>
    %51 = vector.shape_cast %47 : vector<1x6xf32> to vector<1x1x6xf32>
    %c0_19 = arith.constant 0 : index
    %c0_20 = arith.constant 0 : index
    %c0_21 = arith.constant 0 : index
    %52 = vector.load %arg9[%c0_19, %c0_20, %c0_21] : memref<1x1x6xf32, #tpu.memory_space<vmem>>, vector<1x1x6xf32>
    tpu.vector_store %arg9[%c0_19, %c0_20, %c0_21], %51 {strides = array<i32>} : memref<1x1x6xf32, #tpu.memory_space<vmem>>, vector<1x1x6xf32>,
    %53 = vector.shape_cast %50 : vector<1x6xf32> to vector<1x1x6xf32>
    %c0_22 = arith.constant 0 : index
    %c0_23 = arith.constant 0 : index
    %c0_24 = arith.constant 0 : index
    %54 = vector.load %arg10[%c0_22, %c0_23, %c0_24] : memref<1x1x6xf32, #tpu.memory_space<vmem>>, vector<1x1x6xf32>
    tpu.vector_store %arg10[%c0_22, %c0_23, %c0_24], %53 {strides = array<i32>} : memref<1x1x6xf32, #tpu.memory_space<vmem>>, vector<1x1x6xf32>,
    %55 = tpu.concatenate %1, %3 in 1 : vector<16x96xf32>, vector<16x96xf32> -> vector<16x192xf32>
    %c0_25 = arith.constant 0 : index
    %c0_26 = arith.constant 0 : index
    %56 = vector.load %arg7[%c0_25, %c0_26] : memref<8x16xf32, #tpu.memory_space<vmem>>, vector<8x16xf32>
    %cst_27 = arith.constant dense<0.000000e+00> : vector<8x192xf32>
    %57 = tpu.matmul %56, %55, %cst_27 {dimension_numbers = #tpu.dot_dimension_numbers<[1], [0], [0], [1], [0, 0, 1, 1], [], []>} : vector<8x16xf32>, vector<16x192xf32>, vector<8x192xf32> -> vector<8x192xf32>
    %c0_28 = arith.constant 0 : index
    %c0_29 = arith.constant 0 : index
    %58 = vector.load %arg8[%c0_28, %c0_29] : memref<192x96xf32, #tpu.memory_space<vmem>>, vector<192x96xf32>
    %cst_30 = arith.constant dense<0.000000e+00> : vector<8x96xf32>
    %59 = tpu.matmul %57, %58, %cst_30 {dimension_numbers = #tpu.dot_dimension_numbers<[1], [0], [0], [1], [0, 0, 1, 1], [], []>} : vector<8x192xf32>, vector<192x96xf32>, vector<8x96xf32> -> vector<8x96xf32>
    %60 = vector.shape_cast %59 : vector<8x96xf32> to vector<1x8x96xf32>
    %c0_31 = arith.constant 0 : index
    %c0_32 = arith.constant 0 : index
    %c0_33 = arith.constant 0 : index
    %61 = vector.load %arg11[%c0_31, %c0_32, %c0_33] : memref<1x8x96xf32, #tpu.memory_space<vmem>>, vector<1x8x96xf32>
    tpu.vector_store %arg11[%c0_31, %c0_32, %c0_33], %60 {strides = array<i32>} : memref<1x8x96xf32, #tpu.memory_space<vmem>>, vector<1x8x96xf32>,
    %62 = vector.extract_strided_slice %59 {offsets = [0, 0], sizes = [8, 48], strides = [1, 1]} : vector<8x96xf32> to vector<8x48xf32>
    %63 = vector.shape_cast %62 : vector<8x48xf32> to vector<1x8x48xf32>
    %cst_34 = arith.constant dense<0xFF800000> : vector<1xf32>
    %64 = vector.multi_reduction <maximumf>, %63, %cst_34 [1, 2] : vector<1x8x48xf32> to vector<1xf32>
    %65 = vector.shape_cast %64 : vector<1xf32> to vector<1x1x1xf32>
    %66 = vector.extract %65[0, 0, 0] : f32 from vector<1x1x1xf32>
    %67 = vector.broadcast %66 : f32 to vector<1x1x1xf32>
    %68 = vector.shape_cast %62 : vector<8x48xf32> to vector<1x8x48xf32>
    %cst_35 = arith.constant dense<0x7F800000> : vector<1xf32>
    %69 = vector.multi_reduction <minimumf>, %68, %cst_35 [1, 2] : vector<1x8x48xf32> to vector<1xf32>
    %70 = vector.shape_cast %69 : vector<1xf32> to vector<1x1x1xf32>
    %71 = vector.extract %70[0, 0, 0] : f32 from vector<1x1x1xf32>
    %72 = vector.broadcast %71 : f32 to vector<1x1x1xf32>
    %73 = tpu.concatenate %67, %72 in 2 : vector<1x1x1xf32>, vector<1x1x1xf32> -> vector<1x1x2xf32>
    %c0_36 = arith.constant 0 : index
    %c0_37 = arith.constant 0 : index
    %c0_38 = arith.constant 0 : index
    %74 = vector.load %arg12[%c0_36, %c0_37, %c0_38] : memref<1x1x2xf32, #tpu.memory_space<vmem>>, vector<1x1x2xf32>
    tpu.vector_store %arg12[%c0_36, %c0_37, %c0_38], %73 {strides = array<i32>} : memref<1x1x2xf32, #tpu.memory_space<vmem>>, vector<1x1x2xf32>,
    return
  }
  func.func @transform_0(%arg0: i32, %arg1: memref<2xf32, #tpu.memory_space<smem>>) -> (i32, i32, i32) {
    %c0_i32 = arith.constant 0 : i32
    %c0_i32_0 = arith.constant 0 : i32
    %c0_i32_1 = arith.constant 0 : i32
    return %arg0, %c0_i32, %c0_i32_0 : i32, i32, i32
  }
  func.func @transform_1(%arg0: i32, %arg1: memref<2xf32, #tpu.memory_space<smem>>) -> (i32, i32, i32) {
    %c0_i32 = arith.constant 0 : i32
    %c0_i32_0 = arith.constant 0 : i32
    %c0_i32_1 = arith.constant 0 : i32
    return %arg0, %c0_i32, %c0_i32_0 : i32, i32, i32
  }
  func.func @transform_2(%arg0: i32, %arg1: memref<2xf32, #tpu.memory_space<smem>>) -> (i32, i32) {
    %c0_i32 = arith.constant 0 : i32
    %c0_i32_0 = arith.constant 0 : i32
    %c0_i32_1 = arith.constant 0 : i32
    return %c0_i32, %c0_i32_0 : i32, i32
  }
  func.func @transform_3(%arg0: i32, %arg1: memref<2xf32, #tpu.memory_space<smem>>) -> (i32, i32) {
    %c0_i32 = arith.constant 0 : i32
    %c0_i32_0 = arith.constant 0 : i32
    %c0_i32_1 = arith.constant 0 : i32
    return %c0_i32, %c0_i32_0 : i32, i32
  }
  func.func @transform_4(%arg0: i32, %arg1: memref<2xf32, #tpu.memory_space<smem>>) -> (i32, i32) {
    %c0_i32 = arith.constant 0 : i32
    %c0_i32_0 = arith.constant 0 : i32
    %c0_i32_1 = arith.constant 0 : i32
    return %c0_i32, %c0_i32_0 : i32, i32
  }
  func.func @transform_5(%arg0: i32, %arg1: memref<2xf32, #tpu.memory_space<smem>>) -> (i32, i32) {
    %c0_i32 = arith.constant 0 : i32
    %c0_i32_0 = arith.constant 0 : i32
    %c0_i32_1 = arith.constant 0 : i32
    return %c0_i32, %c0_i32_0 : i32, i32
  }
  func.func @transform_6(%arg0: i32, %arg1: memref<2xf32, #tpu.memory_space<smem>>) -> (i32, i32) {
    %c0_i32 = arith.constant 0 : i32
    %c0_i32_0 = arith.constant 0 : i32
    %c0_i32_1 = arith.constant 0 : i32
    return %c0_i32, %c0_i32_0 : i32, i32
  }
  func.func @transform_7(%arg0: i32, %arg1: memref<2xf32, #tpu.memory_space<smem>>) -> (i32, i32, i32) {
    %c0_i32 = arith.constant 0 : i32
    %c0_i32_0 = arith.constant 0 : i32
    %c0_i32_1 = arith.constant 0 : i32
    return %arg0, %c0_i32, %c0_i32_0 : i32, i32, i32
  }
  func.func @transform_8(%arg0: i32, %arg1: memref<2xf32, #tpu.memory_space<smem>>) -> (i32, i32, i32) {
    %c0_i32 = arith.constant 0 : i32
    %c0_i32_0 = arith.constant 0 : i32
    %c0_i32_1 = arith.constant 0 : i32
    return %arg0, %c0_i32, %c0_i32_0 : i32, i32, i32
  }
  func.func @transform_9(%arg0: i32, %arg1: memref<2xf32, #tpu.memory_space<smem>>) -> (i32, i32, i32) {
    %c0_i32 = arith.constant 0 : i32
    %c0_i32_0 = arith.constant 0 : i32
    %c0_i32_1 = arith.constant 0 : i32
    return %arg0, %c0_i32, %c0_i32_0 : i32, i32, i32
  }
  func.func @transform_10(%arg0: i32, %arg1: memref<2xf32, #tpu.memory_space<smem>>) -> (i32, i32, i32) {
    %c0_i32 = arith.constant 0 : i32
    %c0_i32_0 = arith.constant 0 : i32
    %c0_i32_1 = arith.constant 0 : i32
    return %arg0, %c0_i32, %c0_i32_0 : i32, i32, i32
  }
}

</mosaic_0001>

<bundles_post_ra>
// kernel: msssim_pallas.3
= control target key start
LH: loop header
LB: loop body
LE: loop exit
PB: predicated region body
PF: predicated region fallthrough
CT: control target
= control target key end

     0   :  { %s1847_s0 = inlined_call_operand.vmem [shape: f32[2], index: 0, kind: input, shape index: {}]   ;;  %s1848_s1 = inlined_call_operand.vmem [shape: f32[1,16,96], index: 1, kind: input, shape index: {}]   ;;  %s1849_s2 = inlined_call_operand.vmem [shape: f32[1,16,96], index: 2, kind: input, shape index: {}]   ;;  %s1850_s3 = inlined_call_operand.vmem [shape: f32[6,16], index: 3, kind: input, shape index: {}]   ;;  %s1851_s4 = inlined_call_operand.vmem [shape: f32[480,180], index: 4, kind: input, shape index: {}]   ;;  %s1852_s5 = inlined_call_operand.vmem [shape: f32[36,6], index: 5, kind: input, shape index: {}]   ;;  %s1853_s6 = inlined_call_operand.vmem [shape: f32[8,16], index: 6, kind: input, shape index: {}]   ;;  %s1854_s7 = inlined_call_operand.vmem [shape: f32[192,96], index: 7, kind: input, shape index: {}]   ;;  %s1855_s8 = inlined_call_operand.vmem [shape: f32[1,1,6], index: 8, kind: output, shape index: {0}]   ;;  %s1856_s9 = inlined_call_operand.vmem [shape: f32[1,1,6], index: 9, kind: output, shape index: {1}]   ;;  %s1857_s10 = inlined_call_operand.vmem [shape: f32[1,8,96], index: 10, kind: output, shape index: {2}]   ;;  %s1858_s11 = inlined_call_operand.vmem [shape: f32[1,1,2], index: 11, kind: output, shape index: {3}]  }
   0x1   :  { %s17_s19 = sshll.u32 %s1847_s0, 4  ;;  %s18_s19 = int_to_ptr.vmem [resolvable:$true] %s17_s19 }
   0x2   :  { %s1199_s20 = scalar_lea.vmem %s18_s19, 16  ;;  %p1204_p1 = scmp.lt.s32.totalorder %s18_s19, %s18_s19 }
   0x3   :  { %p1200_p0 = scmp.ne.s32.totalorder %s18_s19, %s1199_s20  ;;  %p1205_p2 = scmp.lt.s32.totalorder %s1199_s20, %s1199_s20 }
   0x5   :  { %p1206_p3 = por %p1205_p2, %p1204_p1 }
   0x7   :  { %p1207_p4 = pnand %p1206_p3, %p1200_p0 }
   0x9   :  { %1210 = shalt.err (!%p1207_p4)  }
   0xa   :  { %s1213_s21 = smov [#allocation3]  }
   0xb   :  { %20 = dma.vmem_to_smem %s18_s19, 16, %s1213_s21, [#allocation2] }
   0xc   :  { %1211 = dma.done.wait [#allocation2], 16 }
   0xd   :  { %1212 = vsyncadd [#allocation2], 4294967280 }
   0xe   :  { %22 = sfence }
   0xf   :  { %v39_v0 = vld [vmem:[%s1849_s2] sm:$0xff]  ;;  %v40_v1 = vld [vmem:[%s1849_s2 + $0x8] sm:$0xff]  ;;  %s1214_s2 = smov 96   ;;  %v1215_v10 = vmov 0.0   ;;  %s1217_s29 = smov 64   ;;  %v230_v16 = vld [vmem:[%s1851_s4 + $0x18] sm:$0xff] }
  0x10   :  { %v1296_v2 = vld [vmem:[%s1848_s1] sm:$0xff]  ;;  %v1180_v3 = vpack.i.bf16 %v40_v1, %v39_v0  ;;  %v43_v4 = vmul.f32 %v39_v0, %v39_v0  ;;  %v44_v5 = vmul.f32 %v40_v1, %v40_v1  ;;  %v1301_v6 = vld [vmem:[%s1848_s1 + $0x8] sm:$0xff]  ;;  %149 = vmatprep.mubr.f32.mxu1 %v1215_v10  ;;  %s1216_s1 = smov 32   ;;  %v229_v19 = vld [vmem:[%s1851_s4 + $0x10] sm:$0xff]  ;;  %vm71_vm0 = vcmask 785408   ;;  %s1218_s27 = smov 72  }
  0x11   :  { %v41_v7 = vmul.f32 %v1296_v2, %v1296_v2  ;;  %v42_v8 = vmul.f32 %v1301_v6, %v1301_v6  ;;  %v1309_v11 = vmul.f32 %v39_v0, %v1296_v2  ;;  %v1312_v12 = vmul.f32 %v40_v1, %v1301_v6  ;;  %v228_v15 = vld [vmem:[%s1851_s4 + $0x8] sm:$0xff]  ;;  %v227_v17 = vld [vmem:[%s1851_s4] sm:$0xff]  ;;  %v234_v21 = vld [vmem:[%s1851_s4 + $0x38] sm:$0xff]  ;;  %s1219_s28 = smov 92   ;;  %s1220_s13 = smov 16  }
  0x12   :  { %1181 = vrot.lane.b32.xlu0 %v1180_v3, %s1214_s2  ;;  %v1190_v9 = vpack.i.bf16 %v44_v5, %v43_v4  ;;  %v991_v18 = vpack.c.bf16 %v230_v16, %v228_v15  ;;  %v232_v20 = vld [vmem:[%s1851_s4 + $0x28] sm:$0xff]  ;;  %v993_v22 = vpack.c.bf16 %v229_v19, %v227_v17  ;;  %v231_v24 = vld [vmem:[%s1851_s4 + $0x20] sm:$0xff]  ;;  %v233_v25 = vld [vmem:[%s1851_s4 + $0x30] sm:$0xff]  ;;  %vm74_vm1 = vcmask 523264   ;;  %s1223_s18 = smov 112   ;;  %s509_s19 = sld [smem:[#allocation3]] }
  0x13   :  { %v1185_v13 = vpack.i.bf16 %v42_v8, %v41_v7  ;;  %v987_v14 = vpack.c.bf16 %v1312_v12, %v1309_v11  ;;  %v995_v23 = vpack.c.bf16 %v234_v21, %v232_v20  ;;  %v236_v26 = vld [vmem:[%s1851_s4 + $0x48] sm:$0xff]  ;;  %v238_v27 = vld [vmem:[%s1851_s4 + $0x58] sm:$0xff]  ;;  %v997_v28 = vpack.c.bf16 %v233_v25, %v231_v24  ;;  %v235_v30 = vld [vmem:[%s1851_s4 + $0x40] sm:$0xff] }
  0x14   :  { %1191 = vrot.lane.b32.xlu1 %v1190_v9, %s1216_s1  ;;  %992 = vmatprep.subr.bf16.mxu0 %v991_v18  ;;  %v999_v29 = vpack.c.bf16 %v238_v27, %v236_v26  ;;  %v237_v31 = vld [vmem:[%s1851_s4 + $0x50] sm:$0xff]  ;;  %v240_v32 = vld [vmem:[%s1851_s4 + $0x68] sm:$0xff]  ;;  %v242_v33 = vld [vmem:[%s1851_s4 + $0x78] sm:$0xff]  ;;  %vm77_vm2 = vcmask 261120   ;;  %vm81_vm3 = vcmask 130048   ;;  %vm520_vm4 = vcmask 752640  }
  0x15   :  { %994 = vmatpush1.bf16.msra.mxu0 %v993_v22  ;;  %v1001_v34 = vpack.c.bf16 %v237_v31, %v235_v30  ;;  %v1003_v35 = vpack.c.bf16 %v242_v33, %v240_v32  ;;  %v239_v36 = vld [vmem:[%s1851_s4 + $0x60] sm:$0xff]  ;;  %v241_v37 = vld [vmem:[%s1851_s4 + $0x70] sm:$0xff]  ;;  %v244_v38 = vld [vmem:[%s1851_s4 + $0x88] sm:$0xff]  ;;  %vm555_vm5 = vcmask 1043456   ;;  %vm1222_vm6 = vmmov 0  }
  0x16   :  { %1186 = vrot.lane.b32.xlu0 %v1185_v13, %s1217_s29  ;;  %996 = vmatprep.subr.bf16.mxu0 %v995_v23  ;;  %v246_v39 = vld [vmem:[%s1851_s4 + $0x98] sm:$0xff]  ;;  %v1005_v40 = vpack.c.bf16 %v241_v37, %v239_v36  ;;  %v243_v42 = vld [vmem:[%s1851_s4 + $0x80] sm:$0xff]  ;;  %v245_v43 = vld [vmem:[%s1851_s4 + $0x90] sm:$0xff]  ;;  %vm551_vm7 = vcmask 293888   ;;  %vm629_vm8 = vcmask 46080   ;;  %vm716_vm9 = vcmask 40960  }
  0x17   :  { %v1007_v41 = vpack.c.bf16 %v246_v39, %v244_v38  ;;  %v248_v44 = vld [vmem:[%s1851_s4 + $0xa8] sm:$0xff]  ;;  %v250_v45 = vld [vmem:[%s1851_s4 + $0xb8] sm:$0xff]  ;;  %v1009_v46 = vpack.c.bf16 %v245_v43, %v243_v42  ;;  %v247_v48 = vld [vmem:[%s1851_s4 + $0xa0] sm:$0xff]  ;;  %vm892_vm10 = vcmask 392192   ;;  %vm915_vm11 = vcmask 7168  }
  0x18   :  { %v1011_v47 = vpack.c.bf16 %v250_v45, %v248_v44  ;;  %v249_v49 = vld [vmem:[%s1851_s4 + $0xb0] sm:$0xff]  ;;  %v252_v50 = vld [vmem:[%s1851_s4 + $0xc8] sm:$0xff]  ;;  %v254_v51 = vld [vmem:[%s1851_s4 + $0xd8] sm:$0xff]  ;;  %vm917_vm12 = vcmask 8192  }
  0x19   :  { %998 = vmatpush1.bf16.msra.mxu0 %v997_v28  ;;  %v1013_v52 = vpack.c.bf16 %v249_v49, %v247_v48  ;;  %v1015_v53 = vpack.c.bf16 %v254_v51, %v252_v50  ;;  %v251_v54 = vld [vmem:[%s1851_s4 + $0xc0] sm:$0xff]  ;;  %v253_v55 = vld [vmem:[%s1851_s4 + $0xd0] sm:$0xff]  ;;  %v256_v56 = vld [vmem:[%s1851_s4 + $0xe8] sm:$0xff] }
  0x1a   :  { %1000 = vmatprep.subr.bf16.mxu0 %v999_v29  ;;  %v258_v57 = vld [vmem:[%s1851_s4 + $0xf8] sm:$0xff]  ;;  %v1017_v58 = vpack.c.bf16 %v253_v55, %v251_v54  ;;  %v255_v60 = vld [vmem:[%s1851_s4 + $0xe0] sm:$0xff]  ;;  %v257_v61 = vld [vmem:[%s1851_s4 + $0xf0] sm:$0xff] }
  0x1b   :  { %v1019_v59 = vpack.c.bf16 %v258_v57, %v256_v56  ;;  %v260_v62 = vld [vmem:[%s1851_s4 + $0x108] sm:$0xff]  ;;  %v262_v63 = vld [vmem:[%s1851_s4 + $0x118] sm:$0xff]  ;;  %v1021_v0 = vpack.c.bf16 %v257_v61, %v255_v60  ;;  %v259_v3 = vld [vmem:[%s1851_s4 + $0x100] sm:$0xff] }
  0x1c   :  { %v1023_v1 = vpack.c.bf16 %v262_v63, %v260_v62  ;;  %v261_v4 = vld [vmem:[%s1851_s4 + $0x110] sm:$0xff]  ;;  %v264_v5 = vld [vmem:[%s1851_s4 + $0x128] sm:$0xff]  ;;  %v266_v7 = vld [vmem:[%s1851_s4 + $0x138] sm:$0xff] }
  0x1d   :  { %1002 = vmatpush1.bf16.msra.mxu0 %v1001_v34  ;;  %v1025_v8 = vpack.c.bf16 %v261_v4, %v259_v3  ;;  %v1027_v9 = vpack.c.bf16 %v266_v7, %v264_v5  ;;  %v263_v13 = vld [vmem:[%s1851_s4 + $0x120] sm:$0xff]  ;;  %v265_v15 = vld [vmem:[%s1851_s4 + $0x130] sm:$0xff]  ;;  %v268_v16 = vld [vmem:[%s1851_s4 + $0x148] sm:$0xff] }
  0x1e   :  { %1004 = vmatprep.subr.bf16.mxu0 %v1003_v35  ;;  %v270_v17 = vld [vmem:[%s1851_s4 + $0x158] sm:$0xff]  ;;  %v1029_v18 = vpack.c.bf16 %v265_v15, %v263_v13  ;;  %v267_v20 = vld [vmem:[%s1851_s4 + $0x140] sm:$0xff]  ;;  %v269_v21 = vld [vmem:[%s1851_s4 + $0x150] sm:$0xff] }
  0x1f   :  { %v1031_v19 = vpack.c.bf16 %v270_v17, %v268_v16  ;;  %v272_v22 = vld [vmem:[%s1851_s4 + $0x168] sm:$0xff]  ;;  %v274_v23 = vld [vmem:[%s1851_s4 + $0x178] sm:$0xff]  ;;  %v1033_v24 = vpack.c.bf16 %v269_v21, %v267_v20  ;;  %v271_v26 = vld [vmem:[%s1851_s4 + $0x160] sm:$0xff] }
  0x20   :  { %v1035_v25 = vpack.c.bf16 %v274_v23, %v272_v22  ;;  %v273_v27 = vld [vmem:[%s1851_s4 + $0x170] sm:$0xff]  ;;  %v276_v28 = vld [vmem:[%s1851_s4 + $0x188] sm:$0xff]  ;;  %v278_v29 = vld [vmem:[%s1851_s4 + $0x198] sm:$0xff] }
  0x21   :  { %1006 = vmatpush1.bf16.msra.mxu0 %v1005_v40  ;;  %v1037_v30 = vpack.c.bf16 %v273_v27, %v271_v26  ;;  %v1039_v31 = vpack.c.bf16 %v278_v29, %v276_v28  ;;  %v275_v32 = vld [vmem:[%s1851_s4 + $0x180] sm:$0xff]  ;;  %v277_v33 = vld [vmem:[%s1851_s4 + $0x190] sm:$0xff]  ;;  %v280_v34 = vld [vmem:[%s1851_s4 + $0x1a8] sm:$0xff] }
  0x22   :  { %1008 = vmatprep.subr.bf16.mxu0 %v1007_v41  ;;  %v282_v35 = vld [vmem:[%s1851_s4 + $0x1b8] sm:$0xff]  ;;  %v1041_v36 = vpack.c.bf16 %v277_v33, %v275_v32  ;;  %v279_v38 = vld [vmem:[%s1851_s4 + $0x1a0] sm:$0xff]  ;;  %v281_v39 = vld [vmem:[%s1851_s4 + $0x1b0] sm:$0xff] }
  0x23   :  { %v1043_v37 = vpack.c.bf16 %v282_v35, %v280_v34  ;;  %v284_v40 = vld [vmem:[%s1851_s4 + $0x1c8] sm:$0xff]  ;;  %v286_v41 = vld [vmem:[%s1851_s4 + $0x1d8] sm:$0xff]  ;;  %v1045_v42 = vpack.c.bf16 %v281_v39, %v279_v38  ;;  %v283_v44 = vld [vmem:[%s1851_s4 + $0x1c0] sm:$0xff] }
  0x24   :  { %v1047_v43 = vpack.c.bf16 %v286_v41, %v284_v40  ;;  %v285_v45 = vld [vmem:[%s1851_s4 + $0x1d0] sm:$0xff]  ;;  %v287_v50 = vld [vmem:[%s1851_s4 + $0x1e0] sm:$0xff]  ;;  %v294_v13 = vld [vmem:[%s1851_s4 + $0x218] sm:$0xff] }
  0x25   :  { %1010 = vmatpush1.bf16.msra.mxu0 %v1009_v46  ;;  %v288_v46 = vld [vmem:[%s1851_s4 + $0x1e8] sm:$0xff]  ;;  %v1049_v48 = vpack.c.bf16 %v285_v45, %v283_v44  ;;  %v289_v51 = vld [vmem:[%s1851_s4 + $0x1f0] sm:$0xff]  ;;  %v291_v11 = vld [vmem:[%s1851_s4 + $0x200] sm:$0xff] }
  0x26   :  { %1012 = vmatprep.subr.bf16.mxu0 %v1011_v47  ;;  %v290_v47 = vld [vmem:[%s1851_s4 + $0x1f8] sm:$0xff]  ;;  %v293_v12 = vld [vmem:[%s1851_s4 + $0x210] sm:$0xff]  ;;  %v295_v21 = vld [vmem:[%s1851_s4 + $0x220] sm:$0xff] }
  0x27   :  { %v1051_v49 = vpack.c.bf16 %v290_v47, %v288_v46  ;;  %v298_v16 = vld [vmem:[%s1851_s4 + $0x238] sm:$0xff]  ;;  %v297_v22 = vld [vmem:[%s1851_s4 + $0x230] sm:$0xff]  ;;  %v300_v23 = vld [vmem:[%s1851_s4 + $0x248] sm:$0xff] }
  0x28   :  { %v299_v28 = vld [vmem:[%s1851_s4 + $0x240] sm:$0xff]  ;;  %v301_v29 = vld [vmem:[%s1851_s4 + $0x250] sm:$0xff]  ;;  %v306_v32 = vld [vmem:[%s1851_s4 + $0x278] sm:$0xff] }
  0x29   :  { %1014 = vmatpush1.bf16.msra.mxu0 %v1013_v52  ;;  %v1053_v52 = vpack.c.bf16 %v289_v51, %v287_v50  ;;  %v1065_v33 = vpack.c.bf16 %v301_v29, %v299_v28  ;;  %v303_v35 = vld [vmem:[%s1851_s4 + $0x260] sm:$0xff]  ;;  %v310_v38 = vld [vmem:[%s1851_s4 + $0x298] sm:$0xff] }
  0x2a   :  { %1016 = vmatprep.subr.bf16.mxu0 %v1015_v53  ;;  %v307_v41 = vld [vmem:[%s1851_s4 + $0x280] sm:$0xff]  ;;  %v314_v44 = vld [vmem:[%s1851_s4 + $0x2b8] sm:$0xff] }
  0x2b   :  { %v311_v47 = vld [vmem:[%s1851_s4 + $0x2a0] sm:$0xff]  ;;  %v318_v50 = vld [vmem:[%s1851_s4 + $0x2d8] sm:$0xff] }
  0x2c   :  { %v342_v28 = vld [vmem:[%s1851_s4 + $0x398] sm:$0xff] }
  0x2d   :  { %1018 = vmatpush1.bf16.msra.mxu0 %v1017_v58 }
  0x2e   :  { %1020 = vmatprep.subr.bf16.mxu0 %v1019_v59 }
  0x31   :  { %1022 = vmatpush1.bf16.msra.mxu0 %v1021_v0 }
  0x32   :  { %1024 = vmatprep.subr.bf16.mxu0 %v1023_v1 }
  0x35   :  { %1026 = vmatpush1.bf16.msra.mxu0 %v1025_v8 }
  0x36   :  { %1028 = vmatprep.subr.bf16.mxu0 %v1027_v9  ;;  %v292_v9 = vld [vmem:[%s1851_s4 + $0x208] sm:$0xff] }
  0x37   :  { %v1055_v15 = vpack.c.bf16 %v294_v13, %v292_v9 }
  0x39   :  { %1030 = vmatpush1.bf16.msra.mxu0 %v1029_v18  ;;  %v1057_v18 = vpack.c.bf16 %v293_v12, %v291_v11  ;;  %v329_v11 = vld [vmem:[%s1851_s4 + $0x330] sm:$0xff]  ;;  %v332_v12 = vld [vmem:[%s1851_s4 + $0x348] sm:$0xff] }
  0x3a   :  { %1032 = vmatprep.subr.bf16.mxu0 %v1031_v19 }
  0x3d   :  { %1034 = vmatpush1.bf16.msra.mxu0 %v1033_v24  ;;  %v302_v24 = vld [vmem:[%s1851_s4 + $0x258] sm:$0xff] }
  0x3e   :  { %1036 = vmatprep.subr.bf16.mxu0 %v1035_v25  ;;  %v1061_v25 = vpack.c.bf16 %v297_v22, %v295_v21  ;;  %v1063_v27 = vpack.c.bf16 %v302_v24, %v300_v23  ;;  %v338_v21 = vld [vmem:[%s1851_s4 + $0x378] sm:$0xff]  ;;  %v335_v24 = vld [vmem:[%s1851_s4 + $0x360] sm:$0xff] }
  0x41   :  { %1038 = vmatpush1.bf16.msra.mxu0 %v1037_v30 }
  0x42   :  { %1040 = vmatprep.subr.bf16.mxu0 %v1039_v31  ;;  %v304_v31 = vld [vmem:[%s1851_s4 + $0x268] sm:$0xff] }
  0x43   :  { %v1067_v34 = vpack.c.bf16 %v306_v32, %v304_v31  ;;  %v339_v31 = vld [vmem:[%s1851_s4 + $0x380] sm:$0xff]  ;;  %v341_v32 = vld [vmem:[%s1851_s4 + $0x390] sm:$0xff] }
  0x45   :  { %1042 = vmatpush1.bf16.msra.mxu0 %v1041_v36  ;;  %v305_v36 = vld [vmem:[%s1851_s4 + $0x270] sm:$0xff] }
  0x46   :  { %1044 = vmatprep.subr.bf16.mxu0 %v1043_v37  ;;  %v308_v37 = vld [vmem:[%s1851_s4 + $0x288] sm:$0xff]  ;;  %v1069_v39 = vpack.c.bf16 %v305_v36, %v303_v35  ;;  %v1105_v35 = vpack.c.bf16 %v341_v32, %v339_v31  ;;  %v804_v31 = vld [vmem:[%s1854_s7 + $0x50] sm:$0xff]  ;;  %v805_v32 = vld [vmem:[%s1854_s7 + $0x58] sm:$0xff] }
  0x47   :  { %v1071_v40 = vpack.c.bf16 %v310_v38, %v308_v37  ;;  %v343_v37 = vld [vmem:[%s1851_s4 + $0x3a0] sm:$0xff]  ;;  %v345_v38 = vld [vmem:[%s1851_s4 + $0x3b0] sm:$0xff] }
  0x49   :  { %1046 = vmatpush1.bf16.msra.mxu0 %v1045_v42  ;;  %v309_v42 = vld [vmem:[%s1851_s4 + $0x290] sm:$0xff] }
  0x4a   :  { %1048 = vmatprep.subr.bf16.mxu0 %v1047_v43  ;;  %v312_v43 = vld [vmem:[%s1851_s4 + $0x2a8] sm:$0xff]  ;;  %v1073_v45 = vpack.c.bf16 %v309_v42, %v307_v41 }
  0x4b   :  { %v1075_v46 = vpack.c.bf16 %v314_v44, %v312_v43 }
  0x4d   :  { %1050 = vmatpush1.bf16.msra.mxu0 %v1049_v48  ;;  %v313_v48 = vld [vmem:[%s1851_s4 + $0x2b0] sm:$0xff] }
  0x4e   :  { %1052 = vmatprep.subr.bf16.mxu0 %v1051_v49  ;;  %v316_v49 = vld [vmem:[%s1851_s4 + $0x2c8] sm:$0xff]  ;;  %v1077_v51 = vpack.c.bf16 %v313_v48, %v311_v47 }
  0x51   :  { %1054 = vmatpush1.bf16.msra.mxu0 %v1053_v52  ;;  %v1079_v52 = vpack.c.bf16 %v318_v50, %v316_v49 }
  0x52   :  { %1056 = vmatprep.subr.bf16.mxu0 %v1055_v15  ;;  %v327_v15 = vld [vmem:[%s1851_s4 + $0x320] sm:$0xff] }
  0x84   :  { %v1182_v53 = vpop.permute.xlu0 %1181 }
  0x85   :  { %v1508_v54 = vunpack.i.h.bf16 %v1182_v53  ;;  %v1510_v55 = vunpack.i.l.bf16 %v1182_v53  ;;  %v315_v53 = vld [vmem:[%s1851_s4 + $0x2c0] sm:$0xff] }
  0x86   :  { %v1192_v56 = vpop.permute.xlu1 %1191 }
  0x87   :  { %v1123_v58 = vpack.c.bf16 %v1508_v54, %v1510_v55  ;;  %v1194_v61 = vunpack.i.h.bf16 %v1192_v56  ;;  %v1193_v62 = vunpack.i.l.bf16 %v1192_v56  ;;  %v72_v63 = vsel %vm71_vm0, %v1296_v2, %v1510_v55  ;;  %v80_v2 = vld [vmem:[%s1850_s3] sm:$0x3f]  ;;  %v317_v56 = vld [vmem:[%s1851_s4 + $0x2d0] sm:$0xff] }
  0x88   :  { %v1187_v57 = vpop.permute.xlu0 %1186  ;;  %v73_v0 = vsel %vm71_vm0, %v1301_v6, %v1508_v54 }
  0x89   :  { %v1189_v59 = vunpack.i.h.bf16 %v1187_v57  ;;  %v1188_v60 = vunpack.i.l.bf16 %v1187_v57  ;;  %v1524_v5 = vpack.c.bf16 %v73_v0, %v72_v63  ;;  %v320_v57 = vld [vmem:[%s1851_s4 + $0x2e8] sm:$0xff]  ;;  %v321_v63 = vld [vmem:[%s1851_s4 + $0x2f0] sm:$0xff] }
  0x8a   :  { %v324_v0 = vld [vmem:[%s1851_s4 + $0x308] sm:$0xff] }
  0x8b   :  { %v75_v1 = vsel %vm74_vm1, %v1510_v55, %v1188_v60  ;;  %v76_v3 = vsel %vm74_vm1, %v1508_v54, %v1189_v59  ;;  %v79_v7 = vsel %vm77_vm2, %v1189_v59, %v1194_v61  ;;  %v78_v8 = vsel %vm77_vm2, %v1188_v60, %v1193_v62  ;;  %v322_v59 = vld [vmem:[%s1851_s4 + $0x2f8] sm:$0xff]  ;;  %v319_v62 = vld [vmem:[%s1851_s4 + $0x2e0] sm:$0xff] }
  0x8c   :  { %v983_v4 = vpack.c.bf16 %v76_v3, %v75_v1  ;;  %v989_v6 = vpack.c.bf16 %v79_v7, %v78_v8  ;;  %v1081_v60 = vpack.c.bf16 %v317_v56, %v315_v53  ;;  %v1083_v61 = vpack.c.bf16 %v322_v59, %v320_v57  ;;  %v326_v1 = vld [vmem:[%s1851_s4 + $0x318] sm:$0xff]  ;;  %v323_v7 = vld [vmem:[%s1851_s4 + $0x300] sm:$0xff]  ;;  %v325_v8 = vld [vmem:[%s1851_s4 + $0x310] sm:$0xff] }
  0x8d   :  { %v1085_v3 = vpack.c.bf16 %v321_v63, %v319_v62  ;;  %v1089_v9 = vpack.c.bf16 %v325_v8, %v323_v7  ;;  %v546_v53 = vld [vmem:[%s1852_s5] sm:$0xff]  ;;  %v547_v56 = vld [vmem:[%s1852_s5 + $0x8] sm:$0xff]  ;;  %v548_v57 = vld [vmem:[%s1852_s5 + $0x10] sm:$0xff]  ;;  %v1221_v59 = vmov 0.0|0.0  }
  0x8e   :  { %984 = vmatprep.subr.bf16.mxu1 %v983_v4  ;;  %v1087_v4 = vpack.c.bf16 %v326_v1, %v324_v0  ;;  %v550_v0 = vld [vmem:[%s1852_s5 + $0x20] sm:$0xf]  ;;  %v797_v54 = vld [vmem:[%s1854_s7 + $0x18] sm:$0xff] }
  0x8f   :  { %986 = vmatpush1.bf16.msra.mxu1 %v1524_v5 }
  0x90   :  { %988 = vmatprep.subr.bf16.mxu1 %v987_v14  ;;  %v296_v14 = vld [vmem:[%s1851_s4 + $0x228] sm:$0xff] }
  0x91   :  { %v1059_v20 = vpack.c.bf16 %v298_v16, %v296_v14  ;;  %v334_v14 = vld [vmem:[%s1851_s4 + $0x358] sm:$0xff]  ;;  %v1093_v16 = vpack.c.bf16 %v329_v11, %v327_v15 }
  0x92   :  { %935 = vmatmul.mubr.msk.f32.vlgmr.msra.gmra.mrb[0].mxu1 %vm81_vm3, %v80_v2 }
  0x93   :  { %990 = vmatpush1.bf16.msra.mxu1 %v989_v6  ;;  %220 = vmatprep.mubr.f32.mxu1 %v1215_v10  ;;  %v330_v6 = vld [vmem:[%s1851_s4 + $0x338] sm:$0xff] }
  0x94   :  { %1111 = vmatprep.subr.bf16.mxu1 %v1221_v59 }
  0x96   :  { %936 = vmatmul.mubr.msk.f32.vlgmr.msra.gmra.mrb[2].mxu1 %vm81_vm3, %v80_v2  ;;  %v328_v2 = vld [vmem:[%s1851_s4 + $0x328] sm:$0xff] }
  0x97   :  { %v1091_v13 = vpack.c.bf16 %v330_v6, %v328_v2  ;;  %967 = vmatprep.mubr.msk.f32.mxu1 %vm1222_vm6, %v1215_v10 }
 0x165   :  { %v151_v17 = vpop.f32.mrb[0].mxu1 }
 0x166   :  { %v153_v19 = vpop.f32.mrb[1].mxu1 }
 0x167   :  { %414 = vmatprep.mubr.f32.mxu0 %v153_v19  ;;  %v333_v19 = vld [vmem:[%s1851_s4 + $0x350] sm:$0xff] }
 0x168   :  { %415 = vmatmul.mubr.f32.vlgmr.msra.gmra.mrb[0].mxu0 %v151_v17  ;;  %v1095_v17 = vpack.c.bf16 %v334_v14, %v332_v12 }
 0x169   :  { %1058 = vmatpush1.bf16.msra.mxu0 %v1057_v18  ;;  %v1566_v26 = vpop.f32.mrb[2].mxu1  ;;  %v331_v18 = vld [vmem:[%s1851_s4 + $0x340] sm:$0xff] }
 0x16a   :  { %1060 = vmatprep.subr.bf16.mxu0 %v1059_v20  ;;  %v224_v30 = vpop.f32.mrb[3].mxu1  ;;  %v336_v20 = vld [vmem:[%s1851_s4 + $0x368] sm:$0xff]  ;;  %v1097_v22 = vpack.c.bf16 %v333_v19, %v331_v18  ;;  %v794_v19 = vld [vmem:[%s1854_s7] sm:$0xff] }
 0x16b   :  { %937 = vmatprep.mubr.msk.f32.mxu0 %vm71_vm0, %v224_v30  ;;  %v1099_v23 = vpack.c.bf16 %v338_v21, %v336_v20  ;;  %v795_v20 = vld [vmem:[%s1854_s7 + $0x8] sm:$0xff]  ;;  %v719_v21 = vld [vmem:[%s1853_s6] sm:$0xff] }
 0x16d   :  { %1062 = vmatpush1.bf16.msra.mxu0 %v1061_v25  ;;  %v337_v25 = vld [vmem:[%s1851_s4 + $0x370] sm:$0xff] }
 0x16e   :  { %1064 = vmatprep.subr.bf16.mxu0 %v1063_v27  ;;  %v340_v27 = vld [vmem:[%s1851_s4 + $0x388] sm:$0xff]  ;;  %v1101_v29 = vpack.c.bf16 %v337_v25, %v335_v24  ;;  %v800_v24 = vld [vmem:[%s1854_s7 + $0x30] sm:$0xff]  ;;  %v801_v25 = vld [vmem:[%s1854_s7 + $0x38] sm:$0xff] }
 0x16f   :  { %v1103_v30 = vpack.c.bf16 %v342_v28, %v340_v27  ;;  %v1137_v27 = vpack.c.bf16 %v801_v25, %v800_v24  ;;  %v802_v28 = vld [vmem:[%s1854_s7 + $0x40] sm:$0xff] }
 0x171   :  { %1066 = vmatpush1.bf16.msra.mxu0 %v1065_v33  ;;  %v344_v33 = vld [vmem:[%s1851_s4 + $0x3a8] sm:$0xff] }
 0x172   :  { %1068 = vmatprep.subr.bf16.mxu0 %v1067_v34  ;;  %v346_v34 = vld [vmem:[%s1851_s4 + $0x3b8] sm:$0xff]  ;;  %s1709_s4 = sld [smem:[#allocation3 + $0x1]] }
 0x173   :  { %v1107_v36 = vpack.c.bf16 %v346_v34, %v344_v33  ;;  %v1143_v33 = vpack.c.bf16 %v805_v32, %v804_v31  ;;  %v806_v34 = vld [vmem:[%s1854_s7 + $0x60] sm:$0xff] }
 0x175   :  { %1070 = vmatpush1.bf16.msra.mxu0 %v1069_v39  ;;  %v1109_v39 = vpack.c.bf16 %v345_v38, %v343_v37  ;;  %v808_v37 = vld [vmem:[%s1854_s7 + $0x70] sm:$0xff]  ;;  %v809_v38 = vld [vmem:[%s1854_s7 + $0x78] sm:$0xff] }
 0x176   :  { %1072 = vmatprep.subr.bf16.mxu0 %v1071_v40 }
 0x179   :  { %1074 = vmatpush1.bf16.msra.mxu0 %v1073_v45 }
 0x17a   :  { %1076 = vmatprep.subr.bf16.mxu0 %v1075_v46 }
 0x17d   :  { %1078 = vmatpush1.bf16.msra.mxu0 %v1077_v51 }
 0x17e   :  { %1080 = vmatprep.subr.bf16.mxu0 %v1079_v52 }
 0x181   :  { %1082 = vmatpush1.bf16.msra.mxu0 %v1081_v60  ;;  %v1112_v60 = vpack.c.bf16 %v547_v56, %v546_v53 }
 0x182   :  { %1084 = vmatprep.subr.bf16.mxu0 %v1083_v61  ;;  %v549_v61 = vld [vmem:[%s1852_s5 + $0x18] sm:$0xff] }
 0x183   :  { %1113 = vmatpush3.bf16.msra.mxu1 %v1112_v60  ;;  %v1115_v62 = vpack.c.bf16 %v549_v61, %v548_v57 }
 0x184   :  { %1114 = vmatprep.subr.bf16.mxu1 %v1221_v59 }
 0x185   :  { %1086 = vmatpush1.bf16.msra.mxu0 %v1085_v3 }
 0x186   :  { %1088 = vmatprep.subr.bf16.mxu0 %v1087_v4 }
 0x187   :  { %1116 = vmatpush3.bf16.msra.mxu1 %v1115_v62 }
 0x188   :  { %965 = vmatprep.subr.mxu1 %v1215_v10 }
 0x189   :  { %1090 = vmatpush1.bf16.msra.mxu0 %v1089_v9 }
 0x18a   :  { %1092 = vmatprep.subr.bf16.mxu0 %v1091_v13  ;;  %v532_v13 = vstv %s509_s19 }
 0x18b   :  { %966 = vmatpush3.msk.msra.mxu1 %vm555_vm5, %v550_v0 }
 0x18c   :  { %1117 = vmatprep.subr.bf16.mxu1 %v1221_v59 }
 0x18d   :  { %1094 = vmatpush1.bf16.msra.mxu0 %v1093_v16 }
 0x18e   :  { %1096 = vmatprep.subr.bf16.mxu0 %v1095_v17 }
 0x191   :  { %1098 = vmatpush1.bf16.msra.mxu0 %v1097_v22  ;;  %v1128_v22 = vpack.c.bf16 %v795_v20, %v794_v19 }
 0x192   :  { %1100 = vmatprep.subr.bf16.mxu0 %v1099_v23  ;;  %v796_v23 = vld [vmem:[%s1854_s7 + $0x10] sm:$0xff] }
 0x193   :  { %v1131_v55 = vpack.c.bf16 %v797_v54, %v796_v23 }
 0x195   :  { %1102 = vmatpush1.bf16.msra.mxu0 %v1101_v29  ;;  %v803_v29 = vld [vmem:[%s1854_s7 + $0x48] sm:$0xff] }
 0x196   :  { %1104 = vmatprep.subr.bf16.mxu0 %v1103_v30  ;;  %v1140_v30 = vpack.c.bf16 %v803_v29, %v802_v28 }
 0x199   :  { %1106 = vmatpush1.bf16.msra.mxu0 %v1105_v35  ;;  %v807_v35 = vld [vmem:[%s1854_s7 + $0x68] sm:$0xff] }
 0x19a   :  { %1108 = vmatprep.subr.bf16.mxu0 %v1107_v36  ;;  %v1146_v36 = vpack.c.bf16 %v807_v35, %v806_v34 }
 0x19d   :  { %1110 = vmatpush1.bf16.msra.mxu0 %v1109_v39  ;;  %v1149_v39 = vpack.c.bf16 %v809_v38, %v808_v37 }
 0x1a0   :  { %486 = vmatmul.mubr.f32.vlgmr.msra.gmra.mrb[0].mxu0 %v1566_v26  ;;  %v512_v26 = vstv %s1709_s4 }
 0x273   :  { %v487_v40 = vpop.f32.mrb[0].mxu0 }
 0x274   :  { %v489_v41 = vpop.f32.mrb[1].mxu0  ;;  %v492_v42 = vmul.f32 %v487_v40, %v487_v40 }
 0x276   :  { %499 = vrot.lane.b32.xlu1 %v492_v42, %s1218_s27 }
 0x2e8   :  { %v500_v43 = vpop.permute.xlu1 %499 }
 0x2e9   :  { %v502_v44 = vsub.f32 %v487_v40, %v500_v43  ;;  %v503_v45 = vsub.f32 %v489_v41, %v500_v43  ;;  %v812_v43 = vld [vmem:[%s1854_s7 + $0x90] sm:$0xff] }
 0x2eb   :  { %516 = vrot.lane.b32.xlu0 %v502_v44, %s1219_s28  ;;  %518 = vrot.lane.b32.xlu1 %v503_v45, %s1219_s28 }
 0x2ef   :  { %494 = vrot.lane.b32.xlu0 %v487_v40, %s1219_s28 }
 0x35d   :  { %v517_v46 = vpop.permute.xlu0 %516  ;;  %v519_v47 = vpop.permute.xlu1 %518 }
 0x35e   :  { %v521_v48 = vsel %vm520_vm4, %v517_v46, %v519_v47  ;;  %v814_v46 = vld [vmem:[%s1854_s7 + $0xa0] sm:$0xff]  ;;  %v815_v47 = vld [vmem:[%s1854_s7 + $0xa8] sm:$0xff] }
 0x35f   :  { %v523_v49 = vadd.f32 %v521_v48, %v502_v44  ;;  %v813_v44 = vld [vmem:[%s1854_s7 + $0x98] sm:$0xff]  ;;  %v816_v48 = vld [vmem:[%s1854_s7 + $0xb0] sm:$0xff] }
 0x360   :  { %v1155_v45 = vpack.c.bf16 %v813_v44, %v812_v43 }
 0x361   :  { %v524_v50 = vadd.f32 %v523_v49, %v512_v26  ;;  %v495_v51 = vpop.permute.xlu0 %494  ;;  %v817_v49 = vld [vmem:[%s1854_s7 + $0xb8] sm:$0xff] }
 0x362   :  { %v497_v52 = vmul.f32 %v495_v51, %v487_v40  ;;  %v810_v40 = vld [vmem:[%s1854_s7 + $0x80] sm:$0xff] }
 0x363   :  { %1195 = vrcp.f32 %v524_v50  ;;  %v1161_v50 = vpack.c.bf16 %v817_v49, %v816_v48 }
 0x364   :  { %505 = vrot.lane.b32.xlu1 %v497_v52, %s1220_s13  ;;  %v531_v11 = vmul.f32 2.0, %v497_v52 }
 0x366   :  { %v533_v14 = vadd.f32 %v532_v13, %v531_v11 }
 0x368   :  { %534 = vrot.lane.b32.xlu1 %v492_v42, %s1219_s28 }
 0x36d   :  { %v1196_v63 = vpop.eup %1195 }
 0x36e   :  { %527 = vrot.lane.b32.xlu0 %v1196_v63, %s1218_s27 }
 0x3d6   :  { %v506_v1 = vpop.permute.xlu1 %505 }
 0x3d7   :  { %v508_v3 = vsub.f32 %v489_v41, %v506_v1  ;;  %v811_v41 = vld [vmem:[%s1854_s7 + $0x88] sm:$0xff] }
 0x3d9   :  { %v511_v4 = vmul.f32 2.0, %v508_v3 }
 0x3da   :  { %v535_v6 = vpop.permute.xlu1 %534 }
 0x3db   :  { %v513_v7 = vadd.f32 %v512_v26, %v511_v4  ;;  %v537_v9 = vadd.f32 %v535_v6, %v492_v42  ;;  %v1152_v42 = vpack.c.bf16 %v811_v41, %v810_v40  ;;  %v1158_v26 = vpack.c.bf16 %v815_v47, %v814_v46 }
 0x3dd   :  { %v538_v15 = vadd.f32 %v537_v9, %v532_v13 }
 0x3df   :  { %1197 = vrcp.f32 %v538_v15 }
 0x3e0   :  { %v528_v8 = vpop.permute.xlu0 %527 }
 0x3e1   :  { %v530_v2 = vmul.f32 %v528_v8, %v513_v7 }
 0x3e3   :  { %542 = vrot.lane.b32.xlu0 %v530_v2, %s1223_s18 }
 0x3e9   :  { %v1198_v12 = vpop.eup %1197 }
 0x3ea   :  { %v540_v16 = vmul.f32 %v1198_v12, %v533_v14 }
 0x455   :  { %v543_v17 = vpop.permute.xlu0 %542 }
 0x456   :  { %v545_v18 = vmul.f32 %v543_v17, %v540_v16 }
 0x458   :  { %968 = vmatmul.mubr.msk.f32.vlgmr.msra.gmra.mrb[4].mxu1 %vm551_vm7, %v545_v18 }
 0x459   :  { %1119 = vmatpush3.bf16.msra.mxu1 %v1112_v60  ;;  %980 = vmatprep.mubr.msk.f32.mxu1 %vm1222_vm6, %v1215_v10 }
 0x45a   :  { %1120 = vmatprep.subr.bf16.mxu1 %v1221_v59 }
 0x45d   :  { %1122 = vmatpush3.bf16.msra.mxu1 %v1115_v62 }
 0x45e   :  { %978 = vmatprep.subr.mxu1 %v1215_v10 }
 0x461   :  { %979 = vmatpush3.msk.msra.mxu1 %vm555_vm5, %v550_v0 }
 0x462   :  { %981 = vmatmul.mubr.msk.f32.vlgmr.msra.gmra.mrb[6].mxu1 %vm551_vm7, %v543_v17  ;;  %1124 = vmatprep.subr.bf16.mxu1 %v1123_v58  ;;  %v799_v58 = vld [vmem:[%s1854_s7 + $0x28] sm:$0xff] }
 0x463   :  { %1126 = vmatpush1.bf16.msra.mxu1 %v1524_v5  ;;  %787 = vmatprep.mubr.f32.mxu1 %v1215_v10  ;;  %v798_v10 = vld [vmem:[%s1854_s7 + $0x20] sm:$0xff] }
 0x464   :  { %1127 = vmatprep.subr.bf16.mxu1 %v1221_v59  ;;  %v1134_v5 = vpack.c.bf16 %v799_v58, %v798_v10 }
 0x466   :  { %943 = vmatmul.mubr.msk.f32.vlgmr.msra.gmra.mrb[8].mxu1 %vm81_vm3, %v719_v21 }
 0x467   :  { %1129 = vmatpush1.bf16.msra.mxu1 %v1128_v22 }
 0x468   :  { %1130 = vmatprep.subr.bf16.mxu1 %v1221_v59 }
 0x46b   :  { %1132 = vmatpush1.bf16.msra.mxu1 %v1131_v55 }
 0x46c   :  { %1133 = vmatprep.subr.bf16.mxu1 %v1221_v59 }
 0x46f   :  { %1135 = vmatpush1.bf16.msra.mxu1 %v1134_v5 }
 0x470   :  { %1136 = vmatprep.subr.bf16.mxu1 %v1221_v59 }
 0x473   :  { %1138 = vmatpush1.bf16.msra.mxu1 %v1137_v27 }
 0x474   :  { %1139 = vmatprep.subr.bf16.mxu1 %v1221_v59 }
 0x477   :  { %1141 = vmatpush1.bf16.msra.mxu1 %v1140_v30 }
 0x478   :  { %1142 = vmatprep.subr.bf16.mxu1 %v1221_v59 }
 0x47b   :  { %1144 = vmatpush1.bf16.msra.mxu1 %v1143_v33 }
 0x47c   :  { %1145 = vmatprep.subr.bf16.mxu1 %v1221_v59 }
 0x47f   :  { %1147 = vmatpush1.bf16.msra.mxu1 %v1146_v36 }
 0x480   :  { %1148 = vmatprep.subr.bf16.mxu1 %v1221_v59 }
 0x483   :  { %1150 = vmatpush1.bf16.msra.mxu1 %v1149_v39 }
 0x484   :  { %1151 = vmatprep.subr.bf16.mxu1 %v1221_v59 }
 0x487   :  { %1153 = vmatpush1.bf16.msra.mxu1 %v1152_v42 }
 0x488   :  { %1154 = vmatprep.subr.bf16.mxu1 %v1221_v59 }
 0x48b   :  { %1156 = vmatpush1.bf16.msra.mxu1 %v1155_v45 }
 0x48c   :  { %1157 = vmatprep.subr.bf16.mxu1 %v1221_v59 }
 0x48f   :  { %1159 = vmatpush1.bf16.msra.mxu1 %v1158_v26 }
 0x490   :  { %1160 = vmatprep.subr.bf16.mxu1 %v1221_v59 }
 0x493   :  { %1162 = vmatpush1.bf16.msra.mxu1 %v1161_v50 }
 0x52b   :  { %v625_v51 = vpop.f32.mrb[4].mxu1 }
 0x52c   :  { %v630_v52 = vsel %vm629_vm8, %v625_v51, 0.0  ;;  %v969_v53 = vpop.f32.mrb[5].mxu1 }
 0x52d   :  { %v631_v56 = vrot.slane %v630_v52, 4 }
 0x52f   :  { %v632_v57 = vadd.f32 %v631_v56, %v630_v52 }
 0x531   :  { %v633_v60 = vrot.slane %v632_v57, 2 }
 0x533   :  { %v634_v61 = vadd.f32 %v633_v60, %v632_v57 }
 0x535   :  { %v635_v62 = vrot.slane %v634_v61, 1  ;;  %v705_v59 = vpop.f32.mrb[6].mxu1 }
 0x536   :  { %v709_v63 = vsel %vm629_vm8, %v705_v59, 0.0  ;;  %v982_v0 = vpop.f32.mrb[7].mxu1 }
 0x537   :  { %v636_v1 = vadd.f32 %v635_v62, %v634_v61  ;;  %v710_v3 = vrot.slane %v709_v63, 4 }
 0x539   :  { %717 = vst.msk [vmem:[%s1855_s8] sm:$0x1] %vm716_vm9, %v636_v1  ;;  %v711_v4 = vadd.f32 %v710_v3, %v709_v63  ;;  %v789_v7 = vpop.f32.mrb[8].mxu1 }
 0x53a   :  { %v791_v8 = vpop.f32.mrb[9].mxu1 }
 0x53b   :  { %v712_v2 = vrot.slane %v711_v4, 2  ;;  %944 = vmatprep.mubr.msk.f32.mxu1 %vm74_vm1, %v791_v8 }
 0x53c   :  { %886 = vmatmul.mubr.f32.vlgmr.msra.gmra.mrb[10].mxu1 %v789_v7 }
 0x53d   :  { %v713_v6 = vadd.f32 %v712_v2, %v711_v4 }
 0x53f   :  { %v714_v9 = vrot.slane %v713_v6, 1 }
 0x541   :  { %v715_v13 = vadd.f32 %v714_v9, %v713_v6 }
 0x543   :  { %718 = vst.msk [vmem:[%s1856_s9] sm:$0x1] %vm716_vm9, %v715_v13 }
 0x60f   :  { %v887_v15 = vpop.f32.mrb[10].mxu1 }
 0x610   :  { %891 = vst.msk [vmem:[%s1857_s10] sm:$0xff] %vm71_vm0, %v887_v15  ;;  %v889_v11 = vpop.f32.mrb[11].mxu1  ;;  %v904_v12 = vsel %vm892_vm10, %v887_v15, inf  ;;  %v893_v14 = vsel %vm892_vm10, %v887_v15, -inf }
 0x611   :  { %905 = vmin.xlane.f32.xlu0 %v904_v12  ;;  %894 = vmax.xlane.f32.xlu1 %v893_v14 }
 0x69e   :  { %v906_v16 = vpop.xlane.xlu0 %905  ;;  %v895_v17 = vpop.xlane.xlu1 %894 }
 0x69f   :  { %v907_v18 = vrot.slane %v906_v16, 4  ;;  %v896_v19 = vrot.slane %v895_v17, 4 }
 0x6a1   :  { %v908_v20 = vmin.f32 %v906_v16, %v907_v18  ;;  %v897_v21 = vmax.f32 %v895_v17, %v896_v19 }
 0x6a3   :  { %v909_v22 = vrot.slane %v908_v20, 2  ;;  %v898_v23 = vrot.slane %v897_v21, 2 }
 0x6a5   :  { %v910_v54 = vmin.f32 %v908_v20, %v909_v22  ;;  %v899_v55 = vmax.f32 %v897_v21, %v898_v23 }
 0x6a7   :  { %v900_v10 = vrot.slane %v899_v55, 1  ;;  %v911_v58 = vrot.slane %v910_v54, 1 }
 0x6a9   :  { %v901_v5 = vmax.f32 %v899_v55, %v900_v10  ;;  %v912_v24 = vmin.f32 %v910_v54, %v911_v58 }
 0x6ab   :  { %1165 = vpush %v901_v5 }
 0x6ac   :  { %1167 = vpush %v912_v24 }
 0x6dc   :  { %s1166_s8 = spop %1165 }
 0x6dd   :  { %v903_v25 = vstv %s1166_s8  ;;  %s1168_s9 = spop %1167 }
 0x6de   :  { %v914_v27 = vstv %s1168_s9 }
 0x6df   :  { %v916_v28 = vsel %vm915_vm11, %v903_v25, %v914_v27 }
 0x6e0   :  { %918 = vst.msk [vmem:[%s1858_s11] sm:$0x1] %vm917_vm12, %v916_v28 }

// kernel: msssim_pallas.2
= control target key start
LH: loop header
LB: loop body
LE: loop exit
PB: predicated region body
PF: predicated region fallthrough
CT: control target
= control target key end

     0   :  { %s5394_s0 = inlined_call_operand.vmem [shape: f32[2], index: 0, kind: input, shape index: {}]   ;;  %s5395_s1 = inlined_call_operand.vmem [shape: f32[1,32,192], index: 1, kind: input, shape index: {}]   ;;  %s5396_s2 = inlined_call_operand.vmem [shape: f32[1,32,192], index: 2, kind: input, shape index: {}]   ;;  %s5397_s3 = inlined_call_operand.hbm [shape: f32[22,32], index: 3, kind: input, shape index: {}]   ;;  %s5398_s4 = inlined_call_operand.hbm [shape: f32[960,660], index: 4, kind: input, shape index: {}]   ;;  %s5399_s5 = inlined_call_operand.hbm [shape: f32[132,6], index: 5, kind: input, shape index: {}]   ;;  %s5400_s6 = inlined_call_operand.hbm [shape: f32[16,32], index: 6, kind: input, shape index: {}]   ;;  %s5401_s7 = inlined_call_operand.hbm [shape: f32[384,192], index: 7, kind: input, shape index: {}]   ;;  %s5402_s8 = inlined_call_operand.vmem [shape: f32[1,1,6], index: 8, kind: output, shape index: {0}]   ;;  %s5403_s9 = inlined_call_operand.vmem [shape: f32[1,1,6], index: 9, kind: output, shape index: {1}]   ;;  %s5404_s10 = inlined_call_operand.vmem [shape: f32[1,16,192], index: 10, kind: output, shape index: {2}]   ;;  %s5405_s11 = inlined_call_operand.vmem [shape: f32[1,1,2], index: 11, kind: output, shape index: {3}]  }
   0x1   :  { %s17_s19 = sshll.u32 %s5394_s0, 4  ;;  %s18_s19 = int_to_ptr.vmem [resolvable:$true] %s17_s19 }
   0x2   :  { %s4410_s20 = scalar_lea.vmem %s18_s19, 16  ;;  %p4415_p1 = scmp.lt.s32.totalorder %s18_s19, %s18_s19 }
   0x3   :  { %p4411_p0 = scmp.ne.s32.totalorder %s18_s19, %s4410_s20  ;;  %p4416_p2 = scmp.lt.s32.totalorder %s4410_s20, %s4410_s20 }
   0x5   :  { %p4417_p3 = por %p4416_p2, %p4415_p1 }
   0x7   :  { %p4418_p4 = pnand %p4417_p3, %p4411_p0 }
   0x9   :  { %4421 = shalt.err (!%p4418_p4)  }
   0xa   :  { %s4540_s21 = smov [#allocation3]  }
   0xb   :  { %20 = dma.vmem_to_smem %s18_s19, 16, %s4540_s21, [#allocation2] }
   0xc   :  { %4532 = dma.done.wait [#allocation2], 16 }
   0xd   :  { %4533 = vsyncadd [#allocation2], 4294967280 }
   0xe   :  { %22 = sfence }
   0xf   :  { %23 = vsyncpa [#allocation5], 0 }
  0x10   :  { %24 = vsyncpa [#allocation7], 0 }
  0x11   :  { %25 = vsyncpa [#allocation10], 0  ;;  %s4541_s22 = smov [#allocation6]   ;;  %s4422_s25 = scalar_lea.hbm %s5398_s4, 92160 }
  0x12   :  { %s47_s23 = sshll.u32 %s4541_s22, 4  ;;  %p4423_p5 = scmp.ne.s32.totalorder %s5398_s4, %s4422_s25  ;;  %s48_s23 = int_to_ptr.vmem [resolvable:$true] %s47_s23 }
  0x13   :  { %p4426_p6 = scmp.lt.u32.totalorder %s4422_s25, %s5398_s4 }
  0x15   :  { %p4428_p7 = pnand %p4426_p6, %p4423_p5 }
  0x17   :  { %4431 = shalt.err (!%p4428_p7)
}
  0x18   :  { %s4432_s30 = scalar_lea.vmem %s48_s23, 92160  ;;  %p4437_p9 = scmp.lt.s32.totalorder %s48_s23, %s48_s23 }
  0x19   :  { %p4433_p8 = scmp.ne.s32.totalorder %s48_s23, %s4432_s30  ;;  %p4438_p10 = scmp.lt.s32.totalorder %s4432_s30, %s4432_s30 }
  0x1b   :  { %p4439_p11 = por %p4438_p10, %p4437_p9 }
  0x1d   :  { %p4440_p12 = pnand %p4439_p11, %p4433_p8 }
  0x1f   :  { %4443 = shalt.err (!%p4440_p12)
}
  0x20   :  { %s4542_s12 = smov 768   ;;  %s4543_s13 = smov 48  }
  0x21   :  { %53 = dma.hbm_to_vmem [thread:$0]  %s5398_s4, 92160, %s48_s23, [#allocation7], %s4542_s12, %s4542_s12, %s4543_s13  }
  0x22   :  { %s4544_s16 = smov [#allocation9]   ;;  %s4545_s18 = smov [#allocation4]  }
  0x23   :  { %s71_s17 = sshll.u32 %s4544_s16, 4  ;;  %s35_s19 = sshll.u32 %s4545_s18, 4  ;;  %s72_s17 = int_to_ptr.vmem [resolvable:$true] %s71_s17  ;;  %s36_s19 = int_to_ptr.vmem [resolvable:$true] %s35_s19 }
  0x24   :  { %s4444_s22 = scalar_lea.hbm %s5400_s6, 256 }
  0x25   :  { %p4445_p13 = scmp.ne.s32.totalorder %s5400_s6, %s4444_s22  ;;  %p4448_p0 = scmp.lt.u32.totalorder %s4444_s22, %s5400_s6 }
  0x27   :  { %p4450_p1 = pnand %p4448_p0, %p4445_p13 }
  0x29   :  { %4453 = shalt.err (!%p4450_p1)
}
  0x2a   :  { %s4454_s4 = scalar_lea.vmem %s72_s17, 256  ;;  %p4459_p3 = scmp.lt.s32.totalorder %s72_s17, %s72_s17 }
  0x2b   :  { %p4455_p2 = scmp.ne.s32.totalorder %s72_s17, %s4454_s4  ;;  %p4460_p4 = scmp.lt.s32.totalorder %s4454_s4, %s4454_s4 }
  0x2d   :  { %p4461_p5 = por %p4460_p4, %p4459_p3 }
  0x2f   :  { %p4462_p6 = pnand %p4461_p5, %p4455_p2 }
  0x31   :  { %4465 = shalt.err (!%p4462_p6)
}
  0x32   :  { %s4546_s23 = smov 128   ;;  %s4547_s27 = smov 8  }
  0x33   :  { %77 = dma.hbm_to_vmem [thread:$0]  %s5400_s6, 256, %s72_s17, [#allocation10], %s4546_s23, %s4546_s23, %s4547_s27  }
  0x34   :  { %s4466_s13 = scalar_lea.hbm %s5397_s3, 384 }
  0x35   :  { %p4467_p7 = scmp.ne.s32.totalorder %s5397_s3, %s4466_s13  ;;  %p4470_p8 = scmp.lt.u32.totalorder %s4466_s13, %s5397_s3 }
  0x37   :  { %p4472_p9 = pnand %p4470_p8, %p4467_p7 }
  0x39   :  { %4475 = shalt.err (!%p4472_p9)
}
  0x3a   :  { %s4476_s20 = scalar_lea.vmem %s36_s19, 384  ;;  %p4481_p11 = scmp.lt.s32.totalorder %s36_s19, %s36_s19 }
  0x3b   :  { %p4477_p10 = scmp.ne.s32.totalorder %s36_s19, %s4476_s20  ;;  %p4482_p12 = scmp.lt.s32.totalorder %s4476_s20, %s4476_s20 }
  0x3d   :  { %p4483_p13 = por %p4482_p12, %p4481_p11 }
  0x3f   :  { %p4484_p0 = pnand %p4483_p13, %p4477_p10 }
  0x41   :  { %4487 = shalt.err (!%p4484_p0)
}
  0x42   :  { %41 = dma.hbm_to_vmem [thread:$0]  %s5397_s3, 384, %s36_s19, [#allocation5], %s4546_s23, %s4546_s23, %s4547_s27  }
  0x43   :  { %s4548_s21 = smov [#allocation8]   ;;  %s4549_s0 = smov [#allocation11]  }
  0x44   :  { %s59_s22 = sshll.u32 %s4548_s21, 4  ;;  %s83_s24 = sshll.u32 %s4549_s0, 4  ;;  %s60_s22 = int_to_ptr.vmem [resolvable:$true] %s59_s22  ;;  %s84_s24 = int_to_ptr.vmem [resolvable:$true] %s83_s24 }
  0x45   :  { %s4488_s4 = scalar_lea.hbm %s5399_s5, 2176 }
  0x46   :  { %p4489_p1 = scmp.ne.s32.totalorder %s5399_s5, %s4488_s4  ;;  %p4492_p2 = scmp.lt.u32.totalorder %s4488_s4, %s5399_s5 }
  0x48   :  { %p4494_p3 = pnand %p4492_p2, %p4489_p1 }
  0x4a   :  { %4497 = shalt.err (!%p4494_p3)
}
  0x4b   :  { %s4498_s3 = scalar_lea.vmem %s60_s22, 2176  ;;  %p4503_p5 = scmp.lt.s32.totalorder %s60_s22, %s60_s22 }
  0x4c   :  { %p4499_p4 = scmp.ne.s32.totalorder %s60_s22, %s4498_s3  ;;  %p4504_p6 = scmp.lt.s32.totalorder %s4498_s3, %s4498_s3 }
  0x4e   :  { %p4505_p7 = por %p4504_p6, %p4503_p5 }
  0x50   :  { %p4506_p8 = pnand %p4505_p7, %p4499_p4 }
  0x52   :  { %4509 = shalt.err (!%p4506_p8)
}
  0x53   :  { %65 = dma.hbm_to_vmem [thread:$0]  %s5399_s5, 2176, %s60_s22, [#allocation7], %s4546_s23, %s4546_s23, %s4547_s27  }
  0x54   :  { %s4510_s16 = scalar_lea.hbm %s5401_s7, 12288 }
  0x55   :  { %p4511_p9 = scmp.ne.s32.totalorder %s5401_s7, %s4510_s16  ;;  %p4514_p10 = scmp.lt.u32.totalorder %s4510_s16, %s5401_s7 }
  0x57   :  { %p4516_p11 = pnand %p4514_p10, %p4511_p9 }
  0x59   :  { %4519 = shalt.err (!%p4516_p11)
}
  0x5a   :  { %s4520_s21 = scalar_lea.vmem %s84_s24, 12288  ;;  %p4525_p13 = scmp.lt.s32.totalorder %s84_s24, %s84_s24 }
  0x5b   :  { %p4521_p12 = scmp.ne.s32.totalorder %s84_s24, %s4520_s21  ;;  %p4526_p0 = scmp.lt.s32.totalorder %s4520_s21, %s4520_s21 }
  0x5d   :  { %p4527_p1 = por %p4526_p0, %p4525_p13 }
  0x5f   :  { %p4528_p2 = pnand %p4527_p1, %p4521_p12 }
  0x61   :  { %4531 = shalt.err (!%p4528_p2)
}
  0x62   :  { %s4550_s5 = smov 256   ;;  %s4551_s23 = smov 16  }
  0x63   :  { %89 = dma.hbm_to_vmem [thread:$0]  %s5401_s7, 12288, %s84_s24, [#allocation10], %s4550_s5, %s4550_s5, %s4551_s23  }
  0x64   :  { %4534 = dma.done.wait [#allocation5], 384  }
  0x65   :  { %4535 = vsyncadd [#allocation5], 4294966912 }
  0x66   :  { %4536 = dma.done.wait [#allocation7], 94336  }
  0x67   :  { %4537 = vsyncadd [#allocation7], 4294872960 }
  0x68   :  { %4538 = dma.done.wait [#allocation10], 12544  }
  0x69   :  { %4539 = vsyncadd [#allocation10], 4294954752  ;;  %v114_v0 = vld [vmem:[%s5396_s2 + $0x8] sm:$0xff]  ;;  %v116_v1 = vld [vmem:[%s5396_s2 + $0x18] sm:$0xff]  ;;  %s4552_s20 = smov 64   ;;  %v4553_v13 = vmov 0.0  }
  0x6a   :  { %v113_v2 = vld [vmem:[%s5396_s2] sm:$0xff]  ;;  %v4356_v3 = vpack.i.bf16 %v116_v1, %v114_v0  ;;  %v115_v4 = vld [vmem:[%s5396_s2 + $0x10] sm:$0xff]  ;;  %v118_v5 = vld [vmem:[%s5396_s2 + $0x28] sm:$0xff]  ;;  %v132_v12 = vmul.f32 %v116_v1, %v116_v1  ;;  %303 = vmatprep.mubr.f32.mxu1 %v4553_v13  ;;  %v130_v16 = vmul.f32 %v114_v0, %v114_v0  ;;  %vm169_vm0 = vcmask 523264   ;;  %s3325_s3 = sld [smem:[#allocation3 + $0x1]] }
  0x6b   :  { %v120_v6 = vld [vmem:[%s5396_s2 + $0x38] sm:$0xff]  ;;  %v4346_v7 = vpack.i.bf16 %v115_v4, %v113_v2  ;;  %v117_v8 = vld [vmem:[%s5396_s2 + $0x20] sm:$0xff]  ;;  %v119_v9 = vld [vmem:[%s5396_s2 + $0x30] sm:$0xff]  ;;  %v131_v11 = vmul.f32 %v115_v4, %v115_v4  ;;  %v129_v15 = vmul.f32 %v113_v2, %v113_v2  ;;  %v134_v22 = vmul.f32 %v118_v5, %v118_v5 }
  0x6c   :  { %4357 = vrot.lane.b32.xlu1 %v4356_v3, %s4552_s20  ;;  %v4361_v10 = vpack.i.bf16 %v120_v6, %v118_v5  ;;  %v4351_v14 = vpack.i.bf16 %v119_v9, %v117_v8  ;;  %v135_v18 = vmul.f32 %v119_v9, %v119_v9  ;;  %v136_v19 = vmul.f32 %v120_v6, %v120_v6  ;;  %v4718_v25 = vld [vmem:[%s5395_s1] sm:$0xff]  ;;  %v4723_v26 = vld [vmem:[%s5395_s1 + $0x10] sm:$0xff]  ;;  %v4728_v27 = vld [vmem:[%s5395_s1 + $0x8] sm:$0xff] }
  0x6d   :  { %4347 = vrot.lane.b32.xlu0 %v4346_v7, %s4552_s20  ;;  %v4371_v17 = vpack.i.bf16 %v132_v12, %v131_v11  ;;  %v4366_v20 = vpack.i.bf16 %v130_v16, %v129_v15  ;;  %v133_v21 = vmul.f32 %v117_v8, %v117_v8  ;;  %v4733_v28 = vld [vmem:[%s5395_s1 + $0x18] sm:$0xff]  ;;  %v4736_v29 = vmul.f32 %v113_v2, %v4718_v25  ;;  %v4750_v33 = vld [vmem:[%s5395_s1 + $0x20] sm:$0xff]  ;;  %v4755_v34 = vld [vmem:[%s5395_s1 + $0x30] sm:$0xff] }
  0x6e   :  { %v4381_v23 = vpack.i.bf16 %v136_v19, %v135_v18  ;;  %v4739_v30 = vmul.f32 %v115_v4, %v4723_v26  ;;  %v4742_v31 = vmul.f32 %v114_v0, %v4728_v27  ;;  %v4745_v32 = vmul.f32 %v116_v1, %v4733_v28  ;;  %v4762_v36 = vld [vmem:[%s5395_s1 + $0x28] sm:$0xff]  ;;  %v4767_v37 = vld [vmem:[%s5395_s1 + $0x38] sm:$0xff]  ;;  %v572_v45 = vld [vmem:[#allocation6 + $0x8] sm:$0xff]  ;;  %s4554_s1 = smov 124  }
  0x6f   :  { %v4376_v24 = vpack.i.bf16 %v134_v22, %v133_v21  ;;  %v4770_v38 = vmul.f32 %v117_v8, %v4750_v33  ;;  %v4773_v39 = vmul.f32 %v119_v9, %v4755_v34  ;;  %v4778_v41 = vmul.f32 %v118_v5, %v4762_v36  ;;  %v578_v46 = vld [vmem:[#allocation6 + $0x38] sm:$0xff]  ;;  %v571_v48 = vld [vmem:[#allocation6] sm:$0xff]  ;;  %v577_v49 = vld [vmem:[#allocation6 + $0x30] sm:$0xff] }
  0x70   :  { %4362 = vrot.lane.b32.xlu1 %v4361_v10, %s4552_s20  ;;  %v3379_v35 = vpack.c.bf16 %v4745_v32, %v4742_v31  ;;  %v3381_v40 = vpack.c.bf16 %v4739_v30, %v4736_v29  ;;  %v4781_v42 = vmul.f32 %v120_v6, %v4767_v37  ;;  %v3387_v47 = vpack.c.bf16 %v578_v46, %v572_v45  ;;  %v584_v51 = vld [vmem:[#allocation6 + $0x68] sm:$0xff]  ;;  %v590_v52 = vld [vmem:[#allocation6 + $0x98] sm:$0xff]  ;;  %v583_v54 = vld [vmem:[#allocation6 + $0x60] sm:$0xff] }
  0x71   :  { %4352 = vrot.lane.b32.xlu0 %v4351_v14, %s4552_s20  ;;  %v3385_v44 = vpack.c.bf16 %v4773_v39, %v4770_v38  ;;  %v3389_v50 = vpack.c.bf16 %v577_v49, %v571_v48  ;;  %v3391_v53 = vpack.c.bf16 %v590_v52, %v584_v51  ;;  %v589_v55 = vld [vmem:[#allocation6 + $0x90] sm:$0xff]  ;;  %v596_v57 = vld [vmem:[#allocation6 + $0xc8] sm:$0xff]  ;;  %v602_v58 = vld [vmem:[#allocation6 + $0xf8] sm:$0xff]  ;;  %vm229_vm1 = vcmask 261120  }
  0x72   :  { %v3383_v43 = vpack.c.bf16 %v4781_v42, %v4778_v41  ;;  %3388 = vmatprep.subr.bf16.mxu0 %v3387_v47  ;;  %v3393_v56 = vpack.c.bf16 %v589_v55, %v583_v54  ;;  %v3395_v59 = vpack.c.bf16 %v602_v58, %v596_v57  ;;  %v595_v60 = vld [vmem:[#allocation6 + $0xc0] sm:$0xff]  ;;  %v601_v61 = vld [vmem:[#allocation6 + $0xf0] sm:$0xff]  ;;  %v608_v63 = vld [vmem:[#allocation6 + $0x128] sm:$0xff]  ;;  %vm2357_vm2 = vcmask 64512  }
  0x73   :  { %3390 = vmatpush1.bf16.msra.mxu0 %v3389_v50  ;;  %v3397_v62 = vpack.c.bf16 %v601_v61, %v595_v60  ;;  %v614_v0 = vld [vmem:[#allocation6 + $0x158] sm:$0xff]  ;;  %v607_v2 = vld [vmem:[#allocation6 + $0x120] sm:$0xff]  ;;  %v613_v3 = vld [vmem:[#allocation6 + $0x150] sm:$0xff]  ;;  %vm2323_vm3 = vcmask 1014784   ;;  %vm2415_vm4 = vcmask 130048   ;;  %vm2643_vm5 = vcmask 1043456  }
  0x74   :  { %4372 = vrot.lane.b32.xlu1 %v4371_v17, %s4552_s20  ;;  %3392 = vmatprep.subr.bf16.mxu0 %v3391_v53  ;;  %v3399_v1 = vpack.c.bf16 %v614_v0, %v608_v63  ;;  %v3401_v4 = vpack.c.bf16 %v613_v3, %v607_v2  ;;  %v620_v5 = vld [vmem:[#allocation6 + $0x188] sm:$0xff]  ;;  %v626_v6 = vld [vmem:[#allocation6 + $0x1b8] sm:$0xff]  ;;  %v619_v8 = vld [vmem:[#allocation6 + $0x180] sm:$0xff]  ;;  %vm2600_vm6 = vcmask 916480   ;;  %vm2633_vm7 = vcmask 31744  }
  0x75   :  { %4367 = vrot.lane.b32.xlu0 %v4366_v20, %s4552_s20  ;;  %v3403_v7 = vpack.c.bf16 %v626_v6, %v620_v5  ;;  %v625_v9 = vld [vmem:[#allocation6 + $0x1b0] sm:$0xff]  ;;  %v632_v11 = vld [vmem:[#allocation6 + $0x1e8] sm:$0xff]  ;;  %v638_v12 = vld [vmem:[#allocation6 + $0x218] sm:$0xff]  ;;  %vm2727_vm8 = vcmask 48128   ;;  %vm2731_vm9 = vcmask 46080   ;;  %vm2837_vm10 = vcmask 40960  }
  0x76   :  { %v3405_v10 = vpack.c.bf16 %v625_v9, %v619_v8  ;;  %v3407_v14 = vpack.c.bf16 %v638_v12, %v632_v11  ;;  %v631_v15 = vld [vmem:[#allocation6 + $0x1e0] sm:$0xff]  ;;  %v637_v16 = vld [vmem:[#allocation6 + $0x210] sm:$0xff]  ;;  %v644_v18 = vld [vmem:[#allocation6 + $0x248] sm:$0xff]  ;;  %vm3254_vm11 = vcmask 785408   ;;  %vm3281_vm12 = vcmask 7168  }
  0x77   :  { %3394 = vmatpush1.bf16.msra.mxu0 %v3393_v56  ;;  %v3409_v17 = vpack.c.bf16 %v637_v16, %v631_v15  ;;  %v650_v19 = vld [vmem:[#allocation6 + $0x278] sm:$0xff]  ;;  %v643_v21 = vld [vmem:[#allocation6 + $0x240] sm:$0xff]  ;;  %v649_v22 = vld [vmem:[#allocation6 + $0x270] sm:$0xff]  ;;  %vm3283_vm13 = vcmask 8192  }
  0x78   :  { %4382 = vrot.lane.b32.xlu1 %v4381_v23, %s4552_s20  ;;  %3396 = vmatprep.subr.bf16.mxu0 %v3395_v59  ;;  %v3411_v20 = vpack.c.bf16 %v650_v19, %v644_v18  ;;  %v3413_v23 = vpack.c.bf16 %v649_v22, %v643_v21  ;;  %v662_v45 = vld [vmem:[#allocation6 + $0x2d8] sm:$0xff]  ;;  %v655_v47 = vld [vmem:[#allocation6 + $0x2a0] sm:$0xff]  ;;  %v661_v48 = vld [vmem:[#allocation6 + $0x2d0] sm:$0xff] }
  0x79   :  { %4377 = vrot.lane.b32.xlu0 %v4376_v24, %s4552_s20  ;;  %v656_v24 = vld [vmem:[#allocation6 + $0x2a8] sm:$0xff]  ;;  %v3417_v49 = vpack.c.bf16 %v661_v48, %v655_v47  ;;  %v674_v51 = vld [vmem:[#allocation6 + $0x338] sm:$0xff]  ;;  %v667_v53 = vld [vmem:[#allocation6 + $0x300] sm:$0xff] }
  0x7a   :  { %v3415_v46 = vpack.c.bf16 %v662_v45, %v656_v24  ;;  %v668_v50 = vld [vmem:[#allocation6 + $0x308] sm:$0xff]  ;;  %v673_v54 = vld [vmem:[#allocation6 + $0x330] sm:$0xff]  ;;  %v686_v57 = vld [vmem:[#allocation6 + $0x398] sm:$0xff] }
  0x7b   :  { %3398 = vmatpush1.bf16.msra.mxu0 %v3397_v62  ;;  %v3419_v52 = vpack.c.bf16 %v674_v51, %v668_v50  ;;  %v3421_v55 = vpack.c.bf16 %v673_v54, %v667_v53  ;;  %v680_v56 = vld [vmem:[#allocation6 + $0x368] sm:$0xff]  ;;  %v679_v59 = vld [vmem:[#allocation6 + $0x360] sm:$0xff]  ;;  %v685_v60 = vld [vmem:[#allocation6 + $0x390] sm:$0xff] }
  0x7c   :  { %3400 = vmatprep.subr.bf16.mxu0 %v3399_v1  ;;  %v3423_v58 = vpack.c.bf16 %v686_v57, %v680_v56  ;;  %v3425_v61 = vpack.c.bf16 %v685_v60, %v679_v59  ;;  %v692_v62 = vld [vmem:[#allocation6 + $0x3c8] sm:$0xff]  ;;  %v698_v63 = vld [vmem:[#allocation6 + $0x3f8] sm:$0xff]  ;;  %v691_v1 = vld [vmem:[#allocation6 + $0x3c0] sm:$0xff]  ;;  %v121_v59 = vmul.f32 %v4718_v25, %v4718_v25  ;;  %v123_v60 = vmul.f32 %v4723_v26, %v4723_v26 }
  0x7d   :  { %v3427_v0 = vpack.c.bf16 %v698_v63, %v692_v62  ;;  %v697_v2 = vld [vmem:[#allocation6 + $0x3f0] sm:$0xff]  ;;  %v710_v5 = vld [vmem:[#allocation6 + $0x458] sm:$0xff]  ;;  %v592_v29 = vld [vmem:[#allocation6 + $0xa8] sm:$0xff] }
  0x7e   :  { %v3429_v3 = vpack.c.bf16 %v697_v2, %v691_v1  ;;  %v709_v8 = vld [vmem:[#allocation6 + $0x450] sm:$0xff]  ;;  %v722_v11 = vld [vmem:[#allocation6 + $0x4b8] sm:$0xff]  ;;  %v4797_v1 = vpack.c.bf16 %v4723_v26, %v4718_v25  ;;  %v591_v42 = vld [vmem:[#allocation6 + $0xa0] sm:$0xff] }
  0x7f   :  { %3402 = vmatpush1.bf16.msra.mxu0 %v3401_v4  ;;  %v704_v4 = vld [vmem:[#allocation6 + $0x428] sm:$0xff]  ;;  %v721_v15 = vld [vmem:[#allocation6 + $0x4b0] sm:$0xff]  ;;  %v734_v18 = vld [vmem:[#allocation6 + $0x518] sm:$0xff] }
  0x80   :  { %3404 = vmatprep.subr.bf16.mxu0 %v3403_v7  ;;  %v3431_v6 = vpack.c.bf16 %v710_v5, %v704_v4  ;;  %v703_v7 = vld [vmem:[#allocation6 + $0x420] sm:$0xff]  ;;  %v733_v21 = vld [vmem:[#allocation6 + $0x510] sm:$0xff]  ;;  %v746_v24 = vld [vmem:[#allocation6 + $0x578] sm:$0xff] }
  0x81   :  { %v3433_v9 = vpack.c.bf16 %v709_v8, %v703_v7  ;;  %v745_v47 = vld [vmem:[#allocation6 + $0x570] sm:$0xff]  ;;  %v758_v50 = vld [vmem:[#allocation6 + $0x5d8] sm:$0xff]  ;;  %v4804_v7 = vpack.c.bf16 %v4755_v34, %v4750_v33  ;;  %v3363_v8 = vpack.c.bf16 %v123_v60, %v121_v59 }
  0x82   :  { %v757_v53 = vld [vmem:[#allocation6 + $0x5d0] sm:$0xff]  ;;  %v4845_v59 = vld [vmem:[#allocation4 + $0x10] sm:$0x3f] }
  0x83   :  { %3406 = vmatpush1.bf16.msra.mxu0 %v3405_v10  ;;  %v716_v10 = vld [vmem:[#allocation6 + $0x488] sm:$0xff]  ;;  %v573_v32 = vld [vmem:[#allocation6 + $0x10] sm:$0xff] }
  0x84   :  { %3408 = vmatprep.subr.bf16.mxu0 %v3407_v14  ;;  %v3435_v12 = vpack.c.bf16 %v722_v11, %v716_v10  ;;  %v715_v14 = vld [vmem:[#allocation6 + $0x480] sm:$0xff]  ;;  %v127_v11 = vmul.f32 %v4755_v34, %v4755_v34  ;;  %v585_v41 = vld [vmem:[#allocation6 + $0x70] sm:$0xff] }
  0x85   :  { %v3437_v16 = vpack.c.bf16 %v721_v15, %v715_v14  ;;  %v3633_v38 = vpack.c.bf16 %v591_v42, %v585_v41  ;;  %v712_v41 = vld [vmem:[#allocation6 + $0x468] sm:$0xff] }
  0x87   :  { %3410 = vmatpush1.bf16.msra.mxu0 %v3409_v17  ;;  %v728_v17 = vld [vmem:[#allocation6 + $0x4e8] sm:$0xff] }
  0x88   :  { %3412 = vmatprep.subr.bf16.mxu0 %v3411_v20  ;;  %v3439_v19 = vpack.c.bf16 %v734_v18, %v728_v17  ;;  %v727_v20 = vld [vmem:[#allocation6 + $0x4e0] sm:$0xff] }
  0x89   :  { %v3441_v22 = vpack.c.bf16 %v733_v21, %v727_v20 }
  0x8b   :  { %3414 = vmatpush1.bf16.msra.mxu0 %v3413_v23  ;;  %v740_v23 = vld [vmem:[#allocation6 + $0x548] sm:$0xff] }
  0x8c   :  { %3416 = vmatprep.subr.bf16.mxu0 %v3415_v46  ;;  %v3443_v45 = vpack.c.bf16 %v746_v24, %v740_v23  ;;  %v739_v46 = vld [vmem:[#allocation6 + $0x540] sm:$0xff] }
  0x8d   :  { %v3445_v48 = vpack.c.bf16 %v745_v47, %v739_v46 }
  0x8f   :  { %3418 = vmatpush1.bf16.msra.mxu0 %v3417_v49  ;;  %v752_v49 = vld [vmem:[#allocation6 + $0x5a8] sm:$0xff] }
  0x90   :  { %3420 = vmatprep.subr.bf16.mxu0 %v3419_v52  ;;  %v3447_v51 = vpack.c.bf16 %v758_v50, %v752_v49  ;;  %v751_v52 = vld [vmem:[#allocation6 + $0x5a0] sm:$0xff]  ;;  %v4833_v50 = vld [vmem:[#allocation4 + $0x8] sm:$0xff] }
  0x91   :  { %v3449_v54 = vpack.c.bf16 %v757_v53, %v751_v52  ;;  %v122_v52 = vmul.f32 %v4728_v27, %v4728_v27  ;;  %v124_v53 = vmul.f32 %v4733_v28, %v4733_v28 }
  0x93   :  { %3422 = vmatpush1.bf16.msra.mxu0 %v3421_v55 }
  0x94   :  { %3424 = vmatprep.subr.bf16.mxu0 %v3423_v58 }
  0x97   :  { %3426 = vmatpush1.bf16.msra.mxu0 %v3425_v61 }
  0x98   :  { %3428 = vmatprep.subr.bf16.mxu0 %v3427_v0 }
  0x9b   :  { %3430 = vmatpush1.bf16.msra.mxu0 %v3429_v3 }
  0x9c   :  { %3432 = vmatprep.subr.bf16.mxu0 %v3431_v6 }
  0x9f   :  { %3434 = vmatpush1.bf16.msra.mxu0 %v3433_v9  ;;  %v125_v9 = vmul.f32 %v4750_v33, %v4750_v33 }
  0xa0   :  { %3436 = vmatprep.subr.bf16.mxu0 %v3435_v12 }
  0xa1   :  { %v3367_v23 = vpack.c.bf16 %v127_v11, %v125_v9  ;;  %v604_v9 = vld [vmem:[#allocation6 + $0x108] sm:$0xff] }
  0xa3   :  { %3438 = vmatpush1.bf16.msra.mxu0 %v3437_v16 }
  0xa4   :  { %3440 = vmatprep.subr.bf16.mxu0 %v3439_v19 }
  0xa7   :  { %3442 = vmatpush1.bf16.msra.mxu0 %v3441_v22  ;;  %v4821_v22 = vld [vmem:[#allocation4] sm:$0xff] }
  0xa8   :  { %3444 = vmatprep.subr.bf16.mxu0 %v3443_v45 }
  0xab   :  { %3446 = vmatpush1.bf16.msra.mxu0 %v3445_v48 }
  0xac   :  { %3448 = vmatprep.subr.bf16.mxu0 %v3447_v51 }
  0xaf   :  { %3450 = vmatpush1.bf16.msra.mxu0 %v3449_v54 }
  0xde   :  { %v4358_v55 = vpop.permute.xlu1 %4357 }
  0xdf   :  { %v4348_v56 = vpop.permute.xlu0 %4347  ;;  %v4360_v61 = vunpack.i.h.bf16 %v4358_v55  ;;  %v4359_v2 = vunpack.i.l.bf16 %v4358_v55 }
  0xe0   :  { %v4350_v57 = vunpack.i.h.bf16 %v4348_v56  ;;  %v4349_v58 = vunpack.i.l.bf16 %v4348_v56 }
  0xe2   :  { %v4363_v62 = vpop.permute.xlu1 %4362  ;;  %v218_v63 = vsel %vm169_vm0, %v4728_v27, %v4349_v58  ;;  %v219_v0 = vsel %vm169_vm0, %v4733_v28, %v4350_v57  ;;  %v171_v10 = vsel %vm169_vm0, %v4350_v57, %v4360_v61  ;;  %v170_v14 = vsel %vm169_vm0, %v4349_v58, %v4359_v2 }
  0xe3   :  { %v4353_v3 = vpop.permute.xlu0 %4352  ;;  %v4799_v4 = vpack.c.bf16 %v219_v0, %v218_v63  ;;  %v4365_v15 = vunpack.i.h.bf16 %v4363_v62  ;;  %v4364_v16 = vunpack.i.l.bf16 %v4363_v62  ;;  %v4823_v34 = vpack.c.bf16 %v171_v10, %v170_v14  ;;  %v603_v10 = vld [vmem:[#allocation6 + $0x100] sm:$0xff]  ;;  %v609_v14 = vld [vmem:[#allocation6 + $0x130] sm:$0xff] }
  0xe4   :  { %v4355_v5 = vunpack.i.h.bf16 %v4353_v3  ;;  %v4354_v6 = vunpack.i.l.bf16 %v4353_v3  ;;  %v126_v27 = vmul.f32 %v4762_v36, %v4762_v36  ;;  %v128_v28 = vmul.f32 %v4767_v37, %v4767_v37 }
  0xe5   :  { %3356 = vmatprep.subr.bf16.mxu1 %v4799_v4 }
  0xe6   :  { %3358 = vmatpush1.bf16.msra.mxu1 %v4797_v1  ;;  %v220_v25 = vsel %vm169_vm0, %v4762_v36, %v4354_v6  ;;  %v221_v26 = vsel %vm169_vm0, %v4767_v37, %v4355_v5  ;;  %v4373_v12 = vpop.permute.xlu1 %4372  ;;  %v173_v24 = vsel %vm169_vm0, %v4355_v5, %v4365_v15  ;;  %v172_v45 = vsel %vm169_vm0, %v4354_v6, %v4364_v16  ;;  %v574_v5 = vld [vmem:[#allocation6 + $0x18] sm:$0xff]  ;;  %v580_v6 = vld [vmem:[#allocation6 + $0x48] sm:$0xff]  ;;  %v615_v15 = vld [vmem:[#allocation6 + $0x160] sm:$0xff] }
  0xe7   :  { %v4817_v17 = vpack.c.bf16 %v221_v26, %v220_v25  ;;  %v4368_v33 = vpop.permute.xlu0 %4367  ;;  %v4375_v18 = vunpack.i.h.bf16 %v4373_v12  ;;  %v4374_v19 = vunpack.i.l.bf16 %v4373_v12  ;;  %v4835_v51 = vpack.c.bf16 %v173_v24, %v172_v45  ;;  %v610_v25 = vld [vmem:[#allocation6 + $0x138] sm:$0xff]  ;;  %v616_v26 = vld [vmem:[#allocation6 + $0x168] sm:$0xff] }
  0xe8   :  { %v4370_v20 = vunpack.i.h.bf16 %v4368_v33  ;;  %v4369_v21 = vunpack.i.l.bf16 %v4368_v33  ;;  %v3627_v31 = vpack.c.bf16 %v580_v6, %v574_v5  ;;  %v3639_v12 = vpack.c.bf16 %v616_v26, %v610_v25  ;;  %v622_v16 = vld [vmem:[#allocation6 + $0x198] sm:$0xff]  ;;  %v628_v33 = vld [vmem:[#allocation6 + $0x1c8] sm:$0xff]  ;;  %v681_v5 = vld [vmem:[#allocation6 + $0x370] sm:$0xff] }
  0xe9   :  { %3360 = vmatprep.subr.bf16.mxu1 %v4817_v17  ;;  %v207_v47 = vsel %vm169_vm0, %v4374_v19, %v4375_v18  ;;  %v223_v60 = vsel %vm169_vm0, %v124_v53, %v4374_v19  ;;  %v3641_v18 = vpack.c.bf16 %v615_v15, %v609_v14  ;;  %v3643_v19 = vpack.c.bf16 %v628_v33, %v622_v16  ;;  %v645_v53 = vld [vmem:[#allocation6 + $0x250] sm:$0xff]  ;;  %v687_v6 = vld [vmem:[#allocation6 + $0x3a0] sm:$0xff]  ;;  %v736_v14 = vld [vmem:[#allocation6 + $0x528] sm:$0xff] }
  0xea   :  { %3362 = vmatpush1.bf16.msra.mxu1 %v4804_v7  ;;  %v206_v46 = vsel %vm169_vm0, %v4369_v21, %v4370_v20  ;;  %v4383_v48 = vpop.permute.xlu1 %4382  ;;  %v222_v61 = vsel %vm169_vm0, %v122_v52, %v4369_v21  ;;  %v621_v20 = vld [vmem:[#allocation6 + $0x190] sm:$0xff]  ;;  %v627_v21 = vld [vmem:[#allocation6 + $0x1c0] sm:$0xff] }
  0xeb   :  { %3364 = vmatprep.subr.bf16.mxu1 %v3363_v8  ;;  %v4378_v49 = vpop.permute.xlu0 %4377  ;;  %v3371_v54 = vpack.c.bf16 %v207_v47, %v206_v46  ;;  %v4385_v55 = vunpack.i.h.bf16 %v4383_v48  ;;  %v4384_v56 = vunpack.i.l.bf16 %v4383_v48  ;;  %v3373_v0 = vpack.c.bf16 %v223_v60, %v222_v61  ;;  %v586_v8 = vld [vmem:[#allocation6 + $0x78] sm:$0xff]  ;;  %v633_v46 = vld [vmem:[#allocation6 + $0x1f0] sm:$0xff]  ;;  %v639_v47 = vld [vmem:[#allocation6 + $0x220] sm:$0xff] }
  0xec   :  { %v4380_v57 = vunpack.i.h.bf16 %v4378_v49  ;;  %v4379_v58 = vunpack.i.l.bf16 %v4378_v49  ;;  %v3645_v24 = vpack.c.bf16 %v627_v21, %v621_v20  ;;  %v646_v48 = vld [vmem:[#allocation6 + $0x258] sm:$0xff]  ;;  %v652_v49 = vld [vmem:[#allocation6 + $0x288] sm:$0xff]  ;;  %v717_v26 = vld [vmem:[#allocation6 + $0x490] sm:$0xff] }
  0xed   :  { %3304 = vmatmul.mubr.msk.f32.vlgmr.msra.gmra.mrb[0].mxu1 %vm229_vm1, %v4821_v22  ;;  %v209_v63 = vsel %vm169_vm0, %v4384_v56, %v4385_v55  ;;  %v225_v36 = vsel %vm169_vm0, %v128_v28, %v4384_v56  ;;  %v3651_v52 = vpack.c.bf16 %v652_v49, %v646_v48  ;;  %v658_v55 = vld [vmem:[#allocation6 + $0x2b8] sm:$0xff]  ;;  %v664_v56 = vld [vmem:[#allocation6 + $0x2e8] sm:$0xff]  ;;  %v729_v16 = vld [vmem:[#allocation6 + $0x4f0] sm:$0xff] }
  0xee   :  { %3366 = vmatpush1.bf16.msra.mxu1 %v4823_v34  ;;  %309 = vmatprep.mubr.f32.mxu1 %v4553_v13  ;;  %v208_v62 = vsel %vm169_vm0, %v4379_v58, %v4380_v57  ;;  %v224_v2 = vsel %vm169_vm0, %v126_v27, %v4379_v58  ;;  %v3655_v58 = vpack.c.bf16 %v664_v56, %v658_v55  ;;  %v663_v27 = vld [vmem:[#allocation6 + $0x2e0] sm:$0xff]  ;;  %v670_v28 = vld [vmem:[#allocation6 + $0x318] sm:$0xff]  ;;  %v676_v60 = vld [vmem:[#allocation6 + $0x348] sm:$0xff] }
  0xef   :  { %3368 = vmatprep.subr.bf16.mxu1 %v3367_v23  ;;  %v3375_v37 = vpack.c.bf16 %v209_v63, %v208_v62  ;;  %v3377_v3 = vpack.c.bf16 %v225_v36, %v224_v2  ;;  %v640_v23 = vld [vmem:[#allocation6 + $0x228] sm:$0xff]  ;;  %v3659_v62 = vpack.c.bf16 %v676_v60, %v670_v28  ;;  %v669_v63 = vld [vmem:[#allocation6 + $0x310] sm:$0xff]  ;;  %v682_v36 = vld [vmem:[#allocation6 + $0x378] sm:$0xff] }
  0xf0   :  { %v688_v2 = vld [vmem:[#allocation6 + $0x3a8] sm:$0xff]  ;;  %v770_v20 = vld [vmem:[#allocation6 + $0x638] sm:$0xff]  ;;  %v765_v28 = vld [vmem:[#allocation6 + $0x610] sm:$0xff] }
  0xf1   :  { %3305 = vmatmul.mubr.msk.f32.gmra.mrb[2].mxu1 %vm229_vm1, %v4833_v50  ;;  %v742_v21 = vld [vmem:[#allocation6 + $0x558] sm:$0xff]  ;;  %v760_v49 = vld [vmem:[#allocation6 + $0x5e8] sm:$0xff]  ;;  %v771_v60 = vld [vmem:[#allocation6 + $0x640] sm:$0xff] }
  0xf2   :  { %3370 = vmatpush1.bf16.msra.mxu1 %v4835_v51  ;;  %315 = vmatprep.mubr.f32.mxu1 %v4553_v13  ;;  %v754_v48 = vld [vmem:[#allocation6 + $0x5b8] sm:$0xff]  ;;  %v772_v56 = vld [vmem:[#allocation6 + $0x648] sm:$0xff] }
  0xf3   :  { %3372 = vmatprep.subr.bf16.mxu1 %v3371_v54  ;;  %v651_v54 = vld [vmem:[#allocation6 + $0x280] sm:$0xff]  ;;  %v766_v55 = vld [vmem:[#allocation6 + $0x618] sm:$0xff] }
  0xf4   :  { %v3653_v57 = vpack.c.bf16 %v651_v54, %v645_v53  ;;  %v753_v53 = vld [vmem:[#allocation6 + $0x5b0] sm:$0xff]  ;;  %v759_v54 = vld [vmem:[#allocation6 + $0x5e0] sm:$0xff] }
  0xf5   :  { %3306 = vmatmul.mubr.msk.f32.gmra.mrb[4].mxu1 %vm229_vm1, %v4845_v59 }
  0xf6   :  { %386 = vmatprep.mubr.f32.mxu1 %v4553_v13 }
  0xf9   :  { %3307 = vmatmul.mubr.msk.f32.vlgmr.msra.gmra.mrb[6].mxu1 %vm229_vm1, %v4821_v22 }
  0xfa   :  { %3374 = vmatpush1.bf16.msra.mxu1 %v3373_v0  ;;  %392 = vmatprep.mubr.f32.mxu1 %v4553_v13  ;;  %v675_v0 = vld [vmem:[#allocation6 + $0x340] sm:$0xff] }
  0xfb   :  { %3376 = vmatprep.subr.bf16.mxu1 %v3375_v37  ;;  %v3661_v37 = vpack.c.bf16 %v675_v0, %v669_v63  ;;  %v778_v63 = vld [vmem:[#allocation6 + $0x678] sm:$0xff]  ;;  %v784_v0 = vld [vmem:[#allocation6 + $0x6a8] sm:$0xff] }
  0xfd   :  { %3308 = vmatmul.mubr.msk.f32.gmra.mrb[8].mxu1 %vm229_vm1, %v4833_v50 }
  0xfe   :  { %398 = vmatprep.mubr.f32.mxu1 %v4553_v13  ;;  %3378 = vmatpush1.bf16.msra.mxu1 %v3377_v3  ;;  %v3663_v3 = vpack.c.bf16 %v688_v2, %v682_v36 }
  0xff   :  { %3380 = vmatprep.subr.bf16.mxu1 %v3379_v35  ;;  %v579_v35 = vld [vmem:[#allocation6 + $0x40] sm:$0xff] }
 0x100   :  { %v3629_v30 = vpack.c.bf16 %v579_v35, %v573_v32  ;;  %v700_v32 = vld [vmem:[#allocation6 + $0x408] sm:$0xff]  ;;  %v3665_v35 = vpack.c.bf16 %v687_v6, %v681_v5  ;;  %v781_v5 = vld [vmem:[#allocation6 + $0x690] sm:$0xff] }
 0x101   :  { %3309 = vmatmul.mubr.msk.f32.gmra.mrb[10].mxu1 %vm229_vm1, %v4845_v59 }
 0x102   :  { %469 = vmatprep.mubr.f32.mxu1 %v4553_v13 }
 0x105   :  { %3310 = vmatmul.mubr.msk.f32.vlgmr.msra.gmra.mrb[12].mxu1 %vm229_vm1, %v4821_v22 }
 0x106   :  { %475 = vmatprep.mubr.f32.mxu1 %v4553_v13  ;;  %3382 = vmatpush1.bf16.msra.mxu1 %v3381_v40  ;;  %v3631_v40 = vpack.c.bf16 %v592_v29, %v586_v8  ;;  %v693_v29 = vld [vmem:[#allocation6 + $0x3d0] sm:$0xff] }
 0x107   :  { %3384 = vmatprep.subr.bf16.mxu1 %v3383_v43  ;;  %v598_v43 = vld [vmem:[#allocation6 + $0xd8] sm:$0xff] }
 0x108   :  { %v3635_v39 = vpack.c.bf16 %v604_v9, %v598_v43  ;;  %v705_v9 = vld [vmem:[#allocation6 + $0x430] sm:$0xff] }
 0x109   :  { %3311 = vmatmul.mubr.msk.f32.gmra.mrb[14].mxu1 %vm229_vm1, %v4833_v50 }
 0x10a   :  { %481 = vmatprep.mubr.f32.mxu1 %v4553_v13  ;;  %3386 = vmatpush1.bf16.msra.mxu1 %v3385_v44  ;;  %v597_v44 = vld [vmem:[#allocation6 + $0xd0] sm:$0xff] }
 0x10b   :  { %3628 = vmatprep.subr.bf16.mxu1 %v3627_v31  ;;  %v3637_v11 = vpack.c.bf16 %v603_v10, %v597_v44  ;;  %v694_v31 = vld [vmem:[#allocation6 + $0x3d8] sm:$0xff]  ;;  %v724_v44 = vld [vmem:[#allocation6 + $0x4c8] sm:$0xff] }
 0x10c   :  { %v3667_v8 = vpack.c.bf16 %v700_v32, %v694_v31  ;;  %v3695_v32 = vpack.c.bf16 %v784_v0, %v778_v63  ;;  %v832_v63 = vld [vmem:[#allocation6 + $0x828] sm:$0xff] }
 0x10d   :  { %3312 = vmatmul.mubr.msk.f32.gmra.mrb[16].mxu1 %vm229_vm1, %v4845_v59 }
 0x10e   :  { %552 = vmatprep.mubr.f32.mxu1 %v4553_v13 }
 0x111   :  { %3313 = vmatmul.mubr.msk.f32.vlgmr.msra.gmra.mrb[18].mxu1 %vm229_vm1, %v4821_v22  ;;  %v634_v22 = vld [vmem:[#allocation6 + $0x1f8] sm:$0xff] }
 0x112   :  { %3630 = vmatpush1.bf16.msra.mxu1 %v3629_v30  ;;  %558 = vmatprep.mubr.f32.mxu1 %v4553_v13  ;;  %v3647_v45 = vpack.c.bf16 %v640_v23, %v634_v22  ;;  %v699_v30 = vld [vmem:[#allocation6 + $0x400] sm:$0xff]  ;;  %v748_v22 = vld [vmem:[#allocation6 + $0x588] sm:$0xff] }
 0x113   :  { %3632 = vmatprep.subr.bf16.mxu1 %v3631_v40  ;;  %v706_v40 = vld [vmem:[#allocation6 + $0x438] sm:$0xff]  ;;  %v3669_v42 = vpack.c.bf16 %v699_v30, %v693_v29  ;;  %v788_v29 = vld [vmem:[#allocation6 + $0x6c8] sm:$0xff] }
 0x114   :  { %v3671_v43 = vpack.c.bf16 %v712_v41, %v706_v40  ;;  %v794_v30 = vld [vmem:[#allocation6 + $0x6f8] sm:$0xff]  ;;  %v796_v41 = vld [vmem:[#allocation6 + $0x708] sm:$0xff] }
 0x115   :  { %3314 = vmatmul.mubr.msk.f32.gmra.mrb[20].mxu1 %vm229_vm1, %v4833_v50  ;;  %v3649_v50 = vpack.c.bf16 %v639_v47, %v633_v46  ;;  %v741_v46 = vld [vmem:[#allocation6 + $0x550] sm:$0xff]  ;;  %v747_v47 = vld [vmem:[#allocation6 + $0x580] sm:$0xff]  ;;  %v790_v40 = vld [vmem:[#allocation6 + $0x6d8] sm:$0xff] }
 0x116   :  { %3634 = vmatpush1.bf16.msra.mxu1 %v3633_v38  ;;  %564 = vmatprep.mubr.f32.mxu1 %v4553_v13  ;;  %v711_v38 = vld [vmem:[#allocation6 + $0x460] sm:$0xff] }
 0x117   :  { %3636 = vmatprep.subr.bf16.mxu1 %v3635_v39  ;;  %v718_v39 = vld [vmem:[#allocation6 + $0x498] sm:$0xff]  ;;  %v3673_v10 = vpack.c.bf16 %v711_v38, %v705_v9  ;;  %v787_v9 = vld [vmem:[#allocation6 + $0x6c0] sm:$0xff]  ;;  %v793_v38 = vld [vmem:[#allocation6 + $0x6f0] sm:$0xff] }
 0x118   :  { %v3675_v25 = vpack.c.bf16 %v724_v44, %v718_v39  ;;  %v3459_v44 = vpack.c.bf16 %v794_v30, %v788_v29  ;;  %v836_v29 = vld [vmem:[#allocation6 + $0x848] sm:$0xff] }
 0x119   :  { %3315 = vmatmul.mubr.msk.f32.gmra.mrb[22].mxu1 %vm229_vm1, %v4845_v59  ;;  %v657_v59 = vld [vmem:[#allocation6 + $0x2b0] sm:$0xff] }
 0x11a   :  { %3638 = vmatpush1.bf16.msra.mxu1 %v3637_v11  ;;  %v3657_v61 = vpack.c.bf16 %v663_v27, %v657_v59  ;;  %v723_v11 = vld [vmem:[#allocation6 + $0x4c0] sm:$0xff]  ;;  %v769_v27 = vld [vmem:[#allocation6 + $0x630] sm:$0xff] }
 0x11b   :  { %3640 = vmatprep.subr.bf16.mxu1 %v3639_v12  ;;  %v730_v12 = vld [vmem:[#allocation6 + $0x4f8] sm:$0xff]  ;;  %v3677_v15 = vpack.c.bf16 %v723_v11, %v717_v26  ;;  %v763_v59 = vld [vmem:[#allocation6 + $0x600] sm:$0xff]  ;;  %v800_v11 = vld [vmem:[#allocation6 + $0x728] sm:$0xff] }
 0x11c   :  { %v3679_v33 = vpack.c.bf16 %v736_v14, %v730_v12  ;;  %v3453_v2 = vpack.c.bf16 %v769_v27, %v763_v59  ;;  %v795_v26 = vld [vmem:[#allocation6 + $0x700] sm:$0xff]  ;;  %v806_v14 = vld [vmem:[#allocation6 + $0x758] sm:$0xff]  ;;  %v813_v59 = vld [vmem:[#allocation6 + $0x790] sm:$0xff] }
 0x11d   :  { %v819_v27 = vld [vmem:[#allocation6 + $0x7c0] sm:$0xff] }
 0x11e   :  { %3642 = vmatpush1.bf16.msra.mxu1 %v3641_v18  ;;  %v735_v18 = vld [vmem:[#allocation6 + $0x520] sm:$0xff] }
 0x11f   :  { %3644 = vmatprep.subr.bf16.mxu1 %v3643_v19  ;;  %v764_v19 = vld [vmem:[#allocation6 + $0x608] sm:$0xff] }
 0x120   :  { %v3451_v23 = vpack.c.bf16 %v770_v20, %v764_v19  ;;  %v799_v19 = vld [vmem:[#allocation6 + $0x720] sm:$0xff]  ;;  %v805_v20 = vld [vmem:[#allocation6 + $0x750] sm:$0xff] }
 0x122   :  { %3646 = vmatpush1.bf16.msra.mxu1 %v3645_v24  ;;  %v3681_v24 = vpack.c.bf16 %v735_v18, %v729_v16  ;;  %3452 = vmatprep.subr.bf16.mxu0 %v3451_v23  ;;  %v808_v16 = vld [vmem:[#allocation6 + $0x768] sm:$0xff] }
 0x123   :  { %3648 = vmatprep.subr.bf16.mxu1 %v3647_v45  ;;  %v3683_v45 = vpack.c.bf16 %v748_v22, %v742_v21  ;;  %v3463_v22 = vpack.c.bf16 %v806_v14, %v800_v11  ;;  %v837_v11 = vld [vmem:[#allocation6 + $0x850] sm:$0xff]  ;;  %v843_v14 = vld [vmem:[#allocation6 + $0x880] sm:$0xff] }
 0x126   :  { %3650 = vmatpush1.bf16.msra.mxu1 %v3649_v50  ;;  %v3685_v50 = vpack.c.bf16 %v747_v47, %v741_v46  ;;  %v812_v46 = vld [vmem:[#allocation6 + $0x788] sm:$0xff] }
 0x127   :  { %3652 = vmatprep.subr.bf16.mxu1 %v3651_v52  ;;  %v3687_v52 = vpack.c.bf16 %v760_v49, %v754_v48  ;;  %v818_v48 = vld [vmem:[#allocation6 + $0x7b8] sm:$0xff] }
 0x128   :  { %v814_v49 = vld [vmem:[#allocation6 + $0x798] sm:$0xff] }
 0x12a   :  { %3654 = vmatpush1.bf16.msra.mxu1 %v3653_v57  ;;  %v3689_v57 = vpack.c.bf16 %v759_v54, %v753_v53  ;;  %v811_v54 = vld [vmem:[#allocation6 + $0x780] sm:$0xff] }
 0x12b   :  { %3656 = vmatprep.subr.bf16.mxu1 %v3655_v58  ;;  %v3691_v58 = vpack.c.bf16 %v772_v56, %v766_v55  ;;  %v817_v55 = vld [vmem:[#allocation6 + $0x7b0] sm:$0xff] }
 0x12c   :  { %v3469_v0 = vpack.c.bf16 %v817_v55, %v811_v54  ;;  %v866_v54 = vld [vmem:[#allocation6 + $0x938] sm:$0xff] }
 0x12d   :  { %v862_v55 = vld [vmem:[#allocation6 + $0x918] sm:$0xff] }
 0x12e   :  { %3658 = vmatpush1.bf16.msra.mxu1 %v3657_v61  ;;  %v776_v61 = vld [vmem:[#allocation6 + $0x668] sm:$0xff] }
 0x12f   :  { %3660 = vmatprep.subr.bf16.mxu1 %v3659_v62  ;;  %v782_v62 = vld [vmem:[#allocation6 + $0x698] sm:$0xff] }
 0x130   :  { %v3455_v31 = vpack.c.bf16 %v782_v62, %v776_v61  ;;  %v830_v61 = vld [vmem:[#allocation6 + $0x818] sm:$0xff] }
 0x131   :  { %v826_v62 = vld [vmem:[#allocation6 + $0x7f8] sm:$0xff] }
 0x132   :  { %3662 = vmatpush1.bf16.msra.mxu1 %v3661_v37  ;;  %v3693_v37 = vpack.c.bf16 %v771_v60, %v765_v28  ;;  %v824_v28 = vld [vmem:[#allocation6 + $0x7e8] sm:$0xff] }
 0x133   :  { %3664 = vmatprep.subr.bf16.mxu1 %v3663_v3  ;;  %v775_v3 = vld [vmem:[#allocation6 + $0x660] sm:$0xff] }
 0x136   :  { %3666 = vmatpush1.bf16.msra.mxu1 %v3665_v35  ;;  %v777_v35 = vld [vmem:[#allocation6 + $0x670] sm:$0xff] }
 0x137   :  { %3668 = vmatprep.subr.bf16.mxu1 %v3667_v8  ;;  %v783_v8 = vld [vmem:[#allocation6 + $0x6a0] sm:$0xff] }
 0x13a   :  { %3670 = vmatpush1.bf16.msra.mxu1 %v3669_v42  ;;  %v3457_v42 = vpack.c.bf16 %v781_v5, %v775_v3  ;;  %v829_v3 = vld [vmem:[#allocation6 + $0x810] sm:$0xff] }
 0x13b   :  { %3672 = vmatprep.subr.bf16.mxu1 %v3671_v43  ;;  %v3697_v43 = vpack.c.bf16 %v783_v8, %v777_v35  ;;  %v825_v35 = vld [vmem:[#allocation6 + $0x7f0] sm:$0xff]  ;;  %v831_v8 = vld [vmem:[#allocation6 + $0x820] sm:$0xff] }
 0x13e   :  { %3674 = vmatpush1.bf16.msra.mxu1 %v3673_v10  ;;  %v3699_v10 = vpack.c.bf16 %v796_v41, %v790_v40  ;;  %v842_v40 = vld [vmem:[#allocation6 + $0x878] sm:$0xff] }
 0x13f   :  { %3676 = vmatprep.subr.bf16.mxu1 %v3675_v25  ;;  %v789_v25 = vld [vmem:[#allocation6 + $0x6d0] sm:$0xff]  ;;  %v838_v41 = vld [vmem:[#allocation6 + $0x858] sm:$0xff] }
 0x140   :  { %v3701_v18 = vpack.c.bf16 %v795_v26, %v789_v25  ;;  %v3475_v25 = vpack.c.bf16 %v842_v40, %v836_v29  ;;  %v877_v29 = vld [vmem:[#allocation6 + $0x990] sm:$0xff] }
 0x142   :  { %3678 = vmatpush1.bf16.msra.mxu1 %v3677_v15  ;;  %v802_v15 = vld [vmem:[#allocation6 + $0x738] sm:$0xff] }
 0x143   :  { %3680 = vmatprep.subr.bf16.mxu1 %v3679_v33  ;;  %v3461_v33 = vpack.c.bf16 %v793_v38, %v787_v9  ;;  %v3703_v23 = vpack.c.bf16 %v808_v16, %v802_v15  ;;  %v3713_v9 = vpack.c.bf16 %v831_v8, %v825_v35  ;;  %v835_v38 = vld [vmem:[#allocation6 + $0x840] sm:$0xff]  ;;  %v848_v15 = vld [vmem:[#allocation6 + $0x8a8] sm:$0xff] }
 0x144   :  { %v871_v8 = vld [vmem:[#allocation6 + $0x960] sm:$0xff] }
 0x146   :  { %3682 = vmatpush1.bf16.msra.mxu1 %v3681_v24  ;;  %v801_v24 = vld [vmem:[#allocation6 + $0x730] sm:$0xff] }
 0x147   :  { %3684 = vmatprep.subr.bf16.mxu1 %v3683_v45  ;;  %v807_v45 = vld [vmem:[#allocation6 + $0x760] sm:$0xff] }
 0x148   :  { %v3705_v53 = vpack.c.bf16 %v807_v45, %v801_v24  ;;  %v853_v24 = vld [vmem:[#allocation6 + $0x8d0] sm:$0xff] }
 0x14a   :  { %3686 = vmatpush1.bf16.msra.mxu1 %v3685_v50  ;;  %v820_v50 = vld [vmem:[#allocation6 + $0x7c8] sm:$0xff] }
 0x14b   :  { %3688 = vmatprep.subr.bf16.mxu1 %v3687_v52  ;;  %v3465_v52 = vpack.c.bf16 %v805_v20, %v799_v19  ;;  %v856_v19 = vld [vmem:[#allocation6 + $0x8e8] sm:$0xff] }
 0x14e   :  { %3690 = vmatpush1.bf16.msra.mxu1 %v3689_v57  ;;  %v3467_v57 = vpack.c.bf16 %v818_v48, %v812_v46 }
 0x14f   :  { %3692 = vmatprep.subr.bf16.mxu1 %v3691_v58  ;;  %v3707_v58 = vpack.c.bf16 %v820_v50, %v814_v49  ;;  %v849_v49 = vld [vmem:[#allocation6 + $0x8b0] sm:$0xff]  ;;  %v855_v50 = vld [vmem:[#allocation6 + $0x8e0] sm:$0xff] }
 0x1c0   :  { %v4898_v36 = vpop.f32.mrb[0].mxu1 }
 0x1c1   :  { %v4900_v6 = vpop.f32.mrb[1].mxu1 }
 0x1c2   :  { %1364 = vmatprep.mubr.f32.mxu0 %v4900_v6  ;;  %1696 = vmatprep.mubr.f32.mxu1 %v4900_v6 }
 0x1c3   :  { %1365 = vmatmul.mubr.f32.vlgmr.msra.gmra.mrb[0].mxu0 %v4898_v36  ;;  %1697 = vmatmul.mubr.f32.vlgmr.msra.gmra.mrb[24].mxu1 %v4898_v36 }
 0x1c4   :  { %3454 = vmatpush1.bf16.msra.mxu0 %v3453_v2  ;;  %3694 = vmatpush1.bf16.msra.mxu1 %v3693_v37  ;;  %v4906_v39 = vpop.f32.mrb[2].mxu1  ;;  %v3709_v2 = vpack.c.bf16 %v819_v27, %v813_v59  ;;  %v823_v37 = vld [vmem:[#allocation6 + $0x7e0] sm:$0xff]  ;;  %v3721_v59 = vpack.c.bf16 %v855_v50, %v849_v49  ;;  %v904_v49 = vld [vmem:[#allocation6 + $0xa68] sm:$0xff] }
 0x1c5   :  { %3456 = vmatprep.subr.bf16.mxu0 %v3455_v31  ;;  %3696 = vmatprep.subr.bf16.mxu1 %v3695_v32  ;;  %v4908_v12 = vpop.f32.mrb[3].mxu1  ;;  %v3471_v31 = vpack.c.bf16 %v830_v61, %v824_v28  ;;  %v3711_v32 = vpack.c.bf16 %v832_v63, %v826_v62  ;;  %v859_v27 = vld [vmem:[#allocation6 + $0x900] sm:$0xff]  ;;  %v865_v28 = vld [vmem:[#allocation6 + $0x930] sm:$0xff] }
 0x1c6   :  { %1370 = vmatprep.mubr.f32.mxu0 %v4908_v12  ;;  %1702 = vmatprep.mubr.f32.mxu1 %v4908_v12  ;;  %v861_v63 = vld [vmem:[#allocation6 + $0x910] sm:$0xff] }
 0x1c7   :  { %1371 = vmatmul.mubr.f32.gmra.mrb[2].mxu0 %v4906_v39  ;;  %1703 = vmatmul.mubr.f32.gmra.mrb[26].mxu1 %v4906_v39 }
 0x1c8   :  { %3458 = vmatpush1.bf16.msra.mxu0 %v3457_v42  ;;  %3698 = vmatpush1.bf16.msra.mxu1 %v3697_v43  ;;  %v4914_v21 = vpop.f32.mrb[4].mxu1  ;;  %v844_v42 = vld [vmem:[#allocation6 + $0x888] sm:$0xff]  ;;  %v3473_v43 = vpack.c.bf16 %v829_v3, %v823_v37  ;;  %v878_v37 = vld [vmem:[#allocation6 + $0x998] sm:$0xff] }
 0x1c9   :  { %3460 = vmatprep.subr.bf16.mxu0 %v3459_v44  ;;  %3700 = vmatprep.subr.bf16.mxu1 %v3699_v10  ;;  %v4916_v47 = vpop.f32.mrb[5].mxu1  ;;  %v841_v44 = vld [vmem:[#allocation6 + $0x870] sm:$0xff]  ;;  %v3715_v26 = vpack.c.bf16 %v844_v42, %v838_v41  ;;  %v874_v3 = vld [vmem:[#allocation6 + $0x978] sm:$0xff] }
 0x1ca   :  { %1376 = vmatprep.mubr.f32.mxu0 %v4916_v47  ;;  %1708 = vmatprep.mubr.f32.mxu1 %v4916_v47  ;;  %v3477_v20 = vpack.c.bf16 %v841_v44, %v835_v38  ;;  %v873_v42 = vld [vmem:[#allocation6 + $0x970] sm:$0xff]  ;;  %v890_v38 = vld [vmem:[#allocation6 + $0x9f8] sm:$0xff] }
 0x1cb   :  { %1377 = vmatmul.mubr.f32.gmra.mrb[4].mxu0 %v4914_v21  ;;  %1709 = vmatmul.mubr.f32.gmra.mrb[28].mxu1 %v4914_v21  ;;  %v886_v44 = vld [vmem:[#allocation6 + $0x9d8] sm:$0xff] }
 0x1cc   :  { %3462 = vmatpush1.bf16.msra.mxu0 %v3461_v33  ;;  %3702 = vmatpush1.bf16.msra.mxu1 %v3701_v18  ;;  %v4922_v56 = vpop.f32.mrb[6].mxu1  ;;  %v854_v33 = vld [vmem:[#allocation6 + $0x8d8] sm:$0xff] }
 0x1cd   :  { %3464 = vmatprep.subr.bf16.mxu0 %v3463_v22  ;;  %3704 = vmatprep.subr.bf16.mxu1 %v3703_v23  ;;  %v4924_v60 = vpop.f32.mrb[7].mxu1  ;;  %v850_v18 = vld [vmem:[#allocation6 + $0x8b8] sm:$0xff]  ;;  %v3717_v22 = vpack.c.bf16 %v843_v14, %v837_v11  ;;  %v847_v23 = vld [vmem:[#allocation6 + $0x8a0] sm:$0xff]  ;;  %v3479_v46 = vpack.c.bf16 %v854_v33, %v848_v15  ;;  %v889_v15 = vld [vmem:[#allocation6 + $0x9f0] sm:$0xff] }
 0x1ce   :  { %1447 = vmatprep.mubr.f32.mxu0 %v4924_v60  ;;  %1779 = vmatprep.mubr.f32.mxu1 %v4924_v60  ;;  %v3719_v48 = vpack.c.bf16 %v856_v19, %v850_v18  ;;  %v883_v14 = vld [vmem:[#allocation6 + $0x9c0] sm:$0xff] }
 0x1cf   :  { %v3493_v50 = vpack.c.bf16 %v889_v15, %v883_v14 }
 0x1d0   :  { %3466 = vmatpush1.bf16.msra.mxu0 %v3465_v52  ;;  %3706 = vmatpush1.bf16.msra.mxu1 %v3705_v53  ;;  %v4928_v5 = vpop.f32.mrb[8].mxu1  ;;  %v860_v52 = vld [vmem:[#allocation6 + $0x908] sm:$0xff] }
 0x1d1   :  { %3468 = vmatprep.subr.bf16.mxu0 %v3467_v57  ;;  %3708 = vmatprep.subr.bf16.mxu1 %v3707_v58  ;;  %v4930_v30 = vpop.f32.mrb[9].mxu1  ;;  %v868_v57 = vld [vmem:[#allocation6 + $0x948] sm:$0xff]  ;;  %v3481_v58 = vpack.c.bf16 %v853_v24, %v847_v23  ;;  %v3483_v61 = vpack.c.bf16 %v866_v54, %v860_v52  ;;  %v895_v54 = vld [vmem:[#allocation6 + $0xa20] sm:$0xff] }
 0x1d2   :  { %v3723_v62 = vpack.c.bf16 %v868_v57, %v862_v55  ;;  %v896_v23 = vld [vmem:[#allocation6 + $0xa28] sm:$0xff]  ;;  %v901_v55 = vld [vmem:[#allocation6 + $0xa50] sm:$0xff] }
 0x1d4   :  { %3470 = vmatpush1.bf16.msra.mxu0 %v3469_v0  ;;  %3710 = vmatpush1.bf16.msra.mxu1 %v3709_v2  ;;  %v4932_v10 = vpop.f32.mrb[10].mxu1  ;;  %v867_v0 = vld [vmem:[#allocation6 + $0x940] sm:$0xff]  ;;  %v872_v2 = vld [vmem:[#allocation6 + $0x968] sm:$0xff] }
 0x1d5   :  { %3472 = vmatprep.subr.bf16.mxu0 %v3471_v31  ;;  %3712 = vmatprep.subr.bf16.mxu1 %v3711_v32  ;;  %v4934_v16 = vpop.f32.mrb[11].mxu1  ;;  %v880_v31 = vld [vmem:[#allocation6 + $0x9a8] sm:$0xff]  ;;  %v3485_v32 = vpack.c.bf16 %v865_v28, %v859_v27  ;;  %v3725_v35 = vpack.c.bf16 %v867_v0, %v861_v63  ;;  %v3487_v40 = vpack.c.bf16 %v878_v37, %v872_v2  ;;  %v897_v27 = vld [vmem:[#allocation6 + $0xa30] sm:$0xff]  ;;  %v903_v28 = vld [vmem:[#allocation6 + $0xa60] sm:$0xff] }
 0x1d6   :  { %v3727_v41 = vpack.c.bf16 %v880_v31, %v874_v3  ;;  %v914_v63 = vld [vmem:[#allocation6 + $0xab8] sm:$0xff]  ;;  %v916_v2 = vld [vmem:[#allocation6 + $0xac8] sm:$0xff]  ;;  %v3497_v37 = vpack.c.bf16 %v901_v55, %v895_v54  ;;  %v3737_v3 = vpack.c.bf16 %v903_v28, %v897_v27  ;;  %v907_v31 = vld [vmem:[#allocation6 + $0xa80] sm:$0xff] }
 0x1d7   :  { %v910_v0 = vld [vmem:[#allocation6 + $0xa98] sm:$0xff]  ;;  %v931_v54 = vld [vmem:[#allocation6 + $0xb40] sm:$0xff]  ;;  %v937_v55 = vld [vmem:[#allocation6 + $0xb70] sm:$0xff] }
 0x1d8   :  { %3474 = vmatpush1.bf16.msra.mxu0 %v3473_v43  ;;  %3714 = vmatpush1.bf16.msra.mxu1 %v3713_v9  ;;  %v4936_v45 = vpop.f32.mrb[12].mxu1  ;;  %v879_v43 = vld [vmem:[#allocation6 + $0x9a0] sm:$0xff]  ;;  %v884_v9 = vld [vmem:[#allocation6 + $0x9c8] sm:$0xff]  ;;  %v933_v28 = vld [vmem:[#allocation6 + $0xb50] sm:$0xff] }
 0x1d9   :  { %3476 = vmatprep.subr.bf16.mxu0 %v3475_v25  ;;  %3716 = vmatprep.subr.bf16.mxu1 %v3715_v26  ;;  %v4938_v53 = vpop.f32.mrb[13].mxu1  ;;  %v892_v25 = vld [vmem:[#allocation6 + $0xa08] sm:$0xff]  ;;  %v3489_v26 = vpack.c.bf16 %v877_v29, %v871_v8  ;;  %v3729_v11 = vpack.c.bf16 %v879_v43, %v873_v42  ;;  %v3491_v18 = vpack.c.bf16 %v890_v38, %v884_v9  ;;  %v909_v29 = vld [vmem:[#allocation6 + $0xa90] sm:$0xff]  ;;  %v926_v43 = vld [vmem:[#allocation6 + $0xb18] sm:$0xff] }
 0x1da   :  { %v3731_v19 = vpack.c.bf16 %v892_v25, %v886_v44  ;;  %v3739_v8 = vpack.c.bf16 %v916_v2, %v910_v0  ;;  %v922_v9 = vld [vmem:[#allocation6 + $0xaf8] sm:$0xff]  ;;  %v928_v38 = vld [vmem:[#allocation6 + $0xb28] sm:$0xff] }
 0x1db   :  { %v950_v0 = vld [vmem:[#allocation6 + $0xbd8] sm:$0xff] }
 0x1dc   :  { %3478 = vmatpush1.bf16.msra.mxu0 %v3477_v20  ;;  %3718 = vmatpush1.bf16.msra.mxu1 %v3717_v22  ;;  %v4940_v33 = vpop.f32.mrb[14].mxu1  ;;  %v885_v20 = vld [vmem:[#allocation6 + $0x9d0] sm:$0xff]  ;;  %v891_v22 = vld [vmem:[#allocation6 + $0xa00] sm:$0xff]  ;;  %v946_v2 = vld [vmem:[#allocation6 + $0xbb8] sm:$0xff] }
 0x1dd   :  { %3480 = vmatprep.subr.bf16.mxu0 %v3479_v46  ;;  %3720 = vmatprep.subr.bf16.mxu1 %v3719_v48  ;;  %v4942_v24 = vpop.f32.mrb[15].mxu1  ;;  %v902_v46 = vld [vmem:[#allocation6 + $0xa58] sm:$0xff]  ;;  %v3733_v52 = vpack.c.bf16 %v891_v22, %v885_v20  ;;  %v927_v20 = vld [vmem:[#allocation6 + $0xb20] sm:$0xff]  ;;  %v932_v22 = vld [vmem:[#allocation6 + $0xb48] sm:$0xff] }
 0x1de   :  { %v898_v48 = vld [vmem:[#allocation6 + $0xa38] sm:$0xff] }
 0x1e0   :  { %3482 = vmatpush1.bf16.msra.mxu0 %v3481_v58  ;;  %3722 = vmatpush1.bf16.msra.mxu1 %v3721_v59  ;;  %v4944_v57 = vpop.f32.mrb[16].mxu1  ;;  %v3495_v58 = vpack.c.bf16 %v902_v46, %v896_v23  ;;  %v3735_v59 = vpack.c.bf16 %v904_v49, %v898_v48  ;;  %v938_v23 = vld [vmem:[#allocation6 + $0xb78] sm:$0xff]  ;;  %v940_v48 = vld [vmem:[#allocation6 + $0xb88] sm:$0xff] }
 0x1e1   :  { %3484 = vmatprep.subr.bf16.mxu0 %v3483_v61  ;;  %3724 = vmatprep.subr.bf16.mxu1 %v3723_v62  ;;  %v908_v61 = vld [vmem:[#allocation6 + $0xa88] sm:$0xff]  ;;  %v4946_v62 = vpop.f32.mrb[17].mxu1  ;;  %v934_v46 = vld [vmem:[#allocation6 + $0xb58] sm:$0xff] }
 0x1e2   :  { %v3747_v27 = vpack.c.bf16 %v940_v48, %v934_v46  ;;  %v963_v46 = vld [vmem:[#allocation6 + $0xc40] sm:$0xff]  ;;  %v968_v48 = vld [vmem:[#allocation6 + $0xc68] sm:$0xff] }
 0x1e4   :  { %3486 = vmatpush1.bf16.msra.mxu0 %v3485_v32  ;;  %3726 = vmatpush1.bf16.msra.mxu1 %v3725_v35  ;;  %v913_v32 = vld [vmem:[#allocation6 + $0xab0] sm:$0xff]  ;;  %v3499_v35 = vpack.c.bf16 %v914_v63, %v908_v61  ;;  %v4948_v42 = vpop.f32.mrb[18].mxu1  ;;  %v939_v61 = vld [vmem:[#allocation6 + $0xb80] sm:$0xff]  ;;  %v944_v63 = vld [vmem:[#allocation6 + $0xba8] sm:$0xff] }
 0x1e5   :  { %3488 = vmatprep.subr.bf16.mxu0 %v3487_v40  ;;  %3728 = vmatprep.subr.bf16.mxu1 %v3727_v41  ;;  %v915_v40 = vld [vmem:[#allocation6 + $0xac0] sm:$0xff]  ;;  %v920_v41 = vld [vmem:[#allocation6 + $0xae8] sm:$0xff]  ;;  %v3501_v44 = vpack.c.bf16 %v913_v32, %v907_v31  ;;  %v4950_v14 = vpop.f32.mrb[19].mxu1  ;;  %v3509_v31 = vpack.c.bf16 %v937_v55, %v931_v54  ;;  %v3749_v32 = vpack.c.bf16 %v939_v61, %v933_v28  ;;  %v973_v28 = vld [vmem:[#allocation6 + $0xc90] sm:$0xff] }
 0x1e6   :  { %v3741_v25 = vpack.c.bf16 %v915_v40, %v909_v29  ;;  %v3503_v15 = vpack.c.bf16 %v926_v43, %v920_v41  ;;  %v3511_v40 = vpack.c.bf16 %v950_v0, %v944_v63  ;;  %v945_v43 = vld [vmem:[#allocation6 + $0xbb0] sm:$0xff]  ;;  %v976_v54 = vld [vmem:[#allocation6 + $0xca8] sm:$0xff] }
 0x1e7   :  { %v969_v0 = vld [vmem:[#allocation6 + $0xc70] sm:$0xff] }
 0x1e8   :  { %3490 = vmatpush1.bf16.msra.mxu0 %v3489_v26  ;;  %3730 = vmatpush1.bf16.msra.mxu1 %v3729_v11  ;;  %v919_v26 = vld [vmem:[#allocation6 + $0xae0] sm:$0xff]  ;;  %v925_v11 = vld [vmem:[#allocation6 + $0xb10] sm:$0xff]  ;;  %v4952_v49 = vpop.f32.mrb[20].mxu1 }
 0x1e9   :  { %3492 = vmatprep.subr.bf16.mxu0 %v3491_v18  ;;  %3732 = vmatprep.subr.bf16.mxu1 %v3731_v19  ;;  %v3743_v18 = vpack.c.bf16 %v928_v38, %v922_v9  ;;  %v921_v19 = vld [vmem:[#allocation6 + $0xaf0] sm:$0xff]  ;;  %v951_v9 = vld [vmem:[#allocation6 + $0xbe0] sm:$0xff]  ;;  %v956_v38 = vld [vmem:[#allocation6 + $0xc08] sm:$0xff] }
 0x1ec   :  { %3494 = vmatpush1.bf16.msra.mxu0 %v3493_v50  ;;  %3734 = vmatpush1.bf16.msra.mxu1 %v3733_v52  ;;  %v3505_v50 = vpack.c.bf16 %v925_v11, %v919_v26  ;;  %v3745_v52 = vpack.c.bf16 %v927_v20, %v921_v19  ;;  %v964_v26 = vld [vmem:[#allocation6 + $0xc48] sm:$0xff]  ;;  %v961_v19 = vld [vmem:[#allocation6 + $0xc30] sm:$0xff] }
 0x1ed   :  { %3496 = vmatprep.subr.bf16.mxu0 %v3495_v58  ;;  %3736 = vmatprep.subr.bf16.mxu1 %v3735_v59  ;;  %v4954_v58 = vpop.f32.mrb[21].mxu1  ;;  %v3507_v59 = vpack.c.bf16 %v938_v23, %v932_v22  ;;  %v957_v23 = vld [vmem:[#allocation6 + $0xc10] sm:$0xff] }
 0x1f0   :  { %3498 = vmatpush1.bf16.msra.mxu0 %v3497_v37  ;;  %3738 = vmatpush1.bf16.msra.mxu1 %v3737_v3  ;;  %v952_v37 = vld [vmem:[#allocation6 + $0xbe8] sm:$0xff]  ;;  %v4956_v3 = vpop.f32.mrb[22].mxu1 }
 0x1f1   :  { %3500 = vmatprep.subr.bf16.mxu0 %v3499_v35  ;;  %3740 = vmatprep.subr.bf16.mxu1 %v3739_v8  ;;  %v943_v35 = vld [vmem:[#allocation6 + $0xba0] sm:$0xff]  ;;  %v949_v8 = vld [vmem:[#allocation6 + $0xbd0] sm:$0xff]  ;;  %v4958_v29 = vpop.f32.mrb[23].mxu1  ;;  %v3751_v41 = vpack.c.bf16 %v952_v37, %v946_v2  ;;  %v980_v37 = vld [vmem:[#allocation6 + $0xcc8] sm:$0xff] }
 0x1f2   :  { %v3513_v11 = vpack.c.bf16 %v949_v8, %v943_v35  ;;  %v975_v2 = vld [vmem:[#allocation6 + $0xca0] sm:$0xff]  ;;  %v988_v35 = vld [vmem:[#allocation6 + $0xd08] sm:$0xff] }
 0x1f4   :  { %3502 = vmatpush1.bf16.msra.mxu0 %v3501_v44  ;;  %3742 = vmatpush1.bf16.msra.mxu1 %v3741_v25  ;;  %v962_v44 = vld [vmem:[#allocation6 + $0xc38] sm:$0xff] }
 0x1f5   :  { %3504 = vmatprep.subr.bf16.mxu0 %v3503_v15  ;;  %3744 = vmatprep.subr.bf16.mxu1 %v3743_v18  ;;  %v958_v25 = vld [vmem:[#allocation6 + $0xc18] sm:$0xff]  ;;  %v3753_v15 = vpack.c.bf16 %v951_v9, %v945_v43  ;;  %v955_v18 = vld [vmem:[#allocation6 + $0xc00] sm:$0xff]  ;;  %v3515_v20 = vpack.c.bf16 %v962_v44, %v956_v38  ;;  %v985_v43 = vld [vmem:[#allocation6 + $0xcf0] sm:$0xff] }
 0x1f6   :  { %v3755_v22 = vpack.c.bf16 %v964_v26, %v958_v25  ;;  %v3517_v55 = vpack.c.bf16 %v961_v19, %v955_v18  ;;  %v981_v44 = vld [vmem:[#allocation6 + $0xcd0] sm:$0xff]  ;;  %v987_v25 = vld [vmem:[#allocation6 + $0xd00] sm:$0xff]  ;;  %v992_v26 = vld [vmem:[#allocation6 + $0xd28] sm:$0xff] }
 0x1f7   :  { %v1000_v18 = vld [vmem:[#allocation6 + $0xd68] sm:$0xff] }
 0x1f8   :  { %3506 = vmatpush1.bf16.msra.mxu0 %v3505_v50  ;;  %3746 = vmatpush1.bf16.msra.mxu1 %v3745_v52  ;;  %v974_v50 = vld [vmem:[#allocation6 + $0xc98] sm:$0xff] }
 0x1f9   :  { %3508 = vmatprep.subr.bf16.mxu0 %v3507_v59  ;;  %3748 = vmatprep.subr.bf16.mxu1 %v3747_v27  ;;  %v970_v52 = vld [vmem:[#allocation6 + $0xc78] sm:$0xff]  ;;  %v3757_v59 = vpack.c.bf16 %v963_v46, %v957_v23  ;;  %v967_v27 = vld [vmem:[#allocation6 + $0xc60] sm:$0xff]  ;;  %v3519_v61 = vpack.c.bf16 %v974_v50, %v968_v48  ;;  %v997_v23 = vld [vmem:[#allocation6 + $0xd50] sm:$0xff] }
 0x1fa   :  { %v3759_v63 = vpack.c.bf16 %v976_v54, %v970_v52  ;;  %v3521_v8 = vpack.c.bf16 %v973_v28, %v967_v27  ;;  %v993_v50 = vld [vmem:[#allocation6 + $0xd30] sm:$0xff]  ;;  %v999_v52 = vld [vmem:[#allocation6 + $0xd60] sm:$0xff]  ;;  %v1004_v54 = vld [vmem:[#allocation6 + $0xd88] sm:$0xff] }
 0x1fb   :  { %v1012_v27 = vld [vmem:[#allocation6 + $0xdc8] sm:$0xff] }
 0x1fc   :  { %3510 = vmatpush1.bf16.msra.mxu0 %v3509_v31  ;;  %3750 = vmatpush1.bf16.msra.mxu1 %v3749_v32  ;;  %v986_v31 = vld [vmem:[#allocation6 + $0xcf8] sm:$0xff] }
 0x1fd   :  { %3512 = vmatprep.subr.bf16.mxu0 %v3511_v40  ;;  %3752 = vmatprep.subr.bf16.mxu1 %v3751_v41  ;;  %v982_v32 = vld [vmem:[#allocation6 + $0xcd8] sm:$0xff]  ;;  %v3761_v40 = vpack.c.bf16 %v975_v2, %v969_v0  ;;  %v979_v41 = vld [vmem:[#allocation6 + $0xcc0] sm:$0xff]  ;;  %v3523_v9 = vpack.c.bf16 %v986_v31, %v980_v37  ;;  %v1009_v0 = vld [vmem:[#allocation6 + $0xdb0] sm:$0xff] }
 0x1fe   :  { %v3763_v38 = vpack.c.bf16 %v988_v35, %v982_v32  ;;  %v3525_v19 = vpack.c.bf16 %v985_v43, %v979_v41  ;;  %v1005_v31 = vld [vmem:[#allocation6 + $0xd90] sm:$0xff]  ;;  %v1011_v32 = vld [vmem:[#allocation6 + $0xdc0] sm:$0xff]  ;;  %v1016_v35 = vld [vmem:[#allocation6 + $0xde8] sm:$0xff] }
 0x1ff   :  { %v1024_v41 = vld [vmem:[#allocation6 + $0xe28] sm:$0xff] }
 0x200   :  { %3514 = vmatpush1.bf16.msra.mxu0 %v3513_v11  ;;  %3754 = vmatpush1.bf16.msra.mxu1 %v3753_v15  ;;  %v998_v11 = vld [vmem:[#allocation6 + $0xd58] sm:$0xff] }
 0x201   :  { %3516 = vmatprep.subr.bf16.mxu0 %v3515_v20  ;;  %3756 = vmatprep.subr.bf16.mxu1 %v3755_v22  ;;  %v994_v15 = vld [vmem:[#allocation6 + $0xd38] sm:$0xff]  ;;  %v3765_v20 = vpack.c.bf16 %v987_v25, %v981_v44  ;;  %v991_v22 = vld [vmem:[#allocation6 + $0xd20] sm:$0xff]  ;;  %v3527_v46 = vpack.c.bf16 %v998_v11, %v992_v26  ;;  %v1021_v44 = vld [vmem:[#allocation6 + $0xe10] sm:$0xff] }
 0x202   :  { %v3767_v48 = vpack.c.bf16 %v1000_v18, %v994_v15  ;;  %v3529_v28 = vpack.c.bf16 %v997_v23, %v991_v22  ;;  %v1017_v11 = vld [vmem:[#allocation6 + $0xdf0] sm:$0xff]  ;;  %v1023_v15 = vld [vmem:[#allocation6 + $0xe20] sm:$0xff]  ;;  %v1028_v18 = vld [vmem:[#allocation6 + $0xe48] sm:$0xff] }
 0x203   :  { %1448 = vmatmul.mubr.f32.vlgmr.msra.gmra.mrb[0].mxu0 %v4922_v56  ;;  %1780 = vmatmul.mubr.f32.vlgmr.msra.gmra.mrb[24].mxu1 %v4922_v56  ;;  %v1036_v22 = vld [vmem:[#allocation6 + $0xe88] sm:$0xff] }
 0x204   :  { %3518 = vmatpush1.bf16.msra.mxu0 %v3517_v55  ;;  %3758 = vmatpush1.bf16.msra.mxu1 %v3757_v59  ;;  %v1010_v55 = vld [vmem:[#allocation6 + $0xdb8] sm:$0xff] }
 0x205   :  { %3520 = vmatprep.subr.bf16.mxu0 %v3519_v61  ;;  %3760 = vmatprep.subr.bf16.mxu1 %v3759_v63  ;;  %v1006_v59 = vld [vmem:[#allocation6 + $0xd98] sm:$0xff]  ;;  %v3769_v61 = vpack.c.bf16 %v999_v52, %v993_v50  ;;  %v1003_v63 = vld [vmem:[#allocation6 + $0xd80] sm:$0xff]  ;;  %v3531_v2 = vpack.c.bf16 %v1010_v55, %v1004_v54  ;;  %v1033_v50 = vld [vmem:[#allocation6 + $0xe70] sm:$0xff] }
 0x206   :  { %1453 = vmatprep.mubr.f32.mxu0 %v4930_v30  ;;  %1785 = vmatprep.mubr.f32.mxu1 %v4930_v30  ;;  %v3771_v37 = vpack.c.bf16 %v1012_v27, %v1006_v59  ;;  %v3533_v43 = vpack.c.bf16 %v1009_v0, %v1003_v63  ;;  %v1029_v55 = vld [vmem:[#allocation6 + $0xe50] sm:$0xff]  ;;  %v1035_v59 = vld [vmem:[#allocation6 + $0xe80] sm:$0xff]  ;;  %v1040_v27 = vld [vmem:[#allocation6 + $0xea8] sm:$0xff] }
 0x207   :  { %1454 = vmatmul.mubr.f32.gmra.mrb[2].mxu0 %v4928_v5  ;;  %1786 = vmatmul.mubr.f32.gmra.mrb[26].mxu1 %v4928_v5  ;;  %v1048_v63 = vld [vmem:[#allocation6 + $0xee8] sm:$0xff] }
 0x208   :  { %3522 = vmatpush1.bf16.msra.mxu0 %v3521_v8  ;;  %3762 = vmatpush1.bf16.msra.mxu1 %v3761_v40  ;;  %v1022_v8 = vld [vmem:[#allocation6 + $0xe18] sm:$0xff] }
 0x209   :  { %3524 = vmatprep.subr.bf16.mxu0 %v3523_v9  ;;  %3764 = vmatprep.subr.bf16.mxu1 %v3763_v38  ;;  %v1018_v40 = vld [vmem:[#allocation6 + $0xdf8] sm:$0xff]  ;;  %v3773_v9 = vpack.c.bf16 %v1011_v32, %v1005_v31  ;;  %v1015_v38 = vld [vmem:[#allocation6 + $0xde0] sm:$0xff]  ;;  %v3535_v25 = vpack.c.bf16 %v1022_v8, %v1016_v35  ;;  %v1045_v31 = vld [vmem:[#allocation6 + $0xed0] sm:$0xff] }
 0x20a   :  { %1459 = vmatprep.mubr.f32.mxu0 %v4934_v16  ;;  %1791 = vmatprep.mubr.f32.mxu1 %v4934_v16  ;;  %v3775_v26 = vpack.c.bf16 %v1024_v41, %v1018_v40  ;;  %v3537_v23 = vpack.c.bf16 %v1021_v44, %v1015_v38  ;;  %v1041_v8 = vld [vmem:[#allocation6 + $0xeb0] sm:$0xff]  ;;  %v1047_v40 = vld [vmem:[#allocation6 + $0xee0] sm:$0xff]  ;;  %v1052_v41 = vld [vmem:[#allocation6 + $0xf08] sm:$0xff] }
 0x20b   :  { %1460 = vmatmul.mubr.f32.gmra.mrb[4].mxu0 %v4932_v10  ;;  %1792 = vmatmul.mubr.f32.gmra.mrb[28].mxu1 %v4932_v10  ;;  %v1060_v38 = vld [vmem:[#allocation6 + $0xf48] sm:$0xff] }
 0x20c   :  { %3526 = vmatpush1.bf16.msra.mxu0 %v3525_v19  ;;  %3766 = vmatpush1.bf16.msra.mxu1 %v3765_v20  ;;  %v1034_v19 = vld [vmem:[#allocation6 + $0xe78] sm:$0xff] }
 0x20d   :  { %3528 = vmatprep.subr.bf16.mxu0 %v3527_v46  ;;  %3768 = vmatprep.subr.bf16.mxu1 %v3767_v48  ;;  %v1030_v20 = vld [vmem:[#allocation6 + $0xe58] sm:$0xff]  ;;  %v3777_v46 = vpack.c.bf16 %v1023_v15, %v1017_v11  ;;  %v1027_v48 = vld [vmem:[#allocation6 + $0xe40] sm:$0xff]  ;;  %v3539_v52 = vpack.c.bf16 %v1034_v19, %v1028_v18  ;;  %v1057_v11 = vld [vmem:[#allocation6 + $0xf30] sm:$0xff] }
 0x20e   :  { %1530 = vmatprep.mubr.f32.mxu0 %v4938_v53  ;;  %1862 = vmatprep.mubr.f32.mxu1 %v4938_v53  ;;  %v3779_v54 = vpack.c.bf16 %v1036_v22, %v1030_v20  ;;  %v3541_v0 = vpack.c.bf16 %v1033_v50, %v1027_v48  ;;  %v1053_v19 = vld [vmem:[#allocation6 + $0xf10] sm:$0xff]  ;;  %v1059_v20 = vld [vmem:[#allocation6 + $0xf40] sm:$0xff]  ;;  %v1064_v22 = vld [vmem:[#allocation6 + $0xf68] sm:$0xff] }
 0x20f   :  { %v1072_v48 = vld [vmem:[#allocation6 + $0xfa8] sm:$0xff] }
 0x210   :  { %3530 = vmatpush1.bf16.msra.mxu0 %v3529_v28  ;;  %3770 = vmatpush1.bf16.msra.mxu1 %v3769_v61  ;;  %v1046_v28 = vld [vmem:[#allocation6 + $0xed8] sm:$0xff] }
 0x211   :  { %3532 = vmatprep.subr.bf16.mxu0 %v3531_v2  ;;  %3772 = vmatprep.subr.bf16.mxu1 %v3771_v37  ;;  %v1042_v61 = vld [vmem:[#allocation6 + $0xeb8] sm:$0xff]  ;;  %v3781_v2 = vpack.c.bf16 %v1035_v59, %v1029_v55  ;;  %v1039_v37 = vld [vmem:[#allocation6 + $0xea0] sm:$0xff]  ;;  %v3543_v32 = vpack.c.bf16 %v1046_v28, %v1040_v27  ;;  %v1069_v55 = vld [vmem:[#allocation6 + $0xf90] sm:$0xff] }
 0x212   :  { %v3783_v35 = vpack.c.bf16 %v1048_v63, %v1042_v61  ;;  %v3545_v44 = vpack.c.bf16 %v1045_v31, %v1039_v37  ;;  %v1065_v28 = vld [vmem:[#allocation6 + $0xf70] sm:$0xff]  ;;  %v1071_v61 = vld [vmem:[#allocation6 + $0xfa0] sm:$0xff]  ;;  %v1076_v63 = vld [vmem:[#allocation6 + $0xfc8] sm:$0xff] }
 0x213   :  { %v1084_v37 = vld [vmem:[#allocation6 + $0x1008] sm:$0xff] }
 0x214   :  { %3534 = vmatpush1.bf16.msra.mxu0 %v3533_v43  ;;  %3774 = vmatpush1.bf16.msra.mxu1 %v3773_v9  ;;  %v1058_v43 = vld [vmem:[#allocation6 + $0xf38] sm:$0xff] }
 0x215   :  { %3536 = vmatprep.subr.bf16.mxu0 %v3535_v25  ;;  %3776 = vmatprep.subr.bf16.mxu1 %v3775_v26  ;;  %v1054_v9 = vld [vmem:[#allocation6 + $0xf18] sm:$0xff]  ;;  %v3785_v25 = vpack.c.bf16 %v1047_v40, %v1041_v8  ;;  %v1051_v26 = vld [vmem:[#allocation6 + $0xf00] sm:$0xff]  ;;  %v3547_v15 = vpack.c.bf16 %v1058_v43, %v1052_v41  ;;  %v1081_v8 = vld [vmem:[#allocation6 + $0xff0] sm:$0xff] }
 0x216   :  { %v3787_v18 = vpack.c.bf16 %v1060_v38, %v1054_v9  ;;  %v3549_v50 = vpack.c.bf16 %v1057_v11, %v1051_v26  ;;  %v1077_v43 = vld [vmem:[#allocation6 + $0xfd0] sm:$0xff]  ;;  %v1083_v9 = vld [vmem:[#allocation6 + $0x1000] sm:$0xff]  ;;  %v1088_v38 = vld [vmem:[#allocation6 + $0x1028] sm:$0xff] }
 0x217   :  { %v1096_v26 = vld [vmem:[#allocation6 + $0x1068] sm:$0xff] }
 0x218   :  { %3538 = vmatpush1.bf16.msra.mxu0 %v3537_v23  ;;  %3778 = vmatpush1.bf16.msra.mxu1 %v3777_v46  ;;  %v1070_v23 = vld [vmem:[#allocation6 + $0xf98] sm:$0xff] }
 0x219   :  { %3540 = vmatprep.subr.bf16.mxu0 %v3539_v52  ;;  %3780 = vmatprep.subr.bf16.mxu1 %v3779_v54  ;;  %v1066_v46 = vld [vmem:[#allocation6 + $0xf78] sm:$0xff]  ;;  %v3789_v52 = vpack.c.bf16 %v1059_v20, %v1053_v19  ;;  %v1063_v54 = vld [vmem:[#allocation6 + $0xf60] sm:$0xff]  ;;  %v3551_v59 = vpack.c.bf16 %v1070_v23, %v1064_v22  ;;  %v1093_v19 = vld [vmem:[#allocation6 + $0x1050] sm:$0xff] }
 0x21a   :  { %v3791_v27 = vpack.c.bf16 %v1072_v48, %v1066_v46  ;;  %v3553_v31 = vpack.c.bf16 %v1069_v55, %v1063_v54  ;;  %v1089_v23 = vld [vmem:[#allocation6 + $0x1030] sm:$0xff]  ;;  %v1095_v46 = vld [vmem:[#allocation6 + $0x1060] sm:$0xff]  ;;  %v1100_v48 = vld [vmem:[#allocation6 + $0x1088] sm:$0xff] }
 0x21b   :  { %v1108_v54 = vld [vmem:[#allocation6 + $0x10c8] sm:$0xff] }
 0x21c   :  { %3542 = vmatpush1.bf16.msra.mxu0 %v3541_v0  ;;  %3782 = vmatpush1.bf16.msra.mxu1 %v3781_v2  ;;  %v1082_v0 = vld [vmem:[#allocation6 + $0xff8] sm:$0xff] }
 0x21d   :  { %3544 = vmatprep.subr.bf16.mxu0 %v3543_v32  ;;  %3784 = vmatprep.subr.bf16.mxu1 %v3783_v35  ;;  %v1078_v2 = vld [vmem:[#allocation6 + $0xfd8] sm:$0xff]  ;;  %v3793_v32 = vpack.c.bf16 %v1071_v61, %v1065_v28  ;;  %v1075_v35 = vld [vmem:[#allocation6 + $0xfc0] sm:$0xff]  ;;  %v3555_v40 = vpack.c.bf16 %v1082_v0, %v1076_v63  ;;  %v1105_v28 = vld [vmem:[#allocation6 + $0x10b0] sm:$0xff] }
 0x21e   :  { %v3795_v41 = vpack.c.bf16 %v1084_v37, %v1078_v2  ;;  %v3557_v11 = vpack.c.bf16 %v1081_v8, %v1075_v35  ;;  %v1101_v0 = vld [vmem:[#allocation6 + $0x1090] sm:$0xff]  ;;  %v1107_v2 = vld [vmem:[#allocation6 + $0x10c0] sm:$0xff]  ;;  %v1112_v37 = vld [vmem:[#allocation6 + $0x10e8] sm:$0xff] }
 0x21f   :  { %v1120_v35 = vld [vmem:[#allocation6 + $0x1128] sm:$0xff] }
 0x220   :  { %3546 = vmatpush1.bf16.msra.mxu0 %v3545_v44  ;;  %3786 = vmatpush1.bf16.msra.mxu1 %v3785_v25  ;;  %v1094_v44 = vld [vmem:[#allocation6 + $0x1058] sm:$0xff] }
 0x221   :  { %3548 = vmatprep.subr.bf16.mxu0 %v3547_v15  ;;  %3788 = vmatprep.subr.bf16.mxu1 %v3787_v18  ;;  %v1090_v25 = vld [vmem:[#allocation6 + $0x1038] sm:$0xff]  ;;  %v3797_v15 = vpack.c.bf16 %v1083_v9, %v1077_v43  ;;  %v1087_v18 = vld [vmem:[#allocation6 + $0x1020] sm:$0xff]  ;;  %v3559_v20 = vpack.c.bf16 %v1094_v44, %v1088_v38  ;;  %v1117_v43 = vld [vmem:[#allocation6 + $0x1110] sm:$0xff] }
 0x222   :  { %v3799_v22 = vpack.c.bf16 %v1096_v26, %v1090_v25  ;;  %v3561_v55 = vpack.c.bf16 %v1093_v19, %v1087_v18  ;;  %v1113_v44 = vld [vmem:[#allocation6 + $0x10f0] sm:$0xff]  ;;  %v1119_v25 = vld [vmem:[#allocation6 + $0x1120] sm:$0xff]  ;;  %v1124_v26 = vld [vmem:[#allocation6 + $0x1148] sm:$0xff] }
 0x223   :  { %v1132_v18 = vld [vmem:[#allocation6 + $0x1188] sm:$0xff] }
 0x224   :  { %3550 = vmatpush1.bf16.msra.mxu0 %v3549_v50  ;;  %3790 = vmatpush1.bf16.msra.mxu1 %v3789_v52  ;;  %v1106_v50 = vld [vmem:[#allocation6 + $0x10b8] sm:$0xff] }
 0x225   :  { %3552 = vmatprep.subr.bf16.mxu0 %v3551_v59  ;;  %3792 = vmatprep.subr.bf16.mxu1 %v3791_v27  ;;  %v1102_v52 = vld [vmem:[#allocation6 + $0x1098] sm:$0xff]  ;;  %v3801_v59 = vpack.c.bf16 %v1095_v46, %v1089_v23  ;;  %v1099_v27 = vld [vmem:[#allocation6 + $0x1080] sm:$0xff]  ;;  %v3563_v61 = vpack.c.bf16 %v1106_v50, %v1100_v48  ;;  %v1129_v23 = vld [vmem:[#allocation6 + $0x1170] sm:$0xff] }
 0x226   :  { %v3803_v63 = vpack.c.bf16 %v1108_v54, %v1102_v52  ;;  %v3565_v8 = vpack.c.bf16 %v1105_v28, %v1099_v27  ;;  %v1125_v50 = vld [vmem:[#allocation6 + $0x1150] sm:$0xff]  ;;  %v1131_v52 = vld [vmem:[#allocation6 + $0x1180] sm:$0xff]  ;;  %v1136_v54 = vld [vmem:[#allocation6 + $0x11a8] sm:$0xff] }
 0x227   :  { %v1144_v27 = vld [vmem:[#allocation6 + $0x11e8] sm:$0xff] }
 0x228   :  { %3554 = vmatpush1.bf16.msra.mxu0 %v3553_v31  ;;  %3794 = vmatpush1.bf16.msra.mxu1 %v3793_v32  ;;  %v1118_v31 = vld [vmem:[#allocation6 + $0x1118] sm:$0xff] }
 0x229   :  { %3556 = vmatprep.subr.bf16.mxu0 %v3555_v40  ;;  %3796 = vmatprep.subr.bf16.mxu1 %v3795_v41  ;;  %v1114_v32 = vld [vmem:[#allocation6 + $0x10f8] sm:$0xff]  ;;  %v3805_v40 = vpack.c.bf16 %v1107_v2, %v1101_v0  ;;  %v1111_v41 = vld [vmem:[#allocation6 + $0x10e0] sm:$0xff]  ;;  %v3567_v9 = vpack.c.bf16 %v1118_v31, %v1112_v37  ;;  %v1141_v0 = vld [vmem:[#allocation6 + $0x11d0] sm:$0xff] }
 0x22a   :  { %v3807_v38 = vpack.c.bf16 %v1120_v35, %v1114_v32  ;;  %v3569_v19 = vpack.c.bf16 %v1117_v43, %v1111_v41  ;;  %v1137_v31 = vld [vmem:[#allocation6 + $0x11b0] sm:$0xff]  ;;  %v1143_v32 = vld [vmem:[#allocation6 + $0x11e0] sm:$0xff]  ;;  %v1148_v35 = vld [vmem:[#allocation6 + $0x1208] sm:$0xff] }
 0x22b   :  { %v1156_v41 = vld [vmem:[#allocation6 + $0x1248] sm:$0xff] }
 0x22c   :  { %3558 = vmatpush1.bf16.msra.mxu0 %v3557_v11  ;;  %3798 = vmatpush1.bf16.msra.mxu1 %v3797_v15  ;;  %v1130_v11 = vld [vmem:[#allocation6 + $0x1178] sm:$0xff] }
 0x22d   :  { %3560 = vmatprep.subr.bf16.mxu0 %v3559_v20  ;;  %3800 = vmatprep.subr.bf16.mxu1 %v3799_v22  ;;  %v1126_v15 = vld [vmem:[#allocation6 + $0x1158] sm:$0xff]  ;;  %v3809_v20 = vpack.c.bf16 %v1119_v25, %v1113_v44  ;;  %v1123_v22 = vld [vmem:[#allocation6 + $0x1140] sm:$0xff]  ;;  %v3571_v46 = vpack.c.bf16 %v1130_v11, %v1124_v26  ;;  %v1153_v44 = vld [vmem:[#allocation6 + $0x1230] sm:$0xff] }
 0x22e   :  { %v3811_v48 = vpack.c.bf16 %v1132_v18, %v1126_v15  ;;  %v3573_v28 = vpack.c.bf16 %v1129_v23, %v1123_v22  ;;  %v1149_v11 = vld [vmem:[#allocation6 + $0x1210] sm:$0xff]  ;;  %v1155_v15 = vld [vmem:[#allocation6 + $0x1240] sm:$0xff]  ;;  %v1160_v18 = vld [vmem:[#allocation6 + $0x1268] sm:$0xff] }
 0x22f   :  { %v1168_v22 = vld [vmem:[#allocation6 + $0x12a8] sm:$0xff] }
 0x230   :  { %3562 = vmatpush1.bf16.msra.mxu0 %v3561_v55  ;;  %3802 = vmatpush1.bf16.msra.mxu1 %v3801_v59  ;;  %v1142_v55 = vld [vmem:[#allocation6 + $0x11d8] sm:$0xff] }
 0x231   :  { %3564 = vmatprep.subr.bf16.mxu0 %v3563_v61  ;;  %3804 = vmatprep.subr.bf16.mxu1 %v3803_v63  ;;  %v1138_v59 = vld [vmem:[#allocation6 + $0x11b8] sm:$0xff]  ;;  %v3813_v61 = vpack.c.bf16 %v1131_v52, %v1125_v50  ;;  %v1135_v63 = vld [vmem:[#allocation6 + $0x11a0] sm:$0xff]  ;;  %v3575_v2 = vpack.c.bf16 %v1142_v55, %v1136_v54  ;;  %v1165_v50 = vld [vmem:[#allocation6 + $0x1290] sm:$0xff] }
 0x232   :  { %v3815_v37 = vpack.c.bf16 %v1144_v27, %v1138_v59  ;;  %v3577_v43 = vpack.c.bf16 %v1141_v0, %v1135_v63  ;;  %v1161_v55 = vld [vmem:[#allocation6 + $0x1270] sm:$0xff]  ;;  %v1167_v59 = vld [vmem:[#allocation6 + $0x12a0] sm:$0xff]  ;;  %v1172_v27 = vld [vmem:[#allocation6 + $0x12c8] sm:$0xff] }
 0x233   :  { %v1180_v63 = vld [vmem:[#allocation6 + $0x1308] sm:$0xff] }
 0x234   :  { %3566 = vmatpush1.bf16.msra.mxu0 %v3565_v8  ;;  %3806 = vmatpush1.bf16.msra.mxu1 %v3805_v40  ;;  %v1154_v8 = vld [vmem:[#allocation6 + $0x1238] sm:$0xff] }
 0x235   :  { %3568 = vmatprep.subr.bf16.mxu0 %v3567_v9  ;;  %3808 = vmatprep.subr.bf16.mxu1 %v3807_v38  ;;  %v1150_v40 = vld [vmem:[#allocation6 + $0x1218] sm:$0xff]  ;;  %v3817_v9 = vpack.c.bf16 %v1143_v32, %v1137_v31  ;;  %v1147_v38 = vld [vmem:[#allocation6 + $0x1200] sm:$0xff]  ;;  %v3579_v25 = vpack.c.bf16 %v1154_v8, %v1148_v35  ;;  %v1177_v31 = vld [vmem:[#allocation6 + $0x12f0] sm:$0xff] }
 0x236   :  { %v3819_v26 = vpack.c.bf16 %v1156_v41, %v1150_v40  ;;  %v3581_v23 = vpack.c.bf16 %v1153_v44, %v1147_v38  ;;  %v1173_v8 = vld [vmem:[#allocation6 + $0x12d0] sm:$0xff]  ;;  %v1179_v40 = vld [vmem:[#allocation6 + $0x1300] sm:$0xff]  ;;  %v1184_v41 = vld [vmem:[#allocation6 + $0x1328] sm:$0xff] }
 0x237   :  { %v1192_v38 = vld [vmem:[#allocation6 + $0x1368] sm:$0xff] }
 0x238   :  { %3570 = vmatpush1.bf16.msra.mxu0 %v3569_v19  ;;  %3810 = vmatpush1.bf16.msra.mxu1 %v3809_v20  ;;  %v1166_v19 = vld [vmem:[#allocation6 + $0x1298] sm:$0xff] }
 0x239   :  { %3572 = vmatprep.subr.bf16.mxu0 %v3571_v46  ;;  %3812 = vmatprep.subr.bf16.mxu1 %v3811_v48  ;;  %v1162_v20 = vld [vmem:[#allocation6 + $0x1278] sm:$0xff]  ;;  %v3821_v46 = vpack.c.bf16 %v1155_v15, %v1149_v11  ;;  %v1159_v48 = vld [vmem:[#allocation6 + $0x1260] sm:$0xff]  ;;  %v3583_v52 = vpack.c.bf16 %v1166_v19, %v1160_v18  ;;  %v1189_v11 = vld [vmem:[#allocation6 + $0x1350] sm:$0xff] }
 0x23a   :  { %v3823_v54 = vpack.c.bf16 %v1168_v22, %v1162_v20  ;;  %v3585_v0 = vpack.c.bf16 %v1165_v50, %v1159_v48  ;;  %v1185_v19 = vld [vmem:[#allocation6 + $0x1330] sm:$0xff]  ;;  %v1191_v20 = vld [vmem:[#allocation6 + $0x1360] sm:$0xff]  ;;  %v1196_v22 = vld [vmem:[#allocation6 + $0x1388] sm:$0xff] }
 0x23b   :  { %v1204_v48 = vld [vmem:[#allocation6 + $0x13c8] sm:$0xff] }
 0x23c   :  { %3574 = vmatpush1.bf16.msra.mxu0 %v3573_v28  ;;  %3814 = vmatpush1.bf16.msra.mxu1 %v3813_v61  ;;  %v1178_v28 = vld [vmem:[#allocation6 + $0x12f8] sm:$0xff] }
 0x23d   :  { %3576 = vmatprep.subr.bf16.mxu0 %v3575_v2  ;;  %3816 = vmatprep.subr.bf16.mxu1 %v3815_v37  ;;  %v1174_v61 = vld [vmem:[#allocation6 + $0x12d8] sm:$0xff]  ;;  %v3825_v2 = vpack.c.bf16 %v1167_v59, %v1161_v55  ;;  %v1171_v37 = vld [vmem:[#allocation6 + $0x12c0] sm:$0xff]  ;;  %v3587_v32 = vpack.c.bf16 %v1178_v28, %v1172_v27  ;;  %v1201_v55 = vld [vmem:[#allocation6 + $0x13b0] sm:$0xff] }
 0x23e   :  { %v3827_v35 = vpack.c.bf16 %v1180_v63, %v1174_v61  ;;  %v3589_v44 = vpack.c.bf16 %v1177_v31, %v1171_v37  ;;  %v1197_v28 = vld [vmem:[#allocation6 + $0x1390] sm:$0xff]  ;;  %v1203_v61 = vld [vmem:[#allocation6 + $0x13c0] sm:$0xff]  ;;  %v1208_v63 = vld [vmem:[#allocation6 + $0x13e8] sm:$0xff] }
 0x23f   :  { %v1216_v37 = vld [vmem:[#allocation6 + $0x1428] sm:$0xff] }
 0x240   :  { %3578 = vmatpush1.bf16.msra.mxu0 %v3577_v43  ;;  %3818 = vmatpush1.bf16.msra.mxu1 %v3817_v9  ;;  %v1190_v43 = vld [vmem:[#allocation6 + $0x1358] sm:$0xff] }
 0x241   :  { %3580 = vmatprep.subr.bf16.mxu0 %v3579_v25  ;;  %3820 = vmatprep.subr.bf16.mxu1 %v3819_v26  ;;  %v1186_v9 = vld [vmem:[#allocation6 + $0x1338] sm:$0xff]  ;;  %v3829_v25 = vpack.c.bf16 %v1179_v40, %v1173_v8  ;;  %v1183_v26 = vld [vmem:[#allocation6 + $0x1320] sm:$0xff]  ;;  %v3591_v15 = vpack.c.bf16 %v1190_v43, %v1184_v41  ;;  %v1213_v8 = vld [vmem:[#allocation6 + $0x1410] sm:$0xff] }
 0x242   :  { %v3831_v18 = vpack.c.bf16 %v1192_v38, %v1186_v9  ;;  %v3593_v50 = vpack.c.bf16 %v1189_v11, %v1183_v26  ;;  %v1209_v43 = vld [vmem:[#allocation6 + $0x13f0] sm:$0xff]  ;;  %v1215_v9 = vld [vmem:[#allocation6 + $0x1420] sm:$0xff]  ;;  %v1220_v38 = vld [vmem:[#allocation6 + $0x1448] sm:$0xff] }
 0x243   :  { %1531 = vmatmul.mubr.f32.vlgmr.msra.gmra.mrb[0].mxu0 %v4936_v45  ;;  %1863 = vmatmul.mubr.f32.vlgmr.msra.gmra.mrb[24].mxu1 %v4936_v45  ;;  %v1228_v26 = vld [vmem:[#allocation6 + $0x1488] sm:$0xff] }
 0x244   :  { %3582 = vmatpush1.bf16.msra.mxu0 %v3581_v23  ;;  %3822 = vmatpush1.bf16.msra.mxu1 %v3821_v46  ;;  %v1202_v23 = vld [vmem:[#allocation6 + $0x13b8] sm:$0xff] }
 0x245   :  { %3584 = vmatprep.subr.bf16.mxu0 %v3583_v52  ;;  %3824 = vmatprep.subr.bf16.mxu1 %v3823_v54  ;;  %v1198_v46 = vld [vmem:[#allocation6 + $0x1398] sm:$0xff]  ;;  %v3833_v52 = vpack.c.bf16 %v1191_v20, %v1185_v19  ;;  %v1195_v54 = vld [vmem:[#allocation6 + $0x1380] sm:$0xff]  ;;  %v3595_v59 = vpack.c.bf16 %v1202_v23, %v1196_v22  ;;  %v1225_v19 = vld [vmem:[#allocation6 + $0x1470] sm:$0xff] }
 0x246   :  { %1536 = vmatprep.mubr.f32.mxu0 %v4942_v24  ;;  %1868 = vmatprep.mubr.f32.mxu1 %v4942_v24  ;;  %v3835_v27 = vpack.c.bf16 %v1204_v48, %v1198_v46  ;;  %v3597_v31 = vpack.c.bf16 %v1201_v55, %v1195_v54  ;;  %v1221_v23 = vld [vmem:[#allocation6 + $0x1450] sm:$0xff]  ;;  %v1227_v46 = vld [vmem:[#allocation6 + $0x1480] sm:$0xff]  ;;  %v1232_v48 = vld [vmem:[#allocation6 + $0x14a8] sm:$0xff] }
 0x247   :  { %1537 = vmatmul.mubr.f32.gmra.mrb[2].mxu0 %v4940_v33  ;;  %1869 = vmatmul.mubr.f32.gmra.mrb[26].mxu1 %v4940_v33  ;;  %v1240_v54 = vld [vmem:[#allocation6 + $0x14e8] sm:$0xff] }
 0x248   :  { %3586 = vmatpush1.bf16.msra.mxu0 %v3585_v0  ;;  %3826 = vmatpush1.bf16.msra.mxu1 %v3825_v2  ;;  %v1214_v0 = vld [vmem:[#allocation6 + $0x1418] sm:$0xff] }
 0x249   :  { %3588 = vmatprep.subr.bf16.mxu0 %v3587_v32  ;;  %3828 = vmatprep.subr.bf16.mxu1 %v3827_v35  ;;  %v1210_v2 = vld [vmem:[#allocation6 + $0x13f8] sm:$0xff]  ;;  %v3837_v32 = vpack.c.bf16 %v1203_v61, %v1197_v28  ;;  %v1207_v35 = vld [vmem:[#allocation6 + $0x13e0] sm:$0xff]  ;;  %v3599_v40 = vpack.c.bf16 %v1214_v0, %v1208_v63  ;;  %v1237_v28 = vld [vmem:[#allocation6 + $0x14d0] sm:$0xff] }
 0x24a   :  { %1542 = vmatprep.mubr.f32.mxu0 %v4946_v62  ;;  %1874 = vmatprep.mubr.f32.mxu1 %v4946_v62  ;;  %v3839_v41 = vpack.c.bf16 %v1216_v37, %v1210_v2  ;;  %v3601_v11 = vpack.c.bf16 %v1213_v8, %v1207_v35  ;;  %v1233_v0 = vld [vmem:[#allocation6 + $0x14b0] sm:$0xff]  ;;  %v1239_v2 = vld [vmem:[#allocation6 + $0x14e0] sm:$0xff]  ;;  %v1244_v37 = vld [vmem:[#allocation6 + $0x1508] sm:$0xff] }
 0x24b   :  { %1543 = vmatmul.mubr.f32.gmra.mrb[4].mxu0 %v4944_v57  ;;  %1875 = vmatmul.mubr.f32.gmra.mrb[28].mxu1 %v4944_v57  ;;  %v1252_v35 = vld [vmem:[#allocation6 + $0x1548] sm:$0xff] }
 0x24c   :  { %3590 = vmatpush1.bf16.msra.mxu0 %v3589_v44  ;;  %3830 = vmatpush1.bf16.msra.mxu1 %v3829_v25  ;;  %v1226_v44 = vld [vmem:[#allocation6 + $0x1478] sm:$0xff] }
 0x24d   :  { %3592 = vmatprep.subr.bf16.mxu0 %v3591_v15  ;;  %3832 = vmatprep.subr.bf16.mxu1 %v3831_v18  ;;  %v1222_v25 = vld [vmem:[#allocation6 + $0x1458] sm:$0xff]  ;;  %v3841_v15 = vpack.c.bf16 %v1215_v9, %v1209_v43  ;;  %v1219_v18 = vld [vmem:[#allocation6 + $0x1440] sm:$0xff]  ;;  %v3603_v20 = vpack.c.bf16 %v1226_v44, %v1220_v38  ;;  %v1249_v43 = vld [vmem:[#allocation6 + $0x1530] sm:$0xff] }
 0x24e   :  { %3316 = vmatprep.mubr.msk.f32.mxu0 %vm169_vm0, %v4950_v14  ;;  %3319 = vmatprep.mubr.msk.f32.mxu1 %vm169_vm0, %v4950_v14  ;;  %v3843_v22 = vpack.c.bf16 %v1228_v26, %v1222_v25  ;;  %v3605_v55 = vpack.c.bf16 %v1225_v19, %v1219_v18  ;;  %v1245_v44 = vld [vmem:[#allocation6 + $0x1510] sm:$0xff]  ;;  %v1251_v25 = vld [vmem:[#allocation6 + $0x1540] sm:$0xff]  ;;  %v1256_v26 = vld [vmem:[#allocation6 + $0x1568] sm:$0xff] }
 0x24f   :  { %v1264_v18 = vld [vmem:[#allocation6 + $0x15a8] sm:$0xff] }
 0x250   :  { %3594 = vmatpush1.bf16.msra.mxu0 %v3593_v50  ;;  %3834 = vmatpush1.bf16.msra.mxu1 %v3833_v52  ;;  %v1238_v50 = vld [vmem:[#allocation6 + $0x14d8] sm:$0xff] }
 0x251   :  { %3596 = vmatprep.subr.bf16.mxu0 %v3595_v59  ;;  %3836 = vmatprep.subr.bf16.mxu1 %v3835_v27  ;;  %v1234_v52 = vld [vmem:[#allocation6 + $0x14b8] sm:$0xff]  ;;  %v3845_v59 = vpack.c.bf16 %v1227_v46, %v1221_v23  ;;  %v1231_v27 = vld [vmem:[#allocation6 + $0x14a0] sm:$0xff]  ;;  %v3607_v61 = vpack.c.bf16 %v1238_v50, %v1232_v48  ;;  %v1261_v23 = vld [vmem:[#allocation6 + $0x1590] sm:$0xff] }
 0x252   :  { %v3847_v63 = vpack.c.bf16 %v1240_v54, %v1234_v52  ;;  %v3609_v8 = vpack.c.bf16 %v1237_v28, %v1231_v27  ;;  %v1257_v50 = vld [vmem:[#allocation6 + $0x1570] sm:$0xff]  ;;  %v1263_v52 = vld [vmem:[#allocation6 + $0x15a0] sm:$0xff]  ;;  %v1268_v54 = vld [vmem:[#allocation6 + $0x15c8] sm:$0xff] }
 0x253   :  { %v1276_v27 = vld [vmem:[#allocation6 + $0x1608] sm:$0xff] }
 0x254   :  { %3598 = vmatpush1.bf16.msra.mxu0 %v3597_v31  ;;  %3838 = vmatpush1.bf16.msra.mxu1 %v3837_v32  ;;  %v1250_v31 = vld [vmem:[#allocation6 + $0x1538] sm:$0xff] }
 0x255   :  { %3600 = vmatprep.subr.bf16.mxu0 %v3599_v40  ;;  %3840 = vmatprep.subr.bf16.mxu1 %v3839_v41  ;;  %v1246_v32 = vld [vmem:[#allocation6 + $0x1518] sm:$0xff]  ;;  %v3849_v40 = vpack.c.bf16 %v1239_v2, %v1233_v0  ;;  %v1243_v41 = vld [vmem:[#allocation6 + $0x1500] sm:$0xff]  ;;  %v3611_v9 = vpack.c.bf16 %v1250_v31, %v1244_v37  ;;  %v1273_v0 = vld [vmem:[#allocation6 + $0x15f0] sm:$0xff] }
 0x256   :  { %v3851_v38 = vpack.c.bf16 %v1252_v35, %v1246_v32  ;;  %v3613_v19 = vpack.c.bf16 %v1249_v43, %v1243_v41  ;;  %v1269_v31 = vld [vmem:[#allocation6 + $0x15d0] sm:$0xff]  ;;  %v1275_v32 = vld [vmem:[#allocation6 + $0x1600] sm:$0xff]  ;;  %v1280_v35 = vld [vmem:[#allocation6 + $0x1628] sm:$0xff] }
 0x257   :  { %v1288_v41 = vld [vmem:[#allocation6 + $0x1668] sm:$0xff] }
 0x258   :  { %3602 = vmatpush1.bf16.msra.mxu0 %v3601_v11  ;;  %3842 = vmatpush1.bf16.msra.mxu1 %v3841_v15  ;;  %v1262_v11 = vld [vmem:[#allocation6 + $0x1598] sm:$0xff] }
 0x259   :  { %3604 = vmatprep.subr.bf16.mxu0 %v3603_v20  ;;  %3844 = vmatprep.subr.bf16.mxu1 %v3843_v22  ;;  %v1258_v15 = vld [vmem:[#allocation6 + $0x1578] sm:$0xff]  ;;  %v3853_v20 = vpack.c.bf16 %v1251_v25, %v1245_v44  ;;  %v1255_v22 = vld [vmem:[#allocation6 + $0x1560] sm:$0xff]  ;;  %v3615_v46 = vpack.c.bf16 %v1262_v11, %v1256_v26  ;;  %v1285_v26 = vld [vmem:[#allocation6 + $0x1650] sm:$0xff] }
 0x25a   :  { %v3855_v48 = vpack.c.bf16 %v1264_v18, %v1258_v15  ;;  %v3617_v28 = vpack.c.bf16 %v1261_v23, %v1255_v22  ;;  %v1281_v11 = vld [vmem:[#allocation6 + $0x1630] sm:$0xff]  ;;  %v1287_v15 = vld [vmem:[#allocation6 + $0x1660] sm:$0xff]  ;;  %v576_v18 = vld [vmem:[#allocation6 + $0x28] sm:$0xff] }
 0x25b   :  { %v3865_v22 = vpack.c.bf16 %v1287_v15, %v1281_v11  ;;  %v636_v11 = vld [vmem:[#allocation6 + $0x208] sm:$0xff]  ;;  %v642_v15 = vld [vmem:[#allocation6 + $0x238] sm:$0xff] }
 0x25c   :  { %3606 = vmatpush1.bf16.msra.mxu0 %v3605_v55  ;;  %3846 = vmatpush1.bf16.msra.mxu1 %v3845_v59  ;;  %v1274_v55 = vld [vmem:[#allocation6 + $0x15f8] sm:$0xff] }
 0x25d   :  { %3608 = vmatprep.subr.bf16.mxu0 %v3607_v61  ;;  %3848 = vmatprep.subr.bf16.mxu1 %v3847_v63  ;;  %v1270_v59 = vld [vmem:[#allocation6 + $0x15d8] sm:$0xff]  ;;  %v3857_v61 = vpack.c.bf16 %v1263_v52, %v1257_v50  ;;  %v1267_v63 = vld [vmem:[#allocation6 + $0x15c0] sm:$0xff]  ;;  %v3619_v2 = vpack.c.bf16 %v1274_v55, %v1268_v54  ;;  %v588_v50 = vld [vmem:[#allocation6 + $0x88] sm:$0xff] }
 0x25e   :  { %v3859_v37 = vpack.c.bf16 %v1276_v27, %v1270_v59  ;;  %v3621_v43 = vpack.c.bf16 %v1273_v0, %v1267_v63  ;;  %v594_v52 = vld [vmem:[#allocation6 + $0xb8] sm:$0xff]  ;;  %v587_v59 = vld [vmem:[#allocation6 + $0x80] sm:$0xff]  ;;  %v593_v27 = vld [vmem:[#allocation6 + $0xb0] sm:$0xff] }
 0x25f   :  { %v3871_v55 = vpack.c.bf16 %v594_v52, %v588_v50  ;;  %v3873_v63 = vpack.c.bf16 %v593_v27, %v587_v59  ;;  %v653_v52 = vld [vmem:[#allocation6 + $0x290] sm:$0xff] }
 0x260   :  { %3610 = vmatpush1.bf16.msra.mxu0 %v3609_v8  ;;  %3850 = vmatpush1.bf16.msra.mxu1 %v3849_v40  ;;  %v1286_v8 = vld [vmem:[#allocation6 + $0x1658] sm:$0xff] }
 0x261   :  { %3612 = vmatprep.subr.bf16.mxu0 %v3611_v9  ;;  %3852 = vmatprep.subr.bf16.mxu1 %v3851_v38  ;;  %v1282_v40 = vld [vmem:[#allocation6 + $0x1638] sm:$0xff]  ;;  %v3861_v9 = vpack.c.bf16 %v1275_v32, %v1269_v31  ;;  %v1279_v38 = vld [vmem:[#allocation6 + $0x1620] sm:$0xff]  ;;  %v3623_v44 = vpack.c.bf16 %v1286_v8, %v1280_v35  ;;  %v612_v31 = vld [vmem:[#allocation6 + $0x148] sm:$0xff] }
 0x262   :  { %v3863_v25 = vpack.c.bf16 %v1288_v41, %v1282_v40  ;;  %v618_v32 = vld [vmem:[#allocation6 + $0x178] sm:$0xff]  ;;  %v611_v40 = vld [vmem:[#allocation6 + $0x140] sm:$0xff]  ;;  %v617_v41 = vld [vmem:[#allocation6 + $0x170] sm:$0xff] }
 0x263   :  { %v3879_v8 = vpack.c.bf16 %v618_v32, %v612_v31  ;;  %v671_v31 = vld [vmem:[#allocation6 + $0x320] sm:$0xff]  ;;  %v677_v32 = vld [vmem:[#allocation6 + $0x350] sm:$0xff] }
 0x264   :  { %3614 = vmatpush1.bf16.msra.mxu0 %v3613_v19  ;;  %3854 = vmatpush1.bf16.msra.mxu1 %v3853_v20  ;;  %v582_v19 = vld [vmem:[#allocation6 + $0x58] sm:$0xff]  ;;  %v3625_v20 = vpack.c.bf16 %v1285_v26, %v1279_v38  ;;  %v3881_v38 = vpack.c.bf16 %v617_v41, %v611_v40  ;;  %v629_v26 = vld [vmem:[#allocation6 + $0x1d0] sm:$0xff]  ;;  %v3901_v40 = vpack.c.bf16 %v677_v32, %v671_v31 }
 0x265   :  { %3616 = vmatprep.subr.bf16.mxu0 %v3615_v46  ;;  %3856 = vmatprep.subr.bf16.mxu1 %v3855_v48  ;;  %v3867_v23 = vpack.c.bf16 %v582_v19, %v576_v18  ;;  %v575_v46 = vld [vmem:[#allocation6 + $0x20] sm:$0xff]  ;;  %v581_v48 = vld [vmem:[#allocation6 + $0x50] sm:$0xff]  ;;  %v3887_v19 = vpack.c.bf16 %v642_v15, %v636_v11 }
 0x266   :  { %v3869_v54 = vpack.c.bf16 %v581_v48, %v575_v46  ;;  %v654_v46 = vld [vmem:[#allocation6 + $0x298] sm:$0xff]  ;;  %v695_v11 = vld [vmem:[#allocation6 + $0x3e0] sm:$0xff]  ;;  %v701_v15 = vld [vmem:[#allocation6 + $0x410] sm:$0xff] }
 0x268   :  { %3618 = vmatpush1.bf16.msra.mxu0 %v3617_v28  ;;  %3858 = vmatpush1.bf16.msra.mxu1 %v3857_v61  ;;  %v600_v28 = vld [vmem:[#allocation6 + $0xe8] sm:$0xff]  ;;  %v606_v61 = vld [vmem:[#allocation6 + $0x118] sm:$0xff] }
 0x269   :  { %3620 = vmatprep.subr.bf16.mxu0 %v3619_v2  ;;  %3860 = vmatprep.subr.bf16.mxu1 %v3859_v37  ;;  %v3875_v0 = vpack.c.bf16 %v606_v61, %v600_v28  ;;  %v599_v2 = vld [vmem:[#allocation6 + $0xe0] sm:$0xff]  ;;  %v605_v37 = vld [vmem:[#allocation6 + $0x110] sm:$0xff] }
 0x26a   :  { %v3877_v35 = vpack.c.bf16 %v605_v37, %v599_v2  ;;  %v659_v28 = vld [vmem:[#allocation6 + $0x2c0] sm:$0xff]  ;;  %v665_v61 = vld [vmem:[#allocation6 + $0x2f0] sm:$0xff] }
 0x26b   :  { %v3897_v2 = vpack.c.bf16 %v665_v61, %v659_v28 }
 0x26c   :  { %3622 = vmatpush1.bf16.msra.mxu0 %v3621_v43  ;;  %3862 = vmatpush1.bf16.msra.mxu1 %v3861_v9  ;;  %v624_v43 = vld [vmem:[#allocation6 + $0x1a8] sm:$0xff]  ;;  %v630_v9 = vld [vmem:[#allocation6 + $0x1d8] sm:$0xff] }
 0x26d   :  { %3624 = vmatprep.subr.bf16.mxu0 %v3623_v44  ;;  %3864 = vmatprep.subr.bf16.mxu1 %v3863_v25  ;;  %v3883_v44 = vpack.c.bf16 %v630_v9, %v624_v43  ;;  %v623_v25 = vld [vmem:[#allocation6 + $0x1a0] sm:$0xff]  ;;  %v689_v9 = vld [vmem:[#allocation6 + $0x3b0] sm:$0xff] }
 0x26e   :  { %v3885_v18 = vpack.c.bf16 %v629_v26, %v623_v25  ;;  %v683_v43 = vld [vmem:[#allocation6 + $0x380] sm:$0xff] }
 0x26f   :  { %v3905_v25 = vpack.c.bf16 %v689_v9, %v683_v43 }
 0x270   :  { %3626 = vmatpush1.bf16.msra.mxu0 %v3625_v20  ;;  %3866 = vmatpush1.bf16.msra.mxu1 %v3865_v22  ;;  %v635_v20 = vld [vmem:[#allocation6 + $0x200] sm:$0xff]  ;;  %v641_v22 = vld [vmem:[#allocation6 + $0x230] sm:$0xff] }
 0x271   :  { %3868 = vmatprep.subr.bf16.mxu0 %v3867_v23  ;;  %v648_v23 = vld [vmem:[#allocation6 + $0x268] sm:$0xff]  ;;  %v3889_v48 = vpack.c.bf16 %v641_v22, %v635_v20  ;;  %v3909_v20 = vpack.c.bf16 %v701_v15, %v695_v11 }
 0x272   :  { %v3891_v50 = vpack.c.bf16 %v654_v46, %v648_v23  ;;  %v707_v23 = vld [vmem:[#allocation6 + $0x440] sm:$0xff]  ;;  %v713_v46 = vld [vmem:[#allocation6 + $0x470] sm:$0xff] }
 0x273   :  { %1614 = vmatmul.mubr.f32.vlgmr.msra.gmra.mrb[0].mxu0 %v4948_v42  ;;  %1946 = vmatmul.mubr.f32.vlgmr.msra.gmra.mrb[24].mxu1 %v4948_v42 }
 0x274   :  { %3870 = vmatpush1.bf16.msra.mxu0 %v3869_v54  ;;  %3317 = vmatprep.mubr.msk.f32.mxu0 %vm169_vm0, %v4954_v58  ;;  %v660_v54 = vld [vmem:[#allocation6 + $0x2c8] sm:$0xff] }
 0x275   :  { %3320 = vmatprep.mubr.msk.f32.mxu1 %vm169_vm0, %v4954_v58  ;;  %3872 = vmatprep.subr.bf16.mxu0 %v3871_v55  ;;  %v666_v55 = vld [vmem:[#allocation6 + $0x2f8] sm:$0xff] }
 0x276   :  { %v3895_v27 = vpack.c.bf16 %v666_v55, %v660_v54  ;;  %v719_v54 = vld [vmem:[#allocation6 + $0x4a0] sm:$0xff]  ;;  %v725_v55 = vld [vmem:[#allocation6 + $0x4d0] sm:$0xff] }
 0x277   :  { %1620 = vmatmul.mubr.f32.gmra.mrb[2].mxu0 %v4952_v49  ;;  %1952 = vmatmul.mubr.f32.gmra.mrb[26].mxu1 %v4952_v49  ;;  %v3917_v28 = vpack.c.bf16 %v725_v55, %v719_v54 }
 0x278   :  { %3874 = vmatpush1.bf16.msra.mxu0 %v3873_v63  ;;  %3318 = vmatprep.mubr.msk.f32.mxu0 %vm169_vm0, %v4958_v29  ;;  %v672_v63 = vld [vmem:[#allocation6 + $0x328] sm:$0xff] }
 0x279   :  { %3321 = vmatprep.mubr.msk.f32.mxu1 %vm169_vm0, %v4958_v29  ;;  %3876 = vmatprep.subr.bf16.mxu0 %v3875_v0  ;;  %v678_v0 = vld [vmem:[#allocation6 + $0x358] sm:$0xff] }
 0x27a   :  { %v3899_v37 = vpack.c.bf16 %v678_v0, %v672_v63  ;;  %v731_v63 = vld [vmem:[#allocation6 + $0x500] sm:$0xff]  ;;  %v737_v0 = vld [vmem:[#allocation6 + $0x530] sm:$0xff] }
 0x27b   :  { %1626 = vmatmul.mubr.f32.gmra.mrb[4].mxu0 %v4956_v3  ;;  %1958 = vmatmul.mubr.f32.gmra.mrb[28].mxu1 %v4956_v3  ;;  %v3921_v31 = vpack.c.bf16 %v737_v0, %v731_v63 }
 0x27c   :  { %3878 = vmatpush1.bf16.msra.mxu0 %v3877_v35  ;;  %2028 = vmatprep.mubr.f32.mxu0 %v4900_v6  ;;  %v647_v6 = vld [vmem:[#allocation6 + $0x260] sm:$0xff]  ;;  %v684_v35 = vld [vmem:[#allocation6 + $0x388] sm:$0xff] }
 0x27d   :  { %3880 = vmatprep.subr.bf16.mxu0 %v3879_v8  ;;  %v3893_v59 = vpack.c.bf16 %v653_v52, %v647_v6  ;;  %v690_v8 = vld [vmem:[#allocation6 + $0x3b8] sm:$0xff]  ;;  %v3913_v6 = vpack.c.bf16 %v713_v46, %v707_v23 }
 0x27e   :  { %v3903_v41 = vpack.c.bf16 %v690_v8, %v684_v35  ;;  %v743_v35 = vld [vmem:[#allocation6 + $0x560] sm:$0xff]  ;;  %v749_v8 = vld [vmem:[#allocation6 + $0x590] sm:$0xff] }
 0x27f   :  { %v3925_v43 = vpack.c.bf16 %v749_v8, %v743_v35  ;;  %v815_v35 = vld [vmem:[#allocation6 + $0x7a0] sm:$0xff]  ;;  %v828_v8 = vld [vmem:[#allocation6 + $0x808] sm:$0xff] }
 0x280   :  { %3882 = vmatpush1.bf16.msra.mxu0 %v3881_v38  ;;  %v696_v38 = vld [vmem:[#allocation6 + $0x3e8] sm:$0xff] }
 0x281   :  { %3884 = vmatprep.subr.bf16.mxu0 %v3883_v44  ;;  %v702_v44 = vld [vmem:[#allocation6 + $0x418] sm:$0xff] }
 0x282   :  { %v3907_v26 = vpack.c.bf16 %v702_v44, %v696_v38  ;;  %v755_v38 = vld [vmem:[#allocation6 + $0x5c0] sm:$0xff]  ;;  %v761_v44 = vld [vmem:[#allocation6 + $0x5f0] sm:$0xff] }
 0x283   :  { %v3929_v11 = vpack.c.bf16 %v761_v44, %v755_v38  ;;  %v840_v38 = vld [vmem:[#allocation6 + $0x868] sm:$0xff]  ;;  %v846_v44 = vld [vmem:[#allocation6 + $0x898] sm:$0xff] }
 0x284   :  { %3886 = vmatpush1.bf16.msra.mxu0 %v3885_v18  ;;  %v708_v18 = vld [vmem:[#allocation6 + $0x448] sm:$0xff] }
 0x285   :  { %3888 = vmatprep.subr.bf16.mxu0 %v3887_v19  ;;  %v714_v19 = vld [vmem:[#allocation6 + $0x478] sm:$0xff] }
 0x286   :  { %v3911_v22 = vpack.c.bf16 %v714_v19, %v708_v18  ;;  %v767_v18 = vld [vmem:[#allocation6 + $0x620] sm:$0xff]  ;;  %v773_v19 = vld [vmem:[#allocation6 + $0x650] sm:$0xff] }
 0x287   :  { %v3933_v23 = vpack.c.bf16 %v773_v19, %v767_v18 }
 0x288   :  { %3890 = vmatpush1.bf16.msra.mxu0 %v3889_v48  ;;  %v720_v48 = vld [vmem:[#allocation6 + $0x4a8] sm:$0xff] }
 0x289   :  { %3892 = vmatprep.subr.bf16.mxu0 %v3891_v50  ;;  %v726_v50 = vld [vmem:[#allocation6 + $0x4d8] sm:$0xff] }
 0x28a   :  { %v3915_v52 = vpack.c.bf16 %v726_v50, %v720_v48  ;;  %v779_v48 = vld [vmem:[#allocation6 + $0x680] sm:$0xff]  ;;  %v785_v50 = vld [vmem:[#allocation6 + $0x6b0] sm:$0xff] }
 0x28b   :  { %v3937_v54 = vpack.c.bf16 %v785_v50, %v779_v48 }
 0x28c   :  { %3894 = vmatpush1.bf16.msra.mxu0 %v3893_v59  ;;  %v732_v59 = vld [vmem:[#allocation6 + $0x508] sm:$0xff] }
 0x28d   :  { %3896 = vmatprep.subr.bf16.mxu0 %v3895_v27  ;;  %v738_v27 = vld [vmem:[#allocation6 + $0x538] sm:$0xff] }
 0x28e   :  { %v3919_v61 = vpack.c.bf16 %v738_v27, %v732_v59  ;;  %v791_v59 = vld [vmem:[#allocation6 + $0x6e0] sm:$0xff]  ;;  %v797_v27 = vld [vmem:[#allocation6 + $0x710] sm:$0xff] }
 0x28f   :  { %v3941_v63 = vpack.c.bf16 %v797_v27, %v791_v59 }
 0x290   :  { %3898 = vmatpush1.bf16.msra.mxu0 %v3897_v2  ;;  %v744_v2 = vld [vmem:[#allocation6 + $0x568] sm:$0xff] }
 0x291   :  { %3900 = vmatprep.subr.bf16.mxu0 %v3899_v37  ;;  %v750_v37 = vld [vmem:[#allocation6 + $0x598] sm:$0xff] }
 0x292   :  { %v3923_v32 = vpack.c.bf16 %v750_v37, %v744_v2  ;;  %v803_v2 = vld [vmem:[#allocation6 + $0x740] sm:$0xff]  ;;  %v816_v37 = vld [vmem:[#allocation6 + $0x7a8] sm:$0xff] }
 0x294   :  { %3902 = vmatpush1.bf16.msra.mxu0 %v3901_v40  ;;  %v756_v40 = vld [vmem:[#allocation6 + $0x5c8] sm:$0xff] }
 0x295   :  { %3904 = vmatprep.subr.bf16.mxu0 %v3903_v41  ;;  %v762_v41 = vld [vmem:[#allocation6 + $0x5f8] sm:$0xff] }
 0x296   :  { %v3927_v9 = vpack.c.bf16 %v762_v41, %v756_v40 }
 0x298   :  { %3906 = vmatpush1.bf16.msra.mxu0 %v3905_v25  ;;  %v768_v25 = vld [vmem:[#allocation6 + $0x628] sm:$0xff] }
 0x299   :  { %3908 = vmatprep.subr.bf16.mxu0 %v3907_v26  ;;  %v774_v26 = vld [vmem:[#allocation6 + $0x658] sm:$0xff] }
 0x29a   :  { %v3931_v15 = vpack.c.bf16 %v774_v26, %v768_v25  ;;  %v3955_v25 = vpack.c.bf16 %v846_v44, %v840_v38  ;;  %v845_v26 = vld [vmem:[#allocation6 + $0x890] sm:$0xff]  ;;  %v911_v38 = vld [vmem:[#allocation6 + $0xaa0] sm:$0xff] }
 0x29b   :  { %v917_v44 = vld [vmem:[#allocation6 + $0xad0] sm:$0xff] }
 0x29c   :  { %3910 = vmatpush1.bf16.msra.mxu0 %v3909_v20  ;;  %v780_v20 = vld [vmem:[#allocation6 + $0x688] sm:$0xff] }
 0x29d   :  { %3912 = vmatprep.subr.bf16.mxu0 %v3911_v22  ;;  %v786_v22 = vld [vmem:[#allocation6 + $0x6b8] sm:$0xff] }
 0x29e   :  { %v3935_v46 = vpack.c.bf16 %v786_v22, %v780_v20  ;;  %v851_v20 = vld [vmem:[#allocation6 + $0x8c0] sm:$0xff]  ;;  %v857_v22 = vld [vmem:[#allocation6 + $0x8f0] sm:$0xff] }
 0x29f   :  { %v3961_v48 = vpack.c.bf16 %v857_v22, %v851_v20 }
 0x2a0   :  { %3914 = vmatpush1.bf16.msra.mxu0 %v3913_v6  ;;  %v792_v6 = vld [vmem:[#allocation6 + $0x6e8] sm:$0xff] }
 0x2a1   :  { %3916 = vmatprep.subr.bf16.mxu0 %v3915_v52  ;;  %v798_v52 = vld [vmem:[#allocation6 + $0x718] sm:$0xff] }
 0x2a2   :  { %v3939_v55 = vpack.c.bf16 %v798_v52, %v792_v6  ;;  %v863_v6 = vld [vmem:[#allocation6 + $0x920] sm:$0xff]  ;;  %v869_v52 = vld [vmem:[#allocation6 + $0x950] sm:$0xff] }
 0x2a3   :  { %v3965_v59 = vpack.c.bf16 %v869_v52, %v863_v6 }
 0x2a4   :  { %3918 = vmatpush1.bf16.msra.mxu0 %v3917_v28  ;;  %v804_v28 = vld [vmem:[#allocation6 + $0x748] sm:$0xff] }
 0x2a5   :  { %3920 = vmatprep.subr.bf16.mxu0 %v3919_v61  ;;  %v810_v61 = vld [vmem:[#allocation6 + $0x778] sm:$0xff] }
 0x2a6   :  { %v3943_v0 = vpack.c.bf16 %v810_v61, %v804_v28  ;;  %v875_v28 = vld [vmem:[#allocation6 + $0x980] sm:$0xff]  ;;  %v881_v61 = vld [vmem:[#allocation6 + $0x9b0] sm:$0xff] }
 0x2a8   :  { %3922 = vmatpush1.bf16.msra.mxu0 %v3921_v31 }
 0x2a9   :  { %3924 = vmatprep.subr.bf16.mxu0 %v3923_v32 }
 0x2ac   :  { %3926 = vmatpush1.bf16.msra.mxu0 %v3925_v43  ;;  %v827_v43 = vld [vmem:[#allocation6 + $0x800] sm:$0xff] }
 0x2ad   :  { %3928 = vmatprep.subr.bf16.mxu0 %v3927_v9  ;;  %v833_v9 = vld [vmem:[#allocation6 + $0x830] sm:$0xff] }
 0x2b0   :  { %3930 = vmatpush1.bf16.msra.mxu0 %v3929_v11  ;;  %v852_v11 = vld [vmem:[#allocation6 + $0x8c8] sm:$0xff] }
 0x2b1   :  { %3932 = vmatprep.subr.bf16.mxu0 %v3931_v15  ;;  %v858_v15 = vld [vmem:[#allocation6 + $0x8f8] sm:$0xff] }
 0x2b2   :  { %v3959_v19 = vpack.c.bf16 %v858_v15, %v852_v11  ;;  %v923_v11 = vld [vmem:[#allocation6 + $0xb00] sm:$0xff]  ;;  %v929_v15 = vld [vmem:[#allocation6 + $0xb30] sm:$0xff] }
 0x2b3   :  { %2029 = vmatmul.mubr.f32.vlgmr.msra.gmra.mrb[6].mxu0 %v4898_v36  ;;  %v809_v36 = vld [vmem:[#allocation6 + $0x770] sm:$0xff]  ;;  %v3985_v20 = vpack.c.bf16 %v929_v15, %v923_v11  ;;  %v1007_v11 = vld [vmem:[#allocation6 + $0xda0] sm:$0xff]  ;;  %v1020_v15 = vld [vmem:[#allocation6 + $0xe08] sm:$0xff] }
 0x2b4   :  { %2034 = vmatprep.mubr.f32.mxu0 %v4908_v12  ;;  %3934 = vmatpush1.bf16.msra.mxu0 %v3933_v23  ;;  %v822_v12 = vld [vmem:[#allocation6 + $0x7d8] sm:$0xff]  ;;  %v3945_v31 = vpack.c.bf16 %v809_v36, %v803_v2  ;;  %v864_v23 = vld [vmem:[#allocation6 + $0x928] sm:$0xff]  ;;  %v3969_v2 = vpack.c.bf16 %v881_v61, %v875_v28 }
 0x2b5   :  { %3936 = vmatprep.subr.bf16.mxu0 %v3935_v46  ;;  %v3947_v32 = vpack.c.bf16 %v822_v12, %v816_v37  ;;  %v870_v46 = vld [vmem:[#allocation6 + $0x958] sm:$0xff]  ;;  %v887_v37 = vld [vmem:[#allocation6 + $0x9e0] sm:$0xff]  ;;  %v893_v12 = vld [vmem:[#allocation6 + $0xa10] sm:$0xff] }
 0x2b6   :  { %v3963_v50 = vpack.c.bf16 %v870_v46, %v864_v23  ;;  %v935_v23 = vld [vmem:[#allocation6 + $0xb60] sm:$0xff]  ;;  %v941_v46 = vld [vmem:[#allocation6 + $0xb90] sm:$0xff] }
 0x2b7   :  { %2035 = vmatmul.mubr.f32.gmra.mrb[8].mxu0 %v4906_v39  ;;  %v821_v39 = vld [vmem:[#allocation6 + $0x7d0] sm:$0xff]  ;;  %v3989_v6 = vpack.c.bf16 %v941_v46, %v935_v23  ;;  %v1032_v23 = vld [vmem:[#allocation6 + $0xe68] sm:$0xff]  ;;  %v1038_v46 = vld [vmem:[#allocation6 + $0xe98] sm:$0xff] }
 0x2b8   :  { %2040 = vmatprep.mubr.f32.mxu0 %v4916_v47  ;;  %3938 = vmatpush1.bf16.msra.mxu0 %v3937_v54  ;;  %v834_v47 = vld [vmem:[#allocation6 + $0x838] sm:$0xff]  ;;  %v3949_v40 = vpack.c.bf16 %v821_v39, %v815_v35  ;;  %v876_v54 = vld [vmem:[#allocation6 + $0x988] sm:$0xff]  ;;  %v3973_v35 = vpack.c.bf16 %v893_v12, %v887_v37 }
 0x2b9   :  { %3940 = vmatprep.subr.bf16.mxu0 %v3939_v55  ;;  %v3951_v41 = vpack.c.bf16 %v834_v47, %v828_v8  ;;  %v882_v55 = vld [vmem:[#allocation6 + $0x9b8] sm:$0xff]  ;;  %v899_v8 = vld [vmem:[#allocation6 + $0xa40] sm:$0xff]  ;;  %v905_v47 = vld [vmem:[#allocation6 + $0xa70] sm:$0xff] }
 0x2ba   :  { %v3967_v27 = vpack.c.bf16 %v882_v55, %v876_v54  ;;  %v947_v54 = vld [vmem:[#allocation6 + $0xbc0] sm:$0xff]  ;;  %v953_v55 = vld [vmem:[#allocation6 + $0xbf0] sm:$0xff] }
 0x2bb   :  { %2041 = vmatmul.mubr.f32.gmra.mrb[10].mxu0 %v4914_v21  ;;  %v3953_v21 = vpack.c.bf16 %v833_v9, %v827_v43  ;;  %v3977_v43 = vpack.c.bf16 %v905_v47, %v899_v8  ;;  %v3993_v28 = vpack.c.bf16 %v953_v55, %v947_v54 }
 0x2bc   :  { %3942 = vmatpush1.bf16.msra.mxu0 %v3941_v63  ;;  %2111 = vmatprep.mubr.f32.mxu0 %v4924_v60  ;;  %v839_v60 = vld [vmem:[#allocation6 + $0x860] sm:$0xff]  ;;  %v888_v63 = vld [vmem:[#allocation6 + $0x9e8] sm:$0xff] }
 0x2bd   :  { %3944 = vmatprep.subr.bf16.mxu0 %v3943_v0  ;;  %v3957_v18 = vpack.c.bf16 %v845_v26, %v839_v60  ;;  %v894_v0 = vld [vmem:[#allocation6 + $0xa18] sm:$0xff]  ;;  %v3981_v60 = vpack.c.bf16 %v917_v44, %v911_v38 }
 0x2be   :  { %v3971_v36 = vpack.c.bf16 %v894_v0, %v888_v63  ;;  %v959_v63 = vld [vmem:[#allocation6 + $0xc20] sm:$0xff]  ;;  %v965_v0 = vld [vmem:[#allocation6 + $0xc50] sm:$0xff] }
 0x2bf   :  { %v3997_v37 = vpack.c.bf16 %v965_v0, %v959_v63 }
 0x2c0   :  { %3946 = vmatpush1.bf16.msra.mxu0 %v3945_v31  ;;  %v900_v31 = vld [vmem:[#allocation6 + $0xa48] sm:$0xff] }
 0x2c1   :  { %3948 = vmatprep.subr.bf16.mxu0 %v3947_v32  ;;  %v906_v32 = vld [vmem:[#allocation6 + $0xa78] sm:$0xff] }
 0x2c2   :  { %v3975_v39 = vpack.c.bf16 %v906_v32, %v900_v31  ;;  %v971_v31 = vld [vmem:[#allocation6 + $0xc80] sm:$0xff]  ;;  %v977_v32 = vld [vmem:[#allocation6 + $0xcb0] sm:$0xff] }
 0x2c3   :  { %v4001_v8 = vpack.c.bf16 %v977_v32, %v971_v31 }
 0x2c4   :  { %3950 = vmatpush1.bf16.msra.mxu0 %v3949_v40  ;;  %v912_v40 = vld [vmem:[#allocation6 + $0xaa8] sm:$0xff] }
 0x2c5   :  { %3952 = vmatprep.subr.bf16.mxu0 %v3951_v41  ;;  %v918_v41 = vld [vmem:[#allocation6 + $0xad8] sm:$0xff] }
 0x2c6   :  { %v3979_v9 = vpack.c.bf16 %v918_v41, %v912_v40  ;;  %v983_v40 = vld [vmem:[#allocation6 + $0xce0] sm:$0xff]  ;;  %v989_v41 = vld [vmem:[#allocation6 + $0xd10] sm:$0xff] }
 0x2c7   :  { %v4005_v38 = vpack.c.bf16 %v989_v41, %v983_v40 }
 0x2c8   :  { %3954 = vmatpush1.bf16.msra.mxu0 %v3953_v21  ;;  %v924_v21 = vld [vmem:[#allocation6 + $0xb08] sm:$0xff] }
 0x2c9   :  { %3956 = vmatprep.subr.bf16.mxu0 %v3955_v25  ;;  %v930_v25 = vld [vmem:[#allocation6 + $0xb38] sm:$0xff] }
 0x2ca   :  { %v3983_v26 = vpack.c.bf16 %v930_v25, %v924_v21  ;;  %v995_v21 = vld [vmem:[#allocation6 + $0xd40] sm:$0xff]  ;;  %v1008_v25 = vld [vmem:[#allocation6 + $0xda8] sm:$0xff] }
 0x2cc   :  { %3958 = vmatpush1.bf16.msra.mxu0 %v3957_v18  ;;  %v936_v18 = vld [vmem:[#allocation6 + $0xb68] sm:$0xff] }
 0x2cd   :  { %3960 = vmatprep.subr.bf16.mxu0 %v3959_v19  ;;  %v942_v19 = vld [vmem:[#allocation6 + $0xb98] sm:$0xff] }
 0x2ce   :  { %v3987_v22 = vpack.c.bf16 %v942_v19, %v936_v18 }
 0x2d0   :  { %3962 = vmatpush1.bf16.msra.mxu0 %v3961_v48  ;;  %v948_v48 = vld [vmem:[#allocation6 + $0xbc8] sm:$0xff] }
 0x2d1   :  { %3964 = vmatprep.subr.bf16.mxu0 %v3963_v50  ;;  %v954_v50 = vld [vmem:[#allocation6 + $0xbf8] sm:$0xff] }
 0x2d2   :  { %v3991_v52 = vpack.c.bf16 %v954_v50, %v948_v48  ;;  %v4019_v48 = vpack.c.bf16 %v1038_v46, %v1032_v23  ;;  %v1037_v50 = vld [vmem:[#allocation6 + $0xe90] sm:$0xff]  ;;  %v1115_v23 = vld [vmem:[#allocation6 + $0x1100] sm:$0xff] }
 0x2d3   :  { %v1121_v46 = vld [vmem:[#allocation6 + $0x1130] sm:$0xff] }
 0x2d4   :  { %3966 = vmatpush1.bf16.msra.mxu0 %v3965_v59  ;;  %v960_v59 = vld [vmem:[#allocation6 + $0xc28] sm:$0xff] }
 0x2d5   :  { %3968 = vmatprep.subr.bf16.mxu0 %v3967_v27  ;;  %v966_v27 = vld [vmem:[#allocation6 + $0xc58] sm:$0xff] }
 0x2d6   :  { %v3995_v61 = vpack.c.bf16 %v966_v27, %v960_v59  ;;  %v1043_v59 = vld [vmem:[#allocation6 + $0xec0] sm:$0xff]  ;;  %v1049_v27 = vld [vmem:[#allocation6 + $0xef0] sm:$0xff] }
 0x2d7   :  { %v4025_v63 = vpack.c.bf16 %v1049_v27, %v1043_v59 }
 0x2d8   :  { %3970 = vmatpush1.bf16.msra.mxu0 %v3969_v2  ;;  %v972_v2 = vld [vmem:[#allocation6 + $0xc88] sm:$0xff] }
 0x2d9   :  { %3972 = vmatprep.subr.bf16.mxu0 %v3971_v36  ;;  %v978_v36 = vld [vmem:[#allocation6 + $0xcb8] sm:$0xff] }
 0x2da   :  { %v3999_v12 = vpack.c.bf16 %v978_v36, %v972_v2  ;;  %v1055_v2 = vld [vmem:[#allocation6 + $0xf20] sm:$0xff]  ;;  %v1061_v36 = vld [vmem:[#allocation6 + $0xf50] sm:$0xff] }
 0x2db   :  { %v4029_v31 = vpack.c.bf16 %v1061_v36, %v1055_v2 }
 0x2dc   :  { %3974 = vmatpush1.bf16.msra.mxu0 %v3973_v35  ;;  %v984_v35 = vld [vmem:[#allocation6 + $0xce8] sm:$0xff] }
 0x2dd   :  { %3976 = vmatprep.subr.bf16.mxu0 %v3975_v39  ;;  %v990_v39 = vld [vmem:[#allocation6 + $0xd18] sm:$0xff] }
 0x2de   :  { %v4003_v47 = vpack.c.bf16 %v990_v39, %v984_v35  ;;  %v1067_v35 = vld [vmem:[#allocation6 + $0xf80] sm:$0xff]  ;;  %v1073_v39 = vld [vmem:[#allocation6 + $0xfb0] sm:$0xff] }
 0x2df   :  { %v4033_v40 = vpack.c.bf16 %v1073_v39, %v1067_v35 }
 0x2e0   :  { %3978 = vmatpush1.bf16.msra.mxu0 %v3977_v43  ;;  %v996_v43 = vld [vmem:[#allocation6 + $0xd48] sm:$0xff] }
 0x2e1   :  { %3980 = vmatprep.subr.bf16.mxu0 %v3979_v9  ;;  %v1002_v9 = vld [vmem:[#allocation6 + $0xd78] sm:$0xff] }
 0x2e2   :  { %v4007_v44 = vpack.c.bf16 %v1002_v9, %v996_v43  ;;  %v1079_v43 = vld [vmem:[#allocation6 + $0xfe0] sm:$0xff]  ;;  %v1085_v9 = vld [vmem:[#allocation6 + $0x1010] sm:$0xff] }
 0x2e4   :  { %3982 = vmatpush1.bf16.msra.mxu0 %v3981_v60 }
 0x2e5   :  { %3984 = vmatprep.subr.bf16.mxu0 %v3983_v26 }
 0x2e8   :  { %3986 = vmatpush1.bf16.msra.mxu0 %v3985_v20  ;;  %v1019_v20 = vld [vmem:[#allocation6 + $0xe00] sm:$0xff] }
 0x2e9   :  { %3988 = vmatprep.subr.bf16.mxu0 %v3987_v22  ;;  %v1025_v22 = vld [vmem:[#allocation6 + $0xe30] sm:$0xff] }
 0x2ec   :  { %3990 = vmatpush1.bf16.msra.mxu0 %v3989_v6  ;;  %v1044_v6 = vld [vmem:[#allocation6 + $0xec8] sm:$0xff] }
 0x2ed   :  { %3992 = vmatprep.subr.bf16.mxu0 %v3991_v52  ;;  %v1050_v52 = vld [vmem:[#allocation6 + $0xef8] sm:$0xff] }
 0x2ee   :  { %v4023_v55 = vpack.c.bf16 %v1050_v52, %v1044_v6  ;;  %v1127_v6 = vld [vmem:[#allocation6 + $0x1160] sm:$0xff]  ;;  %v1133_v52 = vld [vmem:[#allocation6 + $0x1190] sm:$0xff] }
 0x2ef   :  { %v4053_v59 = vpack.c.bf16 %v1133_v52, %v1127_v6  ;;  %v1236_v6 = vld [vmem:[#allocation6 + $0x14c8] sm:$0xff]  ;;  %v1242_v52 = vld [vmem:[#allocation6 + $0x14f8] sm:$0xff] }
 0x2f0   :  { %3994 = vmatpush1.bf16.msra.mxu0 %v3993_v28  ;;  %v1056_v28 = vld [vmem:[#allocation6 + $0xf28] sm:$0xff] }
 0x2f1   :  { %3996 = vmatprep.subr.bf16.mxu0 %v3995_v61  ;;  %v1062_v61 = vld [vmem:[#allocation6 + $0xf58] sm:$0xff] }
 0x2f2   :  { %v4027_v0 = vpack.c.bf16 %v1062_v61, %v1056_v28  ;;  %v1139_v28 = vld [vmem:[#allocation6 + $0x11c0] sm:$0xff]  ;;  %v1145_v61 = vld [vmem:[#allocation6 + $0x11f0] sm:$0xff] }
 0x2f3   :  { %2112 = vmatmul.mubr.f32.vlgmr.msra.gmra.mrb[6].mxu0 %v4922_v56  ;;  %v1001_v56 = vld [vmem:[#allocation6 + $0xd70] sm:$0xff]  ;;  %v4057_v2 = vpack.c.bf16 %v1145_v61, %v1139_v28  ;;  %v4087_v61 = vpack.c.bf16 %v1242_v52, %v1236_v6 }
 0x2f4   :  { %2117 = vmatprep.mubr.f32.mxu0 %v4930_v30  ;;  %3998 = vmatpush1.bf16.msra.mxu0 %v3997_v37  ;;  %v1014_v30 = vld [vmem:[#allocation6 + $0xdd8] sm:$0xff]  ;;  %v4009_v60 = vpack.c.bf16 %v1001_v56, %v995_v21  ;;  %v1068_v37 = vld [vmem:[#allocation6 + $0xf88] sm:$0xff]  ;;  %v4037_v21 = vpack.c.bf16 %v1085_v9, %v1079_v43 }
 0x2f5   :  { %4000 = vmatprep.subr.bf16.mxu0 %v3999_v12  ;;  %v4011_v26 = vpack.c.bf16 %v1014_v30, %v1008_v25  ;;  %v1074_v12 = vld [vmem:[#allocation6 + $0xfb8] sm:$0xff]  ;;  %v1091_v25 = vld [vmem:[#allocation6 + $0x1040] sm:$0xff]  ;;  %v1097_v30 = vld [vmem:[#allocation6 + $0x1070] sm:$0xff] }
 0x2f6   :  { %v4031_v32 = vpack.c.bf16 %v1074_v12, %v1068_v37  ;;  %v1151_v37 = vld [vmem:[#allocation6 + $0x1220] sm:$0xff]  ;;  %v1157_v12 = vld [vmem:[#allocation6 + $0x1250] sm:$0xff] }
 0x2f7   :  { %2118 = vmatmul.mubr.f32.gmra.mrb[8].mxu0 %v4928_v5  ;;  %v1013_v5 = vld [vmem:[#allocation6 + $0xdd0] sm:$0xff]  ;;  %v4061_v35 = vpack.c.bf16 %v1157_v12, %v1151_v37  ;;  %v1248_v37 = vld [vmem:[#allocation6 + $0x1528] sm:$0xff]  ;;  %v1254_v12 = vld [vmem:[#allocation6 + $0x1558] sm:$0xff] }
 0x2f8   :  { %2123 = vmatprep.mubr.f32.mxu0 %v4934_v16  ;;  %4002 = vmatpush1.bf16.msra.mxu0 %v4001_v8  ;;  %v1026_v16 = vld [vmem:[#allocation6 + $0xe38] sm:$0xff]  ;;  %v4013_v18 = vpack.c.bf16 %v1013_v5, %v1007_v11  ;;  %v1080_v8 = vld [vmem:[#allocation6 + $0xfe8] sm:$0xff]  ;;  %v4041_v11 = vpack.c.bf16 %v1097_v30, %v1091_v25 }
 0x2f9   :  { %4004 = vmatprep.subr.bf16.mxu0 %v4003_v47  ;;  %v4015_v19 = vpack.c.bf16 %v1026_v16, %v1020_v15  ;;  %v1086_v47 = vld [vmem:[#allocation6 + $0x1018] sm:$0xff]  ;;  %v1103_v15 = vld [vmem:[#allocation6 + $0x10a0] sm:$0xff]  ;;  %v1109_v16 = vld [vmem:[#allocation6 + $0x10d0] sm:$0xff] }
 0x2fa   :  { %v4035_v41 = vpack.c.bf16 %v1086_v47, %v1080_v8  ;;  %v1163_v8 = vld [vmem:[#allocation6 + $0x1280] sm:$0xff]  ;;  %v1169_v47 = vld [vmem:[#allocation6 + $0x12b0] sm:$0xff] }
 0x2fb   :  { %2124 = vmatmul.mubr.f32.gmra.mrb[10].mxu0 %v4932_v10  ;;  %v4017_v10 = vpack.c.bf16 %v1025_v22, %v1019_v20  ;;  %v4045_v20 = vpack.c.bf16 %v1109_v16, %v1103_v15  ;;  %v4065_v43 = vpack.c.bf16 %v1169_v47, %v1163_v8  ;;  %v1205_v15 = vld [vmem:[#allocation6 + $0x13d0] sm:$0xff]  ;;  %v1218_v16 = vld [vmem:[#allocation6 + $0x1438] sm:$0xff]  ;;  %v4091_v47 = vpack.c.bf16 %v1254_v12, %v1248_v37 }
 0x2fc   :  { %4006 = vmatpush1.bf16.msra.mxu0 %v4005_v38  ;;  %2194 = vmatprep.mubr.f32.mxu0 %v4938_v53  ;;  %v1031_v53 = vld [vmem:[#allocation6 + $0xe60] sm:$0xff]  ;;  %v1092_v38 = vld [vmem:[#allocation6 + $0x1048] sm:$0xff] }
 0x2fd   :  { %4008 = vmatprep.subr.bf16.mxu0 %v4007_v44  ;;  %v4021_v54 = vpack.c.bf16 %v1037_v50, %v1031_v53  ;;  %v1098_v44 = vld [vmem:[#allocation6 + $0x1078] sm:$0xff]  ;;  %v4049_v53 = vpack.c.bf16 %v1121_v46, %v1115_v23  ;;  %v1224_v23 = vld [vmem:[#allocation6 + $0x1468] sm:$0xff] }
 0x2fe   :  { %v4039_v56 = vpack.c.bf16 %v1098_v44, %v1092_v38  ;;  %v1175_v38 = vld [vmem:[#allocation6 + $0x12e0] sm:$0xff]  ;;  %v1181_v44 = vld [vmem:[#allocation6 + $0x1310] sm:$0xff]  ;;  %v1230_v46 = vld [vmem:[#allocation6 + $0x1498] sm:$0xff] }
 0x2ff   :  { %v4069_v25 = vpack.c.bf16 %v1181_v44, %v1175_v38  ;;  %v1260_v38 = vld [vmem:[#allocation6 + $0x1588] sm:$0xff]  ;;  %v1266_v44 = vld [vmem:[#allocation6 + $0x15b8] sm:$0xff] }
 0x300   :  { %4010 = vmatpush1.bf16.msra.mxu0 %v4009_v60  ;;  %v1104_v60 = vld [vmem:[#allocation6 + $0x10a8] sm:$0xff] }
 0x301   :  { %4012 = vmatprep.subr.bf16.mxu0 %v4011_v26  ;;  %v1110_v26 = vld [vmem:[#allocation6 + $0x10d8] sm:$0xff] }
 0x302   :  { %v4043_v5 = vpack.c.bf16 %v1110_v26, %v1104_v60  ;;  %v1187_v60 = vld [vmem:[#allocation6 + $0x1340] sm:$0xff]  ;;  %v1200_v26 = vld [vmem:[#allocation6 + $0x13a8] sm:$0xff] }
 0x304   :  { %4014 = vmatpush1.bf16.msra.mxu0 %v4013_v18  ;;  %v1116_v18 = vld [vmem:[#allocation6 + $0x1108] sm:$0xff] }
 0x305   :  { %4016 = vmatprep.subr.bf16.mxu0 %v4015_v19  ;;  %v1122_v19 = vld [vmem:[#allocation6 + $0x1138] sm:$0xff] }
 0x306   :  { %v4047_v22 = vpack.c.bf16 %v1122_v19, %v1116_v18 }
 0x308   :  { %4018 = vmatpush1.bf16.msra.mxu0 %v4017_v10  ;;  %v1128_v10 = vld [vmem:[#allocation6 + $0x1168] sm:$0xff] }
 0x309   :  { %4020 = vmatprep.subr.bf16.mxu0 %v4019_v48  ;;  %v1134_v48 = vld [vmem:[#allocation6 + $0x1198] sm:$0xff] }
 0x30a   :  { %v4051_v50 = vpack.c.bf16 %v1134_v48, %v1128_v10  ;;  %v4083_v10 = vpack.c.bf16 %v1230_v46, %v1224_v23  ;;  %v1229_v48 = vld [vmem:[#allocation6 + $0x1490] sm:$0xff]  ;;  %v1283_v46 = vld [vmem:[#allocation6 + $0x1640] sm:$0xff] }
 0x30c   :  { %4022 = vmatpush1.bf16.msra.mxu0 %v4021_v54  ;;  %v1140_v54 = vld [vmem:[#allocation6 + $0x11c8] sm:$0xff] }
 0x30d   :  { %4024 = vmatprep.subr.bf16.mxu0 %v4023_v55  ;;  %v1146_v55 = vld [vmem:[#allocation6 + $0x11f8] sm:$0xff] }
 0x30e   :  { %v4055_v27 = vpack.c.bf16 %v1146_v55, %v1140_v54 }
 0x310   :  { %4026 = vmatpush1.bf16.msra.mxu0 %v4025_v63  ;;  %v1152_v63 = vld [vmem:[#allocation6 + $0x1228] sm:$0xff] }
 0x311   :  { %4028 = vmatprep.subr.bf16.mxu0 %v4027_v0  ;;  %v1158_v0 = vld [vmem:[#allocation6 + $0x1258] sm:$0xff] }
 0x312   :  { %v4059_v36 = vpack.c.bf16 %v1158_v0, %v1152_v63  ;;  %v1235_v63 = vld [vmem:[#allocation6 + $0x14c0] sm:$0xff]  ;;  %v1241_v0 = vld [vmem:[#allocation6 + $0x14f0] sm:$0xff] }
 0x313   :  { %v4089_v8 = vpack.c.bf16 %v1241_v0, %v1235_v63 }
 0x314   :  { %4030 = vmatpush1.bf16.msra.mxu0 %v4029_v31  ;;  %v1164_v31 = vld [vmem:[#allocation6 + $0x1288] sm:$0xff] }
 0x315   :  { %4032 = vmatprep.subr.bf16.mxu0 %v4031_v32  ;;  %v1170_v32 = vld [vmem:[#allocation6 + $0x12b8] sm:$0xff] }
 0x316   :  { %v4063_v39 = vpack.c.bf16 %v1170_v32, %v1164_v31 }
 0x318   :  { %4034 = vmatpush1.bf16.msra.mxu0 %v4033_v40  ;;  %v1176_v40 = vld [vmem:[#allocation6 + $0x12e8] sm:$0xff] }
 0x319   :  { %4036 = vmatprep.subr.bf16.mxu0 %v4035_v41  ;;  %v1182_v41 = vld [vmem:[#allocation6 + $0x1318] sm:$0xff] }
 0x31a   :  { %v4067_v9 = vpack.c.bf16 %v1182_v41, %v1176_v40  ;;  %v1247_v40 = vld [vmem:[#allocation6 + $0x1520] sm:$0xff]  ;;  %v1253_v41 = vld [vmem:[#allocation6 + $0x1550] sm:$0xff] }
 0x31c   :  { %4038 = vmatpush1.bf16.msra.mxu0 %v4037_v21  ;;  %v1188_v21 = vld [vmem:[#allocation6 + $0x1348] sm:$0xff] }
 0x31d   :  { %4040 = vmatprep.subr.bf16.mxu0 %v4039_v56  ;;  %v1194_v56 = vld [vmem:[#allocation6 + $0x1378] sm:$0xff] }
 0x31e   :  { %v4071_v30 = vpack.c.bf16 %v1194_v56, %v1188_v21 }
 0x320   :  { %4042 = vmatpush1.bf16.msra.mxu0 %v4041_v11 }
 0x321   :  { %4044 = vmatprep.subr.bf16.mxu0 %v4043_v5 }
 0x324   :  { %4046 = vmatpush1.bf16.msra.mxu0 %v4045_v20  ;;  %v1211_v20 = vld [vmem:[#allocation6 + $0x1400] sm:$0xff] }
 0x325   :  { %4048 = vmatprep.subr.bf16.mxu0 %v4047_v22  ;;  %v1217_v22 = vld [vmem:[#allocation6 + $0x1430] sm:$0xff] }
 0x328   :  { %4050 = vmatpush1.bf16.msra.mxu0 %v4049_v53 }
 0x329   :  { %4052 = vmatprep.subr.bf16.mxu0 %v4051_v50 }
 0x32c   :  { %4054 = vmatpush1.bf16.msra.mxu0 %v4053_v59 }
 0x32d   :  { %4056 = vmatprep.subr.bf16.mxu0 %v4055_v27 }
 0x330   :  { %4058 = vmatpush1.bf16.msra.mxu0 %v4057_v2 }
 0x331   :  { %4060 = vmatprep.subr.bf16.mxu0 %v4059_v36 }
 0x333   :  { %2195 = vmatmul.mubr.f32.vlgmr.msra.gmra.mrb[6].mxu0 %v4936_v45  ;;  %v1193_v45 = vld [vmem:[#allocation6 + $0x1370] sm:$0xff] }
 0x334   :  { %2200 = vmatprep.mubr.f32.mxu0 %v4942_v24  ;;  %4062 = vmatpush1.bf16.msra.mxu0 %v4061_v35  ;;  %v1206_v24 = vld [vmem:[#allocation6 + $0x13d8] sm:$0xff]  ;;  %v4073_v11 = vpack.c.bf16 %v1193_v45, %v1187_v60  ;;  %v4093_v60 = vpack.c.bf16 %v1253_v41, %v1247_v40  ;;  %v4095_v45 = vpack.c.bf16 %v1266_v44, %v1260_v38 }
 0x335   :  { %4064 = vmatprep.subr.bf16.mxu0 %v4063_v39  ;;  %v4075_v5 = vpack.c.bf16 %v1206_v24, %v1200_v26  ;;  %v1259_v26 = vld [vmem:[#allocation6 + $0x1580] sm:$0xff]  ;;  %v1265_v24 = vld [vmem:[#allocation6 + $0x15b0] sm:$0xff] }
 0x337   :  { %2201 = vmatmul.mubr.f32.gmra.mrb[8].mxu0 %v4940_v33  ;;  %v1199_v33 = vld [vmem:[#allocation6 + $0x13a0] sm:$0xff] }
 0x338   :  { %2206 = vmatprep.mubr.f32.mxu0 %v4946_v62  ;;  %4066 = vmatpush1.bf16.msra.mxu0 %v4065_v43  ;;  %v1212_v62 = vld [vmem:[#allocation6 + $0x1408] sm:$0xff]  ;;  %v4077_v18 = vpack.c.bf16 %v1205_v15, %v1199_v33  ;;  %v4097_v15 = vpack.c.bf16 %v1265_v24, %v1259_v26 }
 0x339   :  { %4068 = vmatprep.subr.bf16.mxu0 %v4067_v9  ;;  %v4079_v19 = vpack.c.bf16 %v1218_v16, %v1212_v62  ;;  %v1271_v16 = vld [vmem:[#allocation6 + $0x15e0] sm:$0xff] }
 0x33b   :  { %2207 = vmatmul.mubr.f32.gmra.mrb[10].mxu0 %v4944_v57  ;;  %v4081_v57 = vpack.c.bf16 %v1217_v22, %v1211_v20  ;;  %v1290_v20 = vld [vmem:[#allocation6 + $0x1678] sm:$0xff] }
 0x33c   :  { %4070 = vmatpush1.bf16.msra.mxu0 %v4069_v25  ;;  %3322 = vmatprep.mubr.msk.f32.mxu0 %vm169_vm0, %v4950_v14  ;;  %v1223_v14 = vld [vmem:[#allocation6 + $0x1460] sm:$0xff] }
 0x33d   :  { %4072 = vmatprep.subr.bf16.mxu0 %v4071_v30  ;;  %v4085_v28 = vpack.c.bf16 %v1229_v48, %v1223_v14 }
 0x340   :  { %4074 = vmatpush1.bf16.msra.mxu0 %v4073_v11  ;;  %v1272_v11 = vld [vmem:[#allocation6 + $0x15e8] sm:$0xff] }
 0x341   :  { %4076 = vmatprep.subr.bf16.mxu0 %v4075_v5  ;;  %v1278_v5 = vld [vmem:[#allocation6 + $0x1618] sm:$0xff] }
 0x342   :  { %v4099_v62 = vpack.c.bf16 %v1278_v5, %v1272_v11 }
 0x344   :  { %4078 = vmatpush1.bf16.msra.mxu0 %v4077_v18  ;;  %v1277_v18 = vld [vmem:[#allocation6 + $0x1610] sm:$0xff] }
 0x345   :  { %4080 = vmatprep.subr.bf16.mxu0 %v4079_v19  ;;  %v1284_v19 = vld [vmem:[#allocation6 + $0x1648] sm:$0xff]  ;;  %v4101_v22 = vpack.c.bf16 %v1277_v18, %v1271_v16 }
 0x346   :  { %v5020_v53 = vpop.f32.mrb[0].mxu0  ;;  %v5022_v50 = vpop.f32.mrb[24].mxu1  ;;  %v4103_v23 = vpack.c.bf16 %v1290_v20, %v1284_v19 }
 0x347   :  { %v5024_v54 = vpop.f32.mrb[1].mxu0  ;;  %v5026_v55 = vpop.f32.mrb[25].mxu1  ;;  %v5030_v59 = vmul.f32 %v5022_v50, %v5022_v50  ;;  %v5082_v33 = vmul.f32 %v5020_v53, %v5020_v53 }
 0x348   :  { %v5034_v27 = vmul.f32 %v5024_v54, %v5024_v54  ;;  %4082 = vmatpush1.bf16.msra.mxu0 %v4081_v57  ;;  %v1289_v57 = vld [vmem:[#allocation6 + $0x1670] sm:$0xff] }
 0x349   :  { %2376 = vrot.lane.b32.xlu1 %v5030_v59, %s4547_s27  ;;  %4084 = vmatprep.subr.bf16.mxu0 %v4083_v10  ;;  %v4105_v10 = vpack.c.bf16 %v1289_v57, %v1283_v46 }
 0x34a   :  { %2347 = vrot.lane.b32.xlu0 %v5034_v27, %s4547_s27  ;;  %v5040_v2 = vpop.f32.mrb[2].mxu0  ;;  %v5042_v36 = vpop.f32.mrb[26].mxu1 }
 0x34b   :  { %v5044_v31 = vpop.f32.mrb[3].mxu0  ;;  %v5046_v32 = vpop.f32.mrb[27].mxu1  ;;  %v5050_v35 = vmul.f32 %v5042_v36, %v5042_v36 }
 0x34c   :  { %v5054_v39 = vmul.f32 %v5044_v31, %v5044_v31  ;;  %4086 = vmatpush1.bf16.msra.mxu0 %v4085_v28 }
 0x34d   :  { %2378 = vrot.lane.b32.xlu1 %v5050_v35, %s4547_s27  ;;  %4088 = vmatprep.subr.bf16.mxu0 %v4087_v61 }
 0x34e   :  { %2351 = vrot.lane.b32.xlu0 %v5054_v39, %s4547_s27  ;;  %v5060_v43 = vpop.f32.mrb[4].mxu0  ;;  %v5062_v9 = vpop.f32.mrb[28].mxu1 }
 0x34f   :  { %v5064_v21 = vpop.f32.mrb[5].mxu0  ;;  %v5066_v56 = vpop.f32.mrb[29].mxu1  ;;  %v5070_v25 = vmul.f32 %v5062_v9, %v5062_v9 }
 0x350   :  { %v5074_v30 = vmul.f32 %v5064_v21, %v5064_v21  ;;  %4090 = vmatpush1.bf16.msra.mxu0 %v4089_v8 }
 0x351   :  { %2380 = vrot.lane.b32.xlu1 %v5070_v25, %s4547_s27  ;;  %4092 = vmatprep.subr.bf16.mxu0 %v4091_v47 }
 0x352   :  { %2355 = vrot.lane.b32.xlu0 %v5074_v30, %s4547_s27 }
 0x354   :  { %4094 = vmatpush1.bf16.msra.mxu0 %v4093_v60 }
 0x355   :  { %4096 = vmatprep.subr.bf16.mxu0 %v4095_v45  ;;  %v5134_v45 = vmul.f32 %v5060_v43, %v5060_v43 }
 0x356   :  { %2345 = vrot.lane.b32.xlu0 %v5082_v33, %s4547_s27 }
 0x358   :  { %4098 = vmatpush1.bf16.msra.mxu0 %v4097_v15 }
 0x359   :  { %4100 = vmatprep.subr.bf16.mxu0 %v4099_v62  ;;  %v5151_v62 = vstv %s3325_s3 }
 0x35c   :  { %4102 = vmatpush1.bf16.msra.mxu0 %v4101_v22 }
 0x35d   :  { %4104 = vmatprep.subr.bf16.mxu0 %v4103_v23 }
 0x360   :  { %4106 = vmatpush1.bf16.msra.mxu0 %v4105_v10 }
 0x363   :  { %2278 = vmatmul.mubr.f32.vlgmr.msra.gmra.mrb[6].mxu0 %v4948_v42 }
 0x364   :  { %3323 = vmatprep.mubr.msk.f32.mxu0 %vm169_vm0, %v4954_v58 }
 0x367   :  { %2284 = vmatmul.mubr.f32.gmra.mrb[8].mxu0 %v4952_v49  ;;  %v5101_v49 = vmul.f32 %v5040_v2, %v5040_v2 }
 0x368   :  { %3324 = vmatprep.mubr.msk.f32.mxu0 %vm169_vm0, %v4958_v29 }
 0x36b   :  { %2290 = vmatmul.mubr.f32.gmra.mrb[10].mxu0 %v4956_v3 }
 0x3bb   :  { %v2377_v52 = vpop.permute.xlu1 %2376 }
 0x3bc   :  { %v2348_v14 = vpop.permute.xlu0 %2347 }
 0x3bd   :  { %v2391_v48 = vsub.f32 %v5026_v55, %v2348_v14  ;;  %v2382_v61 = vsel %vm2357_vm2, %v2348_v14, %v2377_v52 }
 0x3bf   :  { %2452 = vrot.lane.b32.xlu1 %v2391_v48, %s4554_s1  ;;  %v2379_v63 = vpop.permute.xlu1 %2378 }
 0x3c0   :  { %v2352_v6 = vpop.permute.xlu0 %2351 }
 0x3c1   :  { %v2383_v8 = vsel %vm2357_vm2, %v2352_v6, %v2379_v63  ;;  %v2393_v41 = vsub.f32 %v5046_v32, %v2352_v6 }
 0x3c3   :  { %2311 = vrot.lane.b32.xlu1 %v5024_v54, %s4554_s1  ;;  %v2381_v60 = vpop.permute.xlu1 %2380 }
 0x3c4   :  { %v5097_v42 = vpop.permute.xlu0 %2355 }
 0x3c5   :  { %v2395_v38 = vsub.f32 %v5066_v56, %v5097_v42  ;;  %v2384_v26 = vsel %vm2357_vm2, %v5097_v42, %v2381_v60 }
 0x3c7   :  { %2349 = vrot.lane.b32.xlu1 %v5101_v49, %s4547_s27 }
 0x3c8   :  { %v2346_v58 = vpop.permute.xlu0 %2345 }
 0x3c9   :  { %v2358_v3 = vsel %vm2357_vm2, %v2346_v58, %v2348_v14  ;;  %v2367_v15 = vsub.f32 %v5022_v50, %v2346_v58 }
 0x3ca   :  { %v2368_v29 = vsub.f32 %v5026_v55, %v2358_v3 }
 0x431   :  { %v2453_v11 = vpop.permute.xlu1 %2452 }
 0x435   :  { %v2312_v5 = vpop.permute.xlu1 %2311 }
 0x436   :  { %v5107_v28 = vpop.f32.mrb[6].mxu0 }
 0x437   :  { %v2392_v0 = vsub.f32 %v5107_v28, %v2382_v61  ;;  %v5111_v37 = vpop.f32.mrb[7].mxu0 }
 0x439   :  { %2454 = vrot.lane.b32.xlu0 %v2392_v0, %s4554_s1  ;;  %v2350_v20 = vpop.permute.xlu1 %2349 }
 0x43a   :  { %v5114_v12 = vpop.f32.mrb[8].mxu0  ;;  %v2359_v58 = vsel %vm2357_vm2, %v2350_v20, %v2352_v6 }
 0x43b   :  { %v2394_v47 = vsub.f32 %v5114_v12, %v2383_v8  ;;  %v5118_v40 = vpop.f32.mrb[9].mxu0 }
 0x43d   :  { %2313 = vrot.lane.b32.xlu0 %v5022_v50, %s4554_s1  ;;  %2458 = vrot.lane.b32.xlu1 %v2394_v47, %s4554_s1 }
 0x43e   :  { %v5123_v55 = vpop.f32.mrb[10].mxu0 }
 0x43f   :  { %v5128_v44 = vpop.f32.mrb[11].mxu0  ;;  %v2396_v24 = vsub.f32 %v5123_v55, %v2384_v26 }
 0x441   :  { %2456 = vrot.lane.b32.xlu0 %v2393_v41, %s4554_s1  ;;  %2460 = vrot.lane.b32.xlu1 %v2395_v38, %s4554_s1 }
 0x445   :  { %2353 = vrot.lane.b32.xlu0 %v5134_v45, %s4547_s27  ;;  %2315 = vrot.lane.b32.xlu1 %v5044_v31, %s4554_s1 }
 0x449   :  { %2319 = vrot.lane.b32.xlu1 %v5064_v21, %s4554_s1  ;;  %2462 = vrot.lane.b32.xlu0 %v2396_v24, %s4554_s1 }
 0x44d   :  { %2317 = vrot.lane.b32.xlu0 %v5042_v36, %s4554_s1 }
 0x451   :  { %2321 = vrot.lane.b32.xlu0 %v5062_v9, %s4554_s1 }
 0x4ab   :  { %v2455_v16 = vpop.permute.xlu0 %2454 }
 0x4ac   :  { %v2464_v18 = vsel %vm2323_vm3, %v2453_v11, %v2455_v16  ;;  %v2474_v19 = vadd.f32 %v2455_v16, %v2368_v29  ;;  %v2370_v29 = vsub.f32 %v5046_v32, %v2359_v58  ;;  %v2619_v58 = vld [vmem:[#allocation8 + $0x18] sm:$0xff] }
 0x4ad   :  { %v2473_v22 = vadd.f32 %v2464_v18, %v2367_v15 }
 0x4ae   :  { %v2480_v23 = vadd.f32 %v2474_v19, %v5151_v62 }
 0x4af   :  { %v2479_v46 = vadd.f32 %v2473_v22, %v5151_v62  ;;  %v2314_v57 = vpop.permute.xlu0 %2313  ;;  %v2459_v50 = vpop.permute.xlu1 %2458 }
 0x4b0   :  { %4386 = vrcp.f32 %v2480_v23  ;;  %v2324_v10 = vsel %vm2323_vm3, %v2312_v5, %v2314_v57  ;;  %v5158_v14 = vmul.f32 %v2314_v57, %v5024_v54  ;;  %v2369_v54 = vsub.f32 %v5042_v36, %v2350_v20  ;;  %v2616_v57 = vld [vmem:[#allocation8] sm:$0xff] }
 0x4b1   :  { %4388 = vrcp.f32 %v2479_v46  ;;  %v5161_v48 = vmul.f32 %v2324_v10, %v5020_v53  ;;  %v2476_v61 = vadd.f32 %v2459_v50, %v2370_v29  ;;  %v2617_v10 = vld [vmem:[#allocation8 + $0x8] sm:$0xff] }
 0x4b2   :  { %2405 = vrot.lane.b32.xlu0 %v5158_v14, %s4551_s23 }
 0x4b3   :  { %v2457_v3 = vpop.permute.xlu0 %2456  ;;  %2403 = vrot.lane.b32.xlu1 %v5161_v48, %s4551_s23  ;;  %v2461_v63 = vpop.permute.xlu1 %2460  ;;  %v2482_v38 = vadd.f32 %v2476_v61, %v5151_v62  ;;  %v2621_v61 = vld [vmem:[#allocation8 + $0x28] sm:$0xff] }
 0x4b4   :  { %v2465_v52 = vsel %vm2323_vm3, %v2457_v3, %v2459_v50  ;;  %v2618_v50 = vld [vmem:[#allocation8 + $0x10] sm:$0xff] }
 0x4b5   :  { %v2475_v53 = vadd.f32 %v2465_v52, %v2369_v54  ;;  %4390 = vrcp.f32 %v2482_v38  ;;  %v5211_v52 = vpack.c.bf16 %v2619_v58, %v2618_v50  ;;  %v2620_v54 = vld [vmem:[#allocation8 + $0x20] sm:$0xff]  ;;  %v2627_v38 = vld [vmem:[#allocation8 + $0x58] sm:$0xff] }
 0x4b7   :  { %v2354_v0 = vpop.permute.xlu0 %2353  ;;  %v2481_v36 = vadd.f32 %v2475_v53, %v5151_v62  ;;  %v2316_v11 = vpop.permute.xlu1 %2315  ;;  %v2623_v53 = vld [vmem:[#allocation8 + $0x38] sm:$0xff] }
 0x4b8   :  { %v2360_v6 = vsel %vm2357_vm2, %v2354_v0, %v5097_v42  ;;  %v2371_v60 = vsub.f32 %v5062_v9, %v2354_v0  ;;  %v2622_v0 = vld [vmem:[#allocation8 + $0x30] sm:$0xff] }
 0x4b9   :  { %v2372_v8 = vsub.f32 %v5066_v56, %v2360_v6  ;;  %4392 = vrcp.f32 %v2481_v36  ;;  %v5224_v6 = vpack.c.bf16 %v2623_v53, %v2622_v0  ;;  %v2629_v36 = vld [vmem:[#allocation8 + $0x68] sm:$0xff] }
 0x4ba   :  { %v4387_v47 = vpop.eup %4386 }
 0x4bb   :  { %v4389_v41 = vpop.eup %4388  ;;  %2499 = vrot.lane.b32.xlu0 %v4387_v47, %s4547_s27  ;;  %v2463_v32 = vpop.permute.xlu0 %2462  ;;  %v2625_v47 = vld [vmem:[#allocation8 + $0x48] sm:$0xff] }
 0x4bc   :  { %v2466_v26 = vsel %vm2323_vm3, %v2461_v63, %v2463_v32  ;;  %v2478_v24 = vadd.f32 %v2463_v32, %v2372_v8  ;;  %2497 = vrot.lane.b32.xlu1 %v4389_v41, %s4547_s27  ;;  %v2320_v19 = vpop.permute.xlu1 %2319  ;;  %v5218_v63 = vpack.c.bf16 %v2621_v61, %v2620_v54  ;;  %v2624_v8 = vld [vmem:[#allocation8 + $0x40] sm:$0xff]  ;;  %v2626_v41 = vld [vmem:[#allocation8 + $0x50] sm:$0xff] }
 0x4bd   :  { %v2477_v42 = vadd.f32 %v2466_v26, %v2371_v60  ;;  %v5232_v60 = vpack.c.bf16 %v2627_v38, %v2626_v41  ;;  %v2628_v32 = vld [vmem:[#allocation8 + $0x60] sm:$0xff] }
 0x4be   :  { %v2484_v56 = vadd.f32 %v2478_v24, %v5151_v62  ;;  %v5236_v26 = vpack.c.bf16 %v2629_v36, %v2628_v32  ;;  %v2630_v24 = vld [vmem:[#allocation8 + $0x70] sm:$0xff] }
 0x4bf   :  { %v2318_v5 = vpop.permute.xlu0 %2317  ;;  %v2483_v15 = vadd.f32 %v2477_v42, %v5151_v62 }
 0x4c0   :  { %v2325_v9 = vsel %vm2323_vm3, %v2316_v11, %v2318_v5  ;;  %v5184_v16 = vmul.f32 %v2318_v5, %v5044_v31  ;;  %4394 = vrcp.f32 %v2484_v56  ;;  %v2631_v11 = vld [vmem:[#allocation8 + $0x78] sm:$0xff] }
 0x4c1   :  { %v5187_v18 = vmul.f32 %v2325_v9, %v5040_v2  ;;  %4396 = vrcp.f32 %v2483_v15  ;;  %v4391_v2 = vpop.eup %4390  ;;  %v5240_v42 = vpack.c.bf16 %v2631_v11, %v2630_v24  ;;  %v5245_v15 = vld [vmem:[#allocation8 + $0x80] sm:$0xf] }
 0x4c2   :  { %2409 = vrot.lane.b32.xlu0 %v5184_v16, %s4551_s23 }
 0x4c3   :  { %2407 = vrot.lane.b32.xlu1 %v5187_v18, %s4551_s23  ;;  %v2322_v20 = vpop.permute.xlu0 %2321  ;;  %v4393_v46 = vpop.eup %4392 }
 0x4c4   :  { %v2326_v22 = vsel %vm2323_vm3, %v2320_v19, %v2322_v20  ;;  %v5195_v23 = vmul.f32 %v2322_v20, %v5064_v21  ;;  %v4555_v21 = vmov 0.0|0.0  }
 0x4c5   :  { %v5198_v31 = vmul.f32 %v2326_v22, %v5060_v43  ;;  %4107 = vmatprep.subr.bf16.mxu1 %v4555_v21  ;;  %v5207_v43 = vpack.c.bf16 %v2617_v10, %v2616_v57 }
 0x4c6   :  { %2413 = vrot.lane.b32.xlu0 %v5195_v23, %s4551_s23 }
 0x4c7   :  { %2411 = vrot.lane.b32.xlu1 %v5198_v31, %s4551_s23  ;;  %4109 = vmatpush1.bf16.msra.mxu1 %v5207_v43  ;;  %s2431_s23 = sld [smem:[#allocation3]] }
 0x4c8   :  { %4110 = vmatprep.subr.bf16.mxu1 %v4555_v21 }
 0x4ca   :  { %2503 = vrot.lane.b32.xlu0 %v4391_v2, %s4547_s27  ;;  %v4395_v3 = vpop.eup %4394 }
 0x4cb   :  { %2501 = vrot.lane.b32.xlu1 %v4393_v46, %s4547_s27  ;;  %v4397_v29 = vpop.eup %4396  ;;  %4112 = vmatpush1.bf16.msra.mxu1 %v5211_v52 }
 0x4cc   :  { %4113 = vmatprep.subr.bf16.mxu1 %v4555_v21 }
 0x4ce   :  { %2507 = vrot.lane.b32.xlu0 %v4395_v3, %s4547_s27 }
 0x4cf   :  { %2505 = vrot.lane.b32.xlu1 %v4397_v29, %s4547_s27  ;;  %4115 = vmatpush1.bf16.msra.mxu1 %v5218_v63  ;;  %s4556_s27 = smov 112  }
 0x4d0   :  { %4116 = vmatprep.subr.bf16.mxu1 %v4555_v21 }
 0x4d2   :  { %2539 = vrot.lane.b32.xlu0 %v5030_v59, %s4554_s1  ;;  %v5228_v59 = vpack.c.bf16 %v2625_v47, %v2624_v8 }
 0x4d3   :  { %2537 = vrot.lane.b32.xlu1 %v5034_v27, %s4554_s1  ;;  %4118 = vmatpush1.bf16.msra.mxu1 %v5224_v6 }
 0x4d4   :  { %4119 = vmatprep.subr.bf16.mxu1 %v4555_v21 }
 0x4d7   :  { %4121 = vmatpush1.bf16.msra.mxu1 %v5228_v59 }
 0x4d8   :  { %4122 = vmatprep.subr.bf16.mxu1 %v4555_v21 }
 0x4db   :  { %4124 = vmatpush1.bf16.msra.mxu1 %v5232_v60 }
 0x4dc   :  { %4125 = vmatprep.subr.bf16.mxu1 %v4555_v21 }
 0x4df   :  { %4127 = vmatpush1.bf16.msra.mxu1 %v5236_v26 }
 0x4e0   :  { %4128 = vmatprep.subr.bf16.mxu1 %v4555_v21 }
 0x4e3   :  { %4130 = vmatpush1.bf16.msra.mxu1 %v5240_v42 }
 0x4e4   :  { %2679 = vmatprep.subr.mxu1 %v4553_v13 }
 0x4e7   :  { %3326 = vmatpush1.msk.msra.mxu1 %vm2643_vm5, %v5245_v15 }
 0x4e8   :  { %4131 = vmatprep.subr.bf16.mxu1 %v4555_v21 }
 0x524   :  { %v2406_v56 = vpop.permute.xlu0 %2405 }
 0x525   :  { %v2404_v5 = vpop.permute.xlu1 %2403 }
 0x526   :  { %v2416_v9 = vsel %vm2415_vm4, %v2404_v5, %v2406_v56  ;;  %v2425_v19 = vsub.f32 %v5107_v28, %v2404_v5 }
 0x527   :  { %v2426_v20 = vsub.f32 %v5111_v37, %v2416_v9 }
 0x528   :  { %v2433_v22 = vmul.f32 2.0, %v2425_v19 }
 0x529   :  { %v2434_v2 = vmul.f32 2.0, %v2426_v20 }
 0x52a   :  { %v2440_v57 = vadd.f32 %v5151_v62, %v2433_v22 }
 0x52b   :  { %v2441_v50 = vadd.f32 %v5151_v62, %v2434_v2 }
 0x52d   :  { %v2500_v46 = vpop.permute.xlu0 %2499 }
 0x52e   :  { %v2498_v10 = vpop.permute.xlu1 %2497 }
 0x52f   :  { %v2509_v58 = vsel %vm2357_vm2, %v2498_v10, %v2500_v46  ;;  %v2518_v3 = vmul.f32 %v2498_v10, %v2440_v57 }
 0x530   :  { %v2519_v29 = vmul.f32 %v2509_v58, %v2441_v50 }
 0x531   :  { %2588 = vrot.lane.b32.xlu1 %v2518_v3, %s4556_s27 }
 0x532   :  { %2590 = vrot.lane.b32.xlu0 %v2519_v29, %s4556_s27 }
 0x534   :  { %v2410_v28 = vpop.permute.xlu0 %2409 }
 0x535   :  { %v2408_v37 = vpop.permute.xlu1 %2407  ;;  %2541 = vrot.lane.b32.xlu1 %v5054_v39, %s4554_s1 }
 0x536   :  { %v2417_v54 = vsel %vm2415_vm4, %v2408_v37, %v2410_v28  ;;  %v2427_v61 = vsub.f32 %v5114_v12, %v2408_v37  ;;  %2543 = vrot.lane.b32.xlu0 %v5050_v35, %s4554_s1  ;;  %v2525_v37 = vmul.f32 2.0, %v5158_v14 }
 0x537   :  { %v2428_v0 = vsub.f32 %v5118_v40, %v2417_v54  ;;  %v2524_v54 = vmul.f32 2.0, %v5161_v48 }
 0x538   :  { %v2435_v53 = vmul.f32 2.0, %v2427_v61  ;;  %v2414_v8 = vpop.permute.xlu0 %2413 }
 0x539   :  { %v2436_v47 = vmul.f32 2.0, %v2428_v0  ;;  %2545 = vrot.lane.b32.xlu1 %v5074_v30, %s4554_s1  ;;  %v2412_v41 = vpop.permute.xlu1 %2411 }
 0x53a   :  { %v2418_v38 = vsel %vm2415_vm4, %v2412_v41, %v2414_v8  ;;  %v2429_v32 = vsub.f32 %v5123_v55, %v2412_v41  ;;  %2547 = vrot.lane.b32.xlu0 %v5070_v25, %s4554_s1  ;;  %v2442_v40 = vadd.f32 %v5151_v62, %v2435_v53 }
 0x53b   :  { %v2430_v12 = vsub.f32 %v5128_v44, %v2418_v38  ;;  %v2443_v56 = vadd.f32 %v5151_v62, %v2436_v47 }
 0x53c   :  { %v2437_v36 = vmul.f32 2.0, %v2429_v32  ;;  %v2504_v35 = vpop.permute.xlu0 %2503 }
 0x53d   :  { %v2438_v24 = vmul.f32 2.0, %v2430_v12  ;;  %v2502_v11 = vpop.permute.xlu1 %2501 }
 0x53e   :  { %v2510_v5 = vsel %vm2357_vm2, %v2502_v11, %v2504_v35  ;;  %v2520_v9 = vmul.f32 %v2502_v11, %v2442_v40  ;;  %v2444_v20 = vadd.f32 %v5151_v62, %v2437_v36 }
 0x53f   :  { %v2521_v19 = vmul.f32 %v2510_v5, %v2443_v56  ;;  %v2445_v44 = vadd.f32 %v5151_v62, %v2438_v24  ;;  %v5285_v62 = vstv %s2431_s23 }
 0x540   :  { %2592 = vrot.lane.b32.xlu1 %v2520_v9, %s4556_s27  ;;  %v2508_v55 = vpop.permute.xlu0 %2507  ;;  %v2532_v53 = vadd.f32 %v5285_v62, %v2525_v37 }
 0x541   :  { %v2506_v25 = vpop.permute.xlu1 %2505  ;;  %2594 = vrot.lane.b32.xlu0 %v2521_v19, %s4556_s27 }
 0x542   :  { %v2511_v22 = vsel %vm2357_vm2, %v2506_v25, %v2508_v55  ;;  %v2522_v2 = vmul.f32 %v2506_v25, %v2444_v20  ;;  %v2527_v55 = vmul.f32 2.0, %v5184_v16  ;;  %v2529_v25 = vmul.f32 2.0, %v5195_v23 }
 0x543   :  { %v2523_v46 = vmul.f32 %v2511_v22, %v2445_v44  ;;  %v2528_v16 = vmul.f32 2.0, %v5198_v31 }
 0x544   :  { %2596 = vrot.lane.b32.xlu1 %v2522_v2, %s4556_s27  ;;  %v2540_v57 = vpop.permute.xlu0 %2539 }
 0x545   :  { %2598 = vrot.lane.b32.xlu0 %v2523_v46, %s4556_s27  ;;  %v2538_v10 = vpop.permute.xlu1 %2537  ;;  %v2559_v58 = vadd.f32 %v2540_v57, %v5034_v27  ;;  %v2531_v27 = vadd.f32 %v5285_v62, %v2524_v54  ;;  %v2536_v46 = vadd.f32 %v5285_v62, %v2529_v25  ;;  %v3026_v25 = vld [vmem:[#allocation11 + $0xd0] sm:$0xff] }
 0x546   :  { %v2549_v50 = vsel %vm2323_vm3, %v2538_v10, %v2540_v57  ;;  %v2535_v10 = vadd.f32 %v5285_v62, %v2528_v16 }
 0x547   :  { %v2558_v3 = vadd.f32 %v2549_v50, %v5082_v33  ;;  %v2565_v29 = vadd.f32 %v2559_v58, %v5285_v62 }
 0x549   :  { %v2564_v28 = vadd.f32 %v2558_v3, %v5285_v62  ;;  %4398 = vrcp.f32 %v2565_v29 }
 0x54b   :  { %4400 = vrcp.f32 %v2564_v28 }
 0x553   :  { %v4399_v61 = vpop.eup %4398 }
 0x554   :  { %v2577_v8 = vmul.f32 %v4399_v61, %v2532_v53  ;;  %v3009_v53 = vld [vmem:[#allocation11 + $0x48] sm:$0xff] }
 0x555   :  { %v4401_v0 = vpop.eup %4400 }
 0x556   :  { %v2576_v47 = vmul.f32 %v4401_v0, %v2531_v27  ;;  %v3006_v0 = vld [vmem:[#allocation11 + $0x30] sm:$0xff]  ;;  %v3011_v27 = vld [vmem:[#allocation11 + $0x58] sm:$0xff] }
 0x5a3   :  { %v2589_v33 = vpop.permute.xlu1 %2588 }
 0x5a4   :  { %v5293_v41 = vpop.permute.xlu0 %2590 }
 0x5a5   :  { %v5297_v38 = vsel %vm2600_vm6, %v2589_v33, %v5293_v41  ;;  %v2611_v14 = vmul.f32 %v5293_v41, %v2577_v8  ;;  %v4179_v8 = vpack.c.bf16 %v3011_v27, %v3009_v53  ;;  %v3048_v27 = vld [vmem:[#allocation11 + $0x180] sm:$0xff] }
 0x5a6   :  { %v2610_v48 = vmul.f32 %v5297_v38, %v2576_v47  ;;  %v3008_v47 = vld [vmem:[#allocation11 + $0x40] sm:$0xff] }
 0x5a7   :  { %v2542_v32 = vpop.permute.xlu1 %2541  ;;  %3327 = vmatprep.mubr.msk.f32.mxu1 %vm2633_vm7, %v2611_v14  ;;  %v3015_v14 = vld [vmem:[#allocation11 + $0x78] sm:$0xff] }
 0x5a8   :  { %2712 = vmatmul.mubr.f32.vlgmr.msra.gmra.mrb[30].mxu1 %v2610_v48  ;;  %v2544_v12 = vpop.permute.xlu0 %2543 }
 0x5a9   :  { %4133 = vmatpush1.bf16.msra.mxu1 %v5207_v43  ;;  %v2550_v36 = vsel %vm2323_vm3, %v2542_v32, %v2544_v12  ;;  %v2561_v35 = vadd.f32 %v2544_v12, %v5054_v39  ;;  %v3012_v32 = vld [vmem:[#allocation11 + $0x60] sm:$0xff]  ;;  %v3014_v12 = vld [vmem:[#allocation11 + $0x70] sm:$0xff] }
 0x5aa   :  { %v2560_v40 = vadd.f32 %v2550_v36, %v5101_v49  ;;  %4134 = vmatprep.subr.bf16.mxu1 %v4555_v21  ;;  %v3017_v36 = vld [vmem:[#allocation11 + $0x88] sm:$0xff] }
 0x5ab   :  { %v2567_v24 = vadd.f32 %v2561_v35, %v5285_v62  ;;  %v2546_v11 = vpop.permute.xlu1 %2545  ;;  %v3019_v35 = vld [vmem:[#allocation11 + $0x98] sm:$0xff] }
 0x5ac   :  { %v2566_v56 = vadd.f32 %v2560_v40, %v5285_v62  ;;  %v2548_v5 = vpop.permute.xlu0 %2547  ;;  %v4185_v40 = vpack.c.bf16 %v3014_v12, %v3012_v32  ;;  %v3057_v32 = vld [vmem:[#allocation11 + $0x1c8] sm:$0xff]  ;;  %v3059_v12 = vld [vmem:[#allocation11 + $0x1d8] sm:$0xff] }
 0x5ad   :  { %4402 = vrcp.f32 %v2567_v24  ;;  %4136 = vmatpush1.bf16.msra.mxu1 %v5211_v52  ;;  %v2551_v9 = vsel %vm2323_vm3, %v2546_v11, %v2548_v5  ;;  %v2563_v43 = vadd.f32 %v2548_v5, %v5074_v30  ;;  %v2526_v52 = vmul.f32 2.0, %v5187_v18  ;;  %v3016_v11 = vld [vmem:[#allocation11 + $0x80] sm:$0xff] }
 0x5ae   :  { %4404 = vrcp.f32 %v2566_v56  ;;  %v2562_v39 = vadd.f32 %v2551_v9, %v5134_v45  ;;  %4137 = vmatprep.subr.bf16.mxu1 %v4555_v21  ;;  %v2534_v45 = vadd.f32 %v5285_v62, %v2527_v55  ;;  %v4187_v24 = vpack.c.bf16 %v3019_v35, %v3017_v36  ;;  %v3018_v56 = vld [vmem:[#allocation11 + $0x90] sm:$0xff]  ;;  %v3021_v9 = vld [vmem:[#allocation11 + $0xa8] sm:$0xff]  ;;  %v3056_v35 = vld [vmem:[#allocation11 + $0x1c0] sm:$0xff] }
 0x5af   :  { %v2569_v49 = vadd.f32 %v2563_v43, %v5285_v62  ;;  %v4189_v5 = vpack.c.bf16 %v3018_v56, %v3016_v11  ;;  %v3023_v43 = vld [vmem:[#allocation11 + $0xb8] sm:$0xff]  ;;  %v3025_v55 = vld [vmem:[#allocation11 + $0xc8] sm:$0xff]  ;;  %v4227_v36 = vpack.c.bf16 %v3059_v12, %v3057_v32 }
 0x5b0   :  { %v2568_v19 = vadd.f32 %v2562_v39, %v5285_v62  ;;  %v3020_v39 = vld [vmem:[#allocation11 + $0xa0] sm:$0xff]  ;;  %v3061_v11 = vld [vmem:[#allocation11 + $0x1e8] sm:$0xff]  ;;  %v3063_v56 = vld [vmem:[#allocation11 + $0x1f8] sm:$0xff] }
 0x5b1   :  { %4406 = vrcp.f32 %v2569_v49  ;;  %4139 = vmatpush1.bf16.msra.mxu1 %v5218_v63  ;;  %v2533_v63 = vadd.f32 %v5285_v62, %v2526_v52  ;;  %v4191_v49 = vpack.c.bf16 %v3023_v43, %v3021_v9  ;;  %v3027_v52 = vld [vmem:[#allocation11 + $0xd8] sm:$0xff]  ;;  %v3060_v9 = vld [vmem:[#allocation11 + $0x1e0] sm:$0xff]  ;;  %v3062_v43 = vld [vmem:[#allocation11 + $0x1f0] sm:$0xff] }
 0x5b2   :  { %4408 = vrcp.f32 %v2568_v19  ;;  %4140 = vmatprep.subr.bf16.mxu1 %v4555_v21  ;;  %v2593_v30 = vpop.permute.xlu1 %2592  ;;  %v3022_v19 = vld [vmem:[#allocation11 + $0xb0] sm:$0xff] }
 0x5b3   :  { %v2595_v20 = vpop.permute.xlu0 %2594 }
 0x5b5   :  { %4142 = vmatpush1.bf16.msra.mxu1 %v5224_v6  ;;  %v2602_v6 = vsel %vm2600_vm6, %v2593_v30, %v2595_v20  ;;  %v4193_v30 = vpack.c.bf16 %v3022_v19, %v3020_v39  ;;  %v4233_v39 = vpack.c.bf16 %v3062_v43, %v3060_v9  ;;  %v3067_v19 = vld [vmem:[#allocation11 + $0x218] sm:$0xff]  ;;  %v3078_v9 = vld [vmem:[#allocation11 + $0x270] sm:$0xff] }
 0x5b6   :  { %4143 = vmatprep.subr.bf16.mxu1 %v4555_v21  ;;  %v2597_v50 = vpop.permute.xlu1 %2596 }
 0x5b7   :  { %v4403_v44 = vpop.eup %4402  ;;  %v2599_v58 = vpop.permute.xlu0 %2598 }
 0x5b8   :  { %v4405_v22 = vpop.eup %4404  ;;  %v2579_v2 = vmul.f32 %v4403_v44, %v2534_v45  ;;  %v2603_v28 = vsel %vm2600_vm6, %v2597_v50, %v2599_v58  ;;  %v3024_v45 = vld [vmem:[#allocation11 + $0xc0] sm:$0xff]  ;;  %v3029_v44 = vld [vmem:[#allocation11 + $0xe8] sm:$0xff]  ;;  %v3034_v50 = vld [vmem:[#allocation11 + $0x110] sm:$0xff] }
 0x5b9   :  { %4145 = vmatpush1.bf16.msra.mxu1 %v5228_v59  ;;  %v2578_v18 = vmul.f32 %v4405_v22, %v2533_v63  ;;  %v3031_v63 = vld [vmem:[#allocation11 + $0xf8] sm:$0xff]  ;;  %v4197_v16 = vpack.c.bf16 %v3026_v25, %v3024_v45 }
 0x5ba   :  { %v2613_v57 = vmul.f32 %v2595_v20, %v2579_v2  ;;  %4146 = vmatprep.subr.bf16.mxu1 %v4555_v21  ;;  %v4199_v22 = vpack.c.bf16 %v3031_v63, %v3029_v44  ;;  %v3028_v2 = vld [vmem:[#allocation11 + $0xe0] sm:$0xff] }
 0x5bb   :  { %v4407_v23 = vpop.eup %4406  ;;  %v2612_v3 = vmul.f32 %v2602_v6, %v2578_v18  ;;  %v3030_v18 = vld [vmem:[#allocation11 + $0xf0] sm:$0xff] }
 0x5bc   :  { %v4409_v29 = vpop.eup %4408  ;;  %v2581_v31 = vmul.f32 %v4407_v23, %v2536_v46  ;;  %3328 = vmatprep.mubr.msk.f32.mxu1 %vm2633_vm7, %v2613_v57  ;;  %v3033_v46 = vld [vmem:[#allocation11 + $0x108] sm:$0xff]  ;;  %v4201_v57 = vpack.c.bf16 %v3030_v18, %v3028_v2 }
 0x5bd   :  { %4148 = vmatpush1.bf16.msra.mxu1 %v5232_v60  ;;  %v2580_v59 = vmul.f32 %v4409_v29, %v2535_v10  ;;  %v3001_v60 = vld [vmem:[#allocation11 + $0x8] sm:$0xff]  ;;  %v3032_v10 = vld [vmem:[#allocation11 + $0x100] sm:$0xff] }
 0x5be   :  { %v2615_v37 = vmul.f32 %v2599_v58, %v2581_v31  ;;  %2717 = vmatmul.mubr.f32.gmra.mrb[32].mxu1 %v2612_v3  ;;  %4149 = vmatprep.subr.bf16.mxu1 %v4555_v21  ;;  %v3039_v3 = vld [vmem:[#allocation11 + $0x138] sm:$0xff]  ;;  %v4205_v29 = vpack.c.bf16 %v3034_v50, %v3032_v10 }
 0x5bf   :  { %v2614_v54 = vmul.f32 %v2603_v28, %v2580_v59  ;;  %v3036_v59 = vld [vmem:[#allocation11 + $0x120] sm:$0xff] }
 0x5c0   :  { %3329 = vmatprep.mubr.msk.f32.mxu1 %vm2633_vm7, %v2615_v37 }
 0x5c1   :  { %4151 = vmatpush1.bf16.msra.mxu1 %v5236_v26  ;;  %v3003_v26 = vld [vmem:[#allocation11 + $0x18] sm:$0xff] }
 0x5c2   :  { %2722 = vmatmul.mubr.f32.gmra.mrb[34].mxu1 %v2614_v54  ;;  %4152 = vmatprep.subr.bf16.mxu1 %v4555_v21  ;;  %v2840_v21 = vld [vmem:[#allocation9] sm:$0xff]  ;;  %v3041_v54 = vld [vmem:[#allocation11 + $0x148] sm:$0xff] }
 0x5c3   :  { %3331 = vmatprep.mubr.msk.f32.mxu1 %vm2633_vm7, %v5293_v41  ;;  %v3010_v41 = vld [vmem:[#allocation11 + $0x50] sm:$0xff] }
 0x5c5   :  { %4154 = vmatpush1.bf16.msra.mxu1 %v5240_v42  ;;  %v3005_v42 = vld [vmem:[#allocation11 + $0x28] sm:$0xff] }
 0x5c6   :  { %2778 = vmatprep.subr.mxu1 %v4553_v13 }
 0x5c9   :  { %3330 = vmatpush1.msk.msra.mxu1 %vm2643_vm5, %v5245_v15  ;;  %v3007_v15 = vld [vmem:[#allocation11 + $0x38] sm:$0xff] }
 0x5ca   :  { %2811 = vmatmul.mubr.f32.vlgmr.msra.gmra.mrb[36].mxu1 %v5297_v38  ;;  %4156 = vmatprep.subr.bf16.mxu1 %v4799_v4  ;;  %v4171_v4 = vpack.c.bf16 %v3003_v26, %v3001_v60  ;;  %v4175_v61 = vpack.c.bf16 %v3007_v15, %v3005_v42  ;;  %v3013_v38 = vld [vmem:[#allocation11 + $0x68] sm:$0xff]  ;;  %v3040_v26 = vld [vmem:[#allocation11 + $0x140] sm:$0xff] }
 0x5cb   :  { %3332 = vmatprep.mubr.msk.f32.mxu1 %vm2633_vm7, %v2595_v20  ;;  %4158 = vmatpush1.bf16.msra.mxu1 %v4797_v1  ;;  %v2841_v1 = vld [vmem:[#allocation9 + $0x8] sm:$0xff]  ;;  %v4183_v48 = vpack.c.bf16 %v3015_v14, %v3013_v38  ;;  %v4195_v20 = vpack.c.bf16 %v3027_v52, %v3025_v55  ;;  %v3044_v15 = vld [vmem:[#allocation11 + $0x160] sm:$0xff] }
 0x5cc   :  { %4160 = vmatprep.subr.bf16.mxu1 %v4817_v17  ;;  %v3000_v17 = vld [vmem:[#allocation11] sm:$0xff] }
 0x5cd   :  { %v3052_v14 = vld [vmem:[#allocation11 + $0x1a0] sm:$0xff] }
 0x5ce   :  { %2816 = vmatmul.mubr.f32.gmra.mrb[38].mxu1 %v2602_v6  ;;  %v3035_v6 = vld [vmem:[#allocation11 + $0x118] sm:$0xff] }
 0x5cf   :  { %3333 = vmatprep.mubr.msk.f32.mxu1 %vm2633_vm7, %v2599_v58  ;;  %4162 = vmatpush1.bf16.msra.mxu1 %v4804_v7  ;;  %v3002_v7 = vld [vmem:[#allocation11 + $0x10] sm:$0xff]  ;;  %v4203_v23 = vpack.c.bf16 %v3035_v6, %v3033_v46  ;;  %v3037_v58 = vld [vmem:[#allocation11 + $0x128] sm:$0xff] }
 0x5d0   :  { %4164 = vmatprep.subr.bf16.mxu1 %v4823_v34  ;;  %v4173_v62 = vpack.c.bf16 %v3002_v7, %v3000_v17  ;;  %v4207_v31 = vpack.c.bf16 %v3039_v3, %v3037_v58  ;;  %v3045_v17 = vld [vmem:[#allocation11 + $0x168] sm:$0xff]  ;;  %v3047_v7 = vld [vmem:[#allocation11 + $0x178] sm:$0xff] }
 0x5d1   :  { %v4215_v42 = vpack.c.bf16 %v3047_v7, %v3045_v17  ;;  %v3069_v17 = vld [vmem:[#allocation11 + $0x228] sm:$0xff]  ;;  %v3071_v7 = vld [vmem:[#allocation11 + $0x238] sm:$0xff] }
 0x5d2   :  { %2821 = vmatmul.mubr.f32.gmra.mrb[40].mxu1 %v2603_v28  ;;  %v3038_v28 = vld [vmem:[#allocation11 + $0x130] sm:$0xff] }
 0x5d3   :  { %2912 = vmatprep.mubr.f32.mxu1 %v4553_v13  ;;  %v4209_v37 = vpack.c.bf16 %v3038_v28, %v3036_v59 }
 0x5d6   :  { %3334 = vmatmul.mubr.msk.f32.vlgmr.msra.gmra.mrb[42].mxu1 %vm229_vm1, %v2840_v21 }
 0x5d7   :  { %4166 = vmatpush3.bf16.msra.mxu1 %v4823_v34  ;;  %2918 = vmatprep.mubr.f32.mxu1 %v4553_v13  ;;  %v3004_v34 = vld [vmem:[#allocation11 + $0x20] sm:$0xff] }
 0x5d8   :  { %4168 = vmatprep.subr.bf16.mxu1 %v4835_v51  ;;  %v4177_v33 = vpack.c.bf16 %v3006_v0, %v3004_v34  ;;  %v3049_v34 = vld [vmem:[#allocation11 + $0x188] sm:$0xff]  ;;  %v3051_v0 = vld [vmem:[#allocation11 + $0x198] sm:$0xff] }
 0x5d9   :  { %v4219_v53 = vpack.c.bf16 %v3051_v0, %v3049_v34  ;;  %v4239_v34 = vpack.c.bf16 %v3071_v7, %v3069_v17  ;;  %v3068_v0 = vld [vmem:[#allocation11 + $0x220] sm:$0xff] }
 0x5da   :  { %3335 = vmatmul.mubr.msk.f32.gmra.mrb[44].mxu1 %vm229_vm1, %v2841_v1 }
 0x5db   :  { %4170 = vmatpush3.bf16.msra.mxu1 %v4835_v51  ;;  %3352 = vmatprep.mubr.msk.f32.mxu1 %vm229_vm1, %v2840_v21  ;;  %v4181_v51 = vpack.c.bf16 %v3010_v41, %v3008_v47  ;;  %v3043_v21 = vld [vmem:[#allocation11 + $0x158] sm:$0xff]  ;;  %v3053_v47 = vld [vmem:[#allocation11 + $0x1a8] sm:$0xff] }
 0x5dc   :  { %4172 = vmatprep.subr.bf16.mxu1 %v4171_v4  ;;  %v4211_v60 = vpack.c.bf16 %v3043_v21, %v3041_v54  ;;  %v3055_v41 = vld [vmem:[#allocation11 + $0x1b8] sm:$0xff] }
 0x5dd   :  { %v4223_v38 = vpack.c.bf16 %v3055_v41, %v3053_v47 }
 0x5de   :  { %3353 = vmatmul.mubr.msk.f32.vlgmr.msra.gmra.mrb[46].mxu1 %vm229_vm1, %v2841_v1  ;;  %v3042_v1 = vld [vmem:[#allocation11 + $0x150] sm:$0xff] }
 0x5df   :  { %4174 = vmatpush1.bf16.msra.mxu1 %v4173_v62  ;;  %v4213_v4 = vpack.c.bf16 %v3042_v1, %v3040_v26  ;;  %v3046_v62 = vld [vmem:[#allocation11 + $0x170] sm:$0xff]  ;;  %v3064_v26 = vld [vmem:[#allocation11 + $0x200] sm:$0xff] }
 0x5e0   :  { %4176 = vmatprep.subr.bf16.mxu1 %v4175_v61  ;;  %v4217_v61 = vpack.c.bf16 %v3046_v62, %v3044_v15  ;;  %v3066_v1 = vld [vmem:[#allocation11 + $0x210] sm:$0xff] }
 0x5e1   :  { %v4237_v62 = vpack.c.bf16 %v3066_v1, %v3064_v26 }
 0x5e3   :  { %4178 = vmatpush1.bf16.msra.mxu1 %v4177_v33  ;;  %v3050_v33 = vld [vmem:[#allocation11 + $0x190] sm:$0xff] }
 0x5e4   :  { %4180 = vmatprep.subr.bf16.mxu1 %v4179_v8  ;;  %v4221_v8 = vpack.c.bf16 %v3050_v33, %v3048_v27  ;;  %v3073_v33 = vld [vmem:[#allocation11 + $0x248] sm:$0xff] }
 0x5e7   :  { %4182 = vmatpush1.bf16.msra.mxu1 %v4181_v51  ;;  %v3054_v51 = vld [vmem:[#allocation11 + $0x1b0] sm:$0xff] }
 0x5e8   :  { %4184 = vmatprep.subr.bf16.mxu1 %v4183_v48  ;;  %v4225_v48 = vpack.c.bf16 %v3054_v51, %v3052_v14  ;;  %v3072_v51 = vld [vmem:[#allocation11 + $0x240] sm:$0xff] }
 0x5eb   :  { %4186 = vmatpush1.bf16.msra.mxu1 %v4185_v40  ;;  %v3058_v40 = vld [vmem:[#allocation11 + $0x1d0] sm:$0xff] }
 0x5ec   :  { %4188 = vmatprep.subr.bf16.mxu1 %v4187_v24  ;;  %v4229_v24 = vpack.c.bf16 %v3058_v40, %v3056_v35  ;;  %v3079_v35 = vld [vmem:[#allocation11 + $0x278] sm:$0xff] }
 0x5ef   :  { %4190 = vmatpush1.bf16.msra.mxu1 %v4189_v5  ;;  %v4231_v5 = vpack.c.bf16 %v3063_v56, %v3061_v11 }
 0x5f0   :  { %4192 = vmatprep.subr.bf16.mxu1 %v4191_v49  ;;  %v3065_v49 = vld [vmem:[#allocation11 + $0x208] sm:$0xff] }
 0x5f1   :  { %v4235_v55 = vpack.c.bf16 %v3067_v19, %v3065_v49  ;;  %v3081_v49 = vld [vmem:[#allocation11 + $0x288] sm:$0xff]  ;;  %v3083_v19 = vld [vmem:[#allocation11 + $0x298] sm:$0xff] }
 0x5f3   :  { %4194 = vmatpush1.bf16.msra.mxu1 %v4193_v30 }
 0x5f4   :  { %4196 = vmatprep.subr.bf16.mxu1 %v4195_v20 }
 0x5f7   :  { %4198 = vmatpush1.bf16.msra.mxu1 %v4197_v16 }
 0x5f8   :  { %4200 = vmatprep.subr.bf16.mxu1 %v4199_v22 }
 0x5fb   :  { %4202 = vmatpush1.bf16.msra.mxu1 %v4201_v57 }
 0x5fc   :  { %4204 = vmatprep.subr.bf16.mxu1 %v4203_v23 }
 0x5ff   :  { %4206 = vmatpush1.bf16.msra.mxu1 %v4205_v29 }
 0x600   :  { %4208 = vmatprep.subr.bf16.mxu1 %v4207_v31 }
 0x603   :  { %4210 = vmatpush1.bf16.msra.mxu1 %v4209_v37 }
 0x604   :  { %4212 = vmatprep.subr.bf16.mxu1 %v4211_v60 }
 0x607   :  { %4214 = vmatpush1.bf16.msra.mxu1 %v4213_v4 }
 0x608   :  { %4216 = vmatprep.subr.bf16.mxu1 %v4215_v42 }
 0x60b   :  { %4218 = vmatpush1.bf16.msra.mxu1 %v4217_v61 }
 0x60c   :  { %4220 = vmatprep.subr.bf16.mxu1 %v4219_v53  ;;  %v3070_v53 = vld [vmem:[#allocation11 + $0x230] sm:$0xff] }
 0x60d   :  { %v4241_v41 = vpack.c.bf16 %v3070_v53, %v3068_v0 }
 0x60f   :  { %4222 = vmatpush1.bf16.msra.mxu1 %v4221_v8  ;;  %v3075_v8 = vld [vmem:[#allocation11 + $0x258] sm:$0xff] }
 0x610   :  { %4224 = vmatprep.subr.bf16.mxu1 %v4223_v38  ;;  %v4243_v14 = vpack.c.bf16 %v3075_v8, %v3073_v33 }
 0x613   :  { %4226 = vmatpush1.bf16.msra.mxu1 %v4225_v48  ;;  %v3074_v48 = vld [vmem:[#allocation11 + $0x250] sm:$0xff] }
 0x614   :  { %4228 = vmatprep.subr.bf16.mxu1 %v4227_v36  ;;  %v3077_v36 = vld [vmem:[#allocation11 + $0x268] sm:$0xff] }
 0x615   :  { %v4247_v56 = vpack.c.bf16 %v3079_v35, %v3077_v36 }
 0x617   :  { %4230 = vmatpush1.bf16.msra.mxu1 %v4229_v24  ;;  %v4245_v24 = vpack.c.bf16 %v3074_v48, %v3072_v51 }
 0x618   :  { %4232 = vmatprep.subr.bf16.mxu1 %v4231_v5  ;;  %v3076_v5 = vld [vmem:[#allocation11 + $0x260] sm:$0xff] }
 0x61b   :  { %4234 = vmatpush1.bf16.msra.mxu1 %v4233_v39 }
 0x61c   :  { %4236 = vmatprep.subr.bf16.mxu1 %v4235_v55  ;;  %v4249_v55 = vpack.c.bf16 %v3078_v9, %v3076_v5 }
 0x67b   :  { %v2713_v52 = vpop.f32.mrb[30].mxu1 }
 0x67c   :  { %v2715_v30 = vpop.f32.mrb[31].mxu1  ;;  %v2728_v45 = vsel %vm2727_vm8, %v2713_v52, 0.0  ;;  %v4251_v52 = vpack.c.bf16 %v3083_v19, %v3081_v49 }
 0x67d   :  { %v3080_v30 = vld [vmem:[#allocation11 + $0x280] sm:$0xff] }
 0x691   :  { %v2718_v20 = vpop.f32.mrb[32].mxu1 }
 0x692   :  { %v2729_v25 = vsel %vm2727_vm8, %v2718_v20, 0.0  ;;  %v2720_v44 = vpop.f32.mrb[33].mxu1  ;;  %v3082_v20 = vld [vmem:[#allocation11 + $0x290] sm:$0xff] }
 0x693   :  { %v2730_v63 = vadd.f32 %v2729_v25, %v2728_v45  ;;  %v3085_v45 = vld [vmem:[#allocation11 + $0x2a8] sm:$0xff]  ;;  %v3087_v25 = vld [vmem:[#allocation11 + $0x2b8] sm:$0xff]  ;;  %v4253_v44 = vpack.c.bf16 %v3082_v20, %v3080_v30 }
 0x695   :  { %v2723_v16 = vpop.f32.mrb[34].mxu1 }
 0x696   :  { %v2732_v22 = vsel %vm2731_vm9, %v2723_v16, 0.0  ;;  %v2725_v2 = vpop.f32.mrb[35].mxu1  ;;  %v3084_v16 = vld [vmem:[#allocation11 + $0x2a0] sm:$0xff] }
 0x697   :  { %v2733_v18 = vadd.f32 %v2732_v22, %v2730_v63  ;;  %v4255_v63 = vpack.c.bf16 %v3087_v25, %v3085_v45  ;;  %v3086_v22 = vld [vmem:[#allocation11 + $0x2b0] sm:$0xff]  ;;  %v3089_v2 = vld [vmem:[#allocation11 + $0x2c8] sm:$0xff] }
 0x699   :  { %v2734_v46 = vrot.slane %v2733_v18, 4 }
 0x69b   :  { %v2735_v6 = vadd.f32 %v2734_v46, %v2733_v18  ;;  %v3091_v18 = vld [vmem:[#allocation11 + $0x2d8] sm:$0xff]  ;;  %v4257_v46 = vpack.c.bf16 %v3086_v22, %v3084_v16 }
 0x69d   :  { %v2736_v57 = vrot.slane %v2735_v6, 2  ;;  %v2812_v23 = vpop.f32.mrb[36].mxu1 }
 0x69e   :  { %v2814_v10 = vpop.f32.mrb[37].mxu1  ;;  %v2826_v29 = vsel %vm2727_vm8, %v2812_v23, 0.0  ;;  %v3090_v23 = vld [vmem:[#allocation11 + $0x2d0] sm:$0xff] }
 0x69f   :  { %v2737_v50 = vadd.f32 %v2736_v57, %v2735_v6  ;;  %v4259_v6 = vpack.c.bf16 %v3091_v18, %v3089_v2  ;;  %v3088_v57 = vld [vmem:[#allocation11 + $0x2c0] sm:$0xff]  ;;  %v3093_v10 = vld [vmem:[#allocation11 + $0x2e8] sm:$0xff] }
 0x6a1   :  { %v2738_v58 = vrot.slane %v2737_v50, 1  ;;  %v2817_v3 = vpop.f32.mrb[38].mxu1 }
 0x6a2   :  { %v2827_v31 = vsel %vm2727_vm8, %v2817_v3, 0.0  ;;  %v2819_v59 = vpop.f32.mrb[39].mxu1 }
 0x6a3   :  { %v2739_v28 = vadd.f32 %v2738_v58, %v2737_v50  ;;  %v2828_v37 = vadd.f32 %v2827_v31, %v2826_v29  ;;  %v3095_v50 = vld [vmem:[#allocation11 + $0x2f8] sm:$0xff]  ;;  %v4261_v58 = vpack.c.bf16 %v3090_v23, %v3088_v57  ;;  %v3092_v29 = vld [vmem:[#allocation11 + $0x2e0] sm:$0xff]  ;;  %v3094_v31 = vld [vmem:[#allocation11 + $0x2f0] sm:$0xff] }
 0x6a4   :  { %v4263_v3 = vpack.c.bf16 %v3095_v50, %v3093_v10  ;;  %v4265_v59 = vpack.c.bf16 %v3094_v31, %v3092_v29 }
 0x6a5   :  { %2838 = vst.msk [vmem:[%s5402_s8] sm:$0x1] %vm2837_vm10, %v2739_v28  ;;  %v2822_v54 = vpop.f32.mrb[40].mxu1 }
 0x6a6   :  { %v2829_v21 = vsel %vm2731_vm9, %v2822_v54, 0.0  ;;  %v2824_v60 = vpop.f32.mrb[41].mxu1 }
 0x6a7   :  { %v2830_v4 = vadd.f32 %v2829_v21, %v2828_v37 }
 0x6a9   :  { %v2831_v42 = vrot.slane %v2830_v4, 4  ;;  %v2914_v15 = vpop.f32.mrb[42].mxu1 }
 0x6aa   :  { %v2916_v61 = vpop.f32.mrb[43].mxu1 }
 0x6ab   :  { %v2832_v27 = vadd.f32 %v2831_v42, %v2830_v4  ;;  %3160 = vmatprep.mubr.f32.mxu1 %v2916_v61 }
 0x6ac   :  { %3161 = vmatmul.mubr.f32.vlgmr.msra.gmra.mrb[48].mxu1 %v2914_v15 }
 0x6ad   :  { %v2833_v47 = vrot.slane %v2832_v27, 2  ;;  %4238 = vmatpush1.bf16.msra.mxu1 %v4237_v62  ;;  %v2920_v38 = vpop.f32.mrb[44].mxu1 }
 0x6ae   :  { %4240 = vmatprep.subr.bf16.mxu1 %v4239_v34  ;;  %v2922_v32 = vpop.f32.mrb[45].mxu1 }
 0x6af   :  { %v2834_v12 = vadd.f32 %v2833_v47, %v2832_v27  ;;  %3166 = vmatprep.mubr.f32.mxu1 %v2922_v32 }
 0x6b0   :  { %3167 = vmatmul.mubr.f32.gmra.mrb[50].mxu1 %v2920_v38 }
 0x6b1   :  { %v2835_v40 = vrot.slane %v2834_v12, 1  ;;  %4242 = vmatpush1.bf16.msra.mxu1 %v4241_v41  ;;  %v3354_v11 = vpop.f32.mrb[46].mxu1  ;;  %3237 = vmatprep.mubr.f32.mxu1 %v4553_v13 }
 0x6b2   :  { %4244 = vmatprep.subr.bf16.mxu1 %v4243_v14  ;;  %v2991_v43 = vpop.f32.mrb[47].mxu1 }
 0x6b3   :  { %v2836_v39 = vadd.f32 %v2835_v40, %v2834_v12 }
 0x6b5   :  { %2839 = vst.msk [vmem:[%s5403_s9] sm:$0x1] %vm2837_vm10, %v2836_v39  ;;  %4246 = vmatpush1.bf16.msra.mxu1 %v4245_v24 }
 0x6b6   :  { %4248 = vmatprep.subr.bf16.mxu1 %v4247_v56 }
 0x6b9   :  { %4250 = vmatpush1.bf16.msra.mxu1 %v4249_v55 }
 0x6ba   :  { %4252 = vmatprep.subr.bf16.mxu1 %v4251_v52 }
 0x6bd   :  { %4254 = vmatpush1.bf16.msra.mxu1 %v4253_v44 }
 0x6be   :  { %4256 = vmatprep.subr.bf16.mxu1 %v4255_v63 }
 0x6c1   :  { %4258 = vmatpush1.bf16.msra.mxu1 %v4257_v46 }
 0x6c2   :  { %4260 = vmatprep.subr.bf16.mxu1 %v4259_v6 }
 0x6c5   :  { %4262 = vmatpush1.bf16.msra.mxu1 %v4261_v58 }
 0x6c6   :  { %4264 = vmatprep.subr.bf16.mxu1 %v4263_v3 }
 0x6c9   :  { %4266 = vmatpush1.bf16.msra.mxu1 %v4265_v59 }
 0x6cc   :  { %3238 = vmatmul.mubr.f32.vlgmr.msra.gmra.mrb[48].mxu1 %v2991_v43 }
 0x6cd   :  { %3243 = vmatprep.mubr.f32.mxu1 %v4553_v13 }
 0x6d0   :  { %3244 = vmatmul.mubr.f32.gmra.mrb[50].mxu1 %v3354_v11 }
 0x79f   :  { %v3239_v28 = vpop.f32.mrb[48].mxu1 }
 0x7a0   :  { %3250 = vst [vmem:[%s5404_s10] sm:$0xff] %v3239_v28  ;;  %v3241_v37 = vpop.f32.mrb[49].mxu1  ;;  %v3268_v13 = vsel %vm3254_vm11, %v3239_v28, inf  ;;  %v3255_v26 = vsel %vm3254_vm11, %v3239_v28, -inf }
 0x7a1   :  { %3251 = vst.msk [vmem:[%s5404_s10 + $0x8] sm:$0xff] %vm169_vm0, %v3241_v37 }
 0x7a3   :  { %v3245_v54 = vpop.f32.mrb[50].mxu1 }
 0x7a4   :  { %3252 = vst [vmem:[%s5404_s10 + $0x10] sm:$0xff] %v3245_v54  ;;  %v3247_v21 = vpop.f32.mrb[51].mxu1  ;;  %v3269_v60 = vsel %vm3254_vm11, %v3245_v54, inf  ;;  %v3256_v1 = vsel %vm3254_vm11, %v3245_v54, -inf }
 0x7a5   :  { %3253 = vst.msk [vmem:[%s5404_s10 + $0x18] sm:$0xff] %vm169_vm0, %v3247_v21  ;;  %v3270_v4 = vmin.f32 %v3268_v13, %v3269_v60  ;;  %v3257_v17 = vmax.f32 %v3255_v26, %v3256_v1 }
 0x7a7   :  { %3271 = vmin.xlane.f32.xlu0 %v3270_v4  ;;  %3258 = vmax.xlane.f32.xlu1 %v3257_v17 }
 0x834   :  { %v3272_v7 = vpop.xlane.xlu0 %3271  ;;  %v3259_v42 = vpop.xlane.xlu1 %3258 }
 0x835   :  { %v3273_v15 = vrot.slane %v3272_v7, 4  ;;  %v3260_v62 = vrot.slane %v3259_v42, 4 }
 0x837   :  { %v3274_v61 = vmin.f32 %v3272_v7, %v3273_v15  ;;  %v3261_v34 = vmax.f32 %v3259_v42, %v3260_v62 }
 0x839   :  { %v3275_v0 = vrot.slane %v3274_v61, 2  ;;  %v3262_v53 = vrot.slane %v3261_v34, 2 }
 0x83b   :  { %v3276_v27 = vmin.f32 %v3274_v61, %v3275_v0  ;;  %v3263_v33 = vmax.f32 %v3261_v34, %v3262_v53 }
 0x83d   :  { %v3264_v8 = vrot.slane %v3263_v33, 1  ;;  %v3277_v47 = vrot.slane %v3276_v27, 1 }
 0x83f   :  { %v3265_v41 = vmax.f32 %v3263_v33, %v3264_v8  ;;  %v3278_v38 = vmin.f32 %v3276_v27, %v3277_v47 }
 0x841   :  { %4325 = vpush %v3265_v41 }
 0x842   :  { %4327 = vpush %v3278_v38 }
 0x872   :  { %s4326_s10 = spop %4325 }
 0x873   :  { %v3267_v14 = vstv %s4326_s10  ;;  %s4328_s21 = spop %4327 }
 0x874   :  { %v3280_v51 = vstv %s4328_s21 }
 0x875   :  { %v3282_v48 = vsel %vm3281_vm12, %v3267_v14, %v3280_v51 }
 0x876   :  { %3284 = vst.msk [vmem:[%s5405_s11] sm:$0x1] %vm3283_vm13, %v3282_v48 }
 0x877   :  { %3301 = vsyncpa [#allocation5], 1 }
 0x878   :  { %3302 = vsyncpa [#allocation7], 1 }
 0x879   :  { %3303 = vsyncpa [#allocation10], 1 }

</bundles_post_ra>
